<compile_context>
chip_gen: v5e
topology: v5e:2x2
jax: 0.10.0
libtpu: 0.0.40
codegen_flags: <defaults>
</compile_context>

<pallas_src>
import math
from functools import lru_cache, partial

import numpy as np
import jax
import jax.numpy as jnp
from jax.experimental import pallas as pl
from jax.experimental.pallas import tpu as pltpu

F32 = jnp.float32
BF16 = jnp.bfloat16


def _rup(x, m):
    return (x + m - 1) // m * m


# ----------------------------------------------------------------------------
# Pallas kernel: fused 2x-nearest-upsample + conv3x3 + BN(eval) + ReLU
# ----------------------------------------------------------------------------
def _upconv_kernel(x_ref, w_ref, s_ref, t_ref, o_ref, *, TRH, W):
    """One grid step = one (batch, cout-tile, row-band).

    x_ref : (1, Hp+2, W+2, Cin)  bf16 zero-padded input image (whole image, reused)
    w_ref : (4, 4*Cin, TCo)      bf16 per-phase weights, 2x2 taps packed into K
    s_ref : (1, TCo)             f32 folded BN scale
    t_ref : (1, TCo)             f32 folded BN shift (conv bias included)
    o_ref : (4, TRH, W, TCo)     bf16 four output parities for this row band
    """
    m = pl.program_id(2)
    r0 = m * TRH
    Cin = x_ref.shape[-1]
    TCo = o_ref.shape[-1]
    scale = s_ref[...]
    shift = t_ref[...]

    # 9 distinct shifted windows (row offset dr, col offset dc), built once.
    slabs = [[x_ref[0, pl.ds(r0 + dr, TRH), pl.ds(dc, W), :].reshape(TRH * W, Cin)
              for dc in range(3)] for dr in range(3)]

    for a in range(2):            # output row parity: out row = 2*r + a
        for b in range(2):        # output col parity: out col = 2*s + b
            # K-concat of the 4 taps (order matches the host weight packing u*2+v).
            lhs = jnp.concatenate(
                [slabs[a][b], slabs[a][b + 1], slabs[a + 1][b], slabs[a + 1][b + 1]],
                axis=-1)
            acc = jnp.dot(lhs, w_ref[a * 2 + b],
                          preferred_element_type=jnp.float32)
            y = jnp.maximum(acc * scale + shift, 0.0)
            o_ref[a * 2 + b] = y.reshape(TRH, W, TCo).astype(o_ref.dtype)


@lru_cache(maxsize=None)
def _build_upconv(B, Hp, W, Cin, Cp, TCo, TRH):
    Hp2, Wp2 = Hp + 2, W + 2

    # Explicit VMEM budget from actual block / temporary sizes (+ headroom).
    x_blk = Hp2 * Wp2 * Cin * 2                       # bf16 input image block
    w_blk = 4 * (4 * Cin) * TCo * 2                   # bf16 packed weights block
    o_blk = 4 * TRH * W * TCo * 2                     # bf16 output block
    st_blk = 2 * TCo * 4                              # scale + shift blocks
    temps = (9 * TRH * W * Cin * 2                    # 9 slabs (bf16)
             + 4 * TRH * W * (4 * Cin) * 2            # concatenated LHS (bf16)
             + 4 * TRH * W * TCo * 4)                 # f32 accumulators / epilogue
    vmem_bytes = int((2 * (x_blk + w_blk + o_blk + st_blk) + temps) * 1.5) + (1 << 20)
    vmem_bytes = min(max(vmem_bytes, 4 << 20), 100 << 20)

    return pl.pallas_call(
        partial(_upconv_kernel, TRH=TRH, W=W),
        out_shape=jax.ShapeDtypeStruct((B * 4, Hp, W, Cp), BF16),
        grid_spec=pltpu.PrefetchScalarGridSpec(
            num_scalar_prefetch=0,
            grid=(B, Cp // TCo, Hp // TRH),           # row-band innermost
            in_specs=[
                pl.BlockSpec((1, Hp2, Wp2, Cin), lambda bi, j, m: (bi, 0, 0, 0)),
                pl.BlockSpec((4, 4 * Cin, TCo), lambda bi, j, m: (0, 0, j)),
                pl.BlockSpec((1, TCo), lambda bi, j, m: (0, j)),
                pl.BlockSpec((1, TCo), lambda bi, j, m: (0, j)),
            ],
            out_specs=pl.BlockSpec((4, TRH, W, TCo),
                                   lambda bi, j, m: (bi, m, 0, j)),
        ),
        compiler_params=pltpu.CompilerParams(
            dimension_semantics=("parallel", "parallel", "parallel"),
            vmem_limit_bytes=vmem_bytes),
    )


# Row/col mix: 3x3 conv on the 2x nearest-upsampled image == 2x2 convs on the
# original (zero-padded) image, one per output parity:
#   parity 0: tap 0 <- W[0],        tap 1 <- W[1] + W[2]
#   parity 1: tap 0 <- W[0] + W[1], tap 1 <- W[2]
_PHASE_MIX = np.array([[[1., 0., 0.], [0., 1., 1.]],
                       [[1., 1., 0.], [0., 0., 1.]]], np.float32)


def _up_conv_forward(x_nchw, params, eps=1e-5):
    """ReLU(BN_eval(Conv3x3(Upsample2x(x)))); x: (B, Cin, H, W) -> (B, Cout, 2H, 2W)."""
    B, Cin, H, W = x_nchw.shape
    Cout = params['w'].shape[0]

    # Generation-aware cout tiling: N=256 whenever more than one 128-lane tile
    # is needed (full MXU width on v6e/v7x); otherwise a single 128 tile.
    if Cout <= 128:
        Cp, TCo = 128, 128
    else:
        Cp, TCo = _rup(Cout, 256), 256

    # Row-band size: keep the per-phase matmul M = TRH*W near 512-1024 and pad H
    # up to a multiple of TRH (padded rows read zeros; sliced off afterwards).
    TRH = max(1, min(H, 1024 // max(W, 1)))
    Hp = _rup(H, TRH)

    # NCHW -> NHWC (channels on lanes), bf16 for half-sized DMA / MXU feed,
    # 1-px zero pad (the upsampled conv's zero pad folds exactly onto this),
    # plus bottom padding up to Hp.
    x = jnp.transpose(x_nchw, (0, 2, 3, 1)).astype(BF16)
    xp = jnp.pad(x, ((0, 0), (1, 1 + Hp - H), (1, 1), (0, 0)))

    # Fold the upsample into the weights: four phase-dependent 2x2 kernels,
    # then pack the 4 taps into the matmul K dimension -> (4, 4*Cin, Cp).
    w = params['w'].astype(BF16).astype(F32)                      # match MXU operand rounding
    w = jnp.transpose(w, (2, 3, 1, 0))                            # (kh, kw, Cin, Cout)
    A = jnp.asarray(_PHASE_MIX)
    w_eff = jnp.einsum('auk,bvl,klio->abuvio', A, A, w)           # (2,2,2,2,Cin,Cout)
    w_eff = w_eff.reshape(4, 4 * Cin, Cout)                       # K index = tap*Cin + cin
    w_eff = jnp.pad(w_eff, ((0, 0), (0, 0), (0, Cp - Cout))).astype(BF16)

    # Fold BatchNorm (eval, running stats) + conv bias into scale/shift.
    scale = params['bn_g'] * jax.lax.rsqrt(params['bn_v'] + eps)
    shift = (params['b'] - params['bn_m']) * scale + params['bn_b']
    scale = jnp.pad(scale.astype(F32), (0, Cp - Cout)).reshape(1, Cp)
    shift = jnp.pad(shift.astype(F32), (0, Cp - Cout)).reshape(1, Cp)

    out = _build_upconv(B, Hp, W, Cin, Cp, TCo, TRH)(xp, w_eff, scale, shift)

    # (B*4, Hp, W, Cp): row bi*4 + a*2 + b holds out[bi, 2r+a, 2s+b, :].
    out = out[:, :H, :, :Cout].reshape(B, 2, 2, H, W, Cout)
    out = jnp.transpose(out, (0, 3, 1, 4, 2, 5)).reshape(B, 2 * H, 2 * W, Cout)
    return jnp.transpose(out, (0, 3, 1, 2)).astype(F32)           # NCHW, like PyTorch


up_conv_forward = jax.jit(_up_conv_forward)


# ----------------------------------------------------------------------------
# Deterministic parameters + pure-XLA reference
# ----------------------------------------------------------------------------
def init_up_conv_params(key, in_ch, out_ch):
    k1, k2, k3, k4, k5, k6 = jax.random.split(key, 6)
    bound = 1.0 / math.sqrt(in_ch * 9)
    return dict(
        w=jax.random.uniform(k1, (out_ch, in_ch, 3, 3), F32, -bound, bound),
        b=jax.random.uniform(k2, (out_ch,), F32, -bound, bound),
        bn_g=jax.random.uniform(k3, (out_ch,), F32, 0.5, 1.5),
        bn_b=0.1 * jax.random.normal(k4, (out_ch,), F32),
        bn_m=0.1 * jax.random.normal(k5, (out_ch,), F32),
        bn_v=jax.random.uniform(k6, (out_ch,), F32, 0.5, 1.5),
    )


def _reference(x_nchw, p, eps=1e-5):
    # XLA reference with bf16-rounded activations AND weights (like the kernel's
    # MXU operands), f32 math throughout.
    xb = x_nchw.astype(BF16).astype(F32)
    wb = p['w'].astype(BF16).astype(F32)
    up = jnp.repeat(jnp.repeat(xb, 2, axis=2), 2, axis=3)
    z = jax.lax.conv_general_dilated(
        up, wb, window_strides=(1, 1), padding='SAME',
        dimension_numbers=('NCHW', 'OIHW', 'NCHW'),
        preferred_element_type=F32, precision=jax.lax.Precision.HIGHEST)
    z = z + p['b'][None, :, None, None]
    scale = (p['bn_g'] * jax.lax.rsqrt(p['bn_v'] + eps))[None, :, None, None]
    z = (z - p['bn_m'][None, :, None, None]) * scale + p['bn_b'][None, :, None, None]
    return jnp.maximum(z, 0.0)


if __name__ == "__main__":
    B, in_ch, out_ch, H, W = 2, 128, 64, 16, 16
    kx, kp = jax.random.split(jax.random.PRNGKey(0))
    x = jax.random.normal(kx, (B, in_ch, H, W), F32)
    params = init_up_conv_params(kp, in_ch, out_ch)

    out = jax.block_until_ready(up_conv_forward(x, params))

    assert out.shape == (B, out_ch, 2 * H, 2 * W), out.shape
    assert bool(jnp.all(jnp.isfinite(out)))

    ref = jax.block_until_ready(_reference(x, params))
    err = float(jnp.max(jnp.abs(out - ref)))
    tol = 1e-2 * float(jnp.max(jnp.abs(ref))) + 1e-3   # bf16 output-store rounding headroom
    assert err <= tol, f"max |out-ref| = {err} > tol {tol}"
    print("KERNEL_OK")
</pallas_src>

<mosaic_0001>
module attributes {stable_mosaic.version = 11 : i64} {
  func.func @_upconv_kernel(%arg0: i32, %arg1: i32, %arg2: i32, %arg3: memref<1x18x18x128xbf16, #tpu.memory_space<vmem>>, %arg4: memref<4x512x128xbf16, #tpu.memory_space<vmem>>, %arg5: memref<1x128xf32, #tpu.memory_space<vmem>>, %arg6: memref<1x128xf32, #tpu.memory_space<vmem>>, %arg7: memref<4x16x16x128xbf16, #tpu.memory_space<vmem>>) attributes {dimension_semantics = [#tpu.dimension_semantics<parallel>, #tpu.dimension_semantics<parallel>, #tpu.dimension_semantics<parallel>], iteration_bounds = array<i64: 2, 1, 1>, scalar_prefetch = 0 : i64, scratch_operands = 0 : i64, tpu.core_type = #tpu.core_type<tc>, window_params = [{transform_indices = @transform_0, window_bounds = array<i64: 1, 18, 18, 128>}, {transform_indices = @transform_1, window_bounds = array<i64: 4, 512, 128>}, {transform_indices = @transform_2, window_bounds = array<i64: 1, 128>}, {transform_indices = @transform_3, window_bounds = array<i64: 1, 128>}, {transform_indices = @transform_4, window_bounds = array<i64: 4, 16, 16, 128>}]} {
    %c16_i32 = arith.constant 16 : i32
    %0 = arith.muli %arg2, %c16_i32 : i32
    %c0 = arith.constant 0 : index
    %c0_0 = arith.constant 0 : index
    %1 = vector.load %arg5[%c0, %c0_0] : memref<1x128xf32, #tpu.memory_space<vmem>>, vector<1x128xf32>
    %c0_1 = arith.constant 0 : index
    %c0_2 = arith.constant 0 : index
    %2 = vector.load %arg6[%c0_1, %c0_2] : memref<1x128xf32, #tpu.memory_space<vmem>>, vector<1x128xf32>
    %c0_i32 = arith.constant 0 : i32
    %3 = arith.addi %0, %c0_i32 : i32
    %c0_3 = arith.constant 0 : index
    %4 = arith.index_cast %3 : i32 to index
    %c0_4 = arith.constant 0 : index
    %c0_5 = arith.constant 0 : index
    %5 = vector.load %arg3[%c0_3, %4, %c0_4, %c0_5] : memref<1x18x18x128xbf16, #tpu.memory_space<vmem>>, vector<1x16x16x128xbf16>
    %6 = vector.shape_cast %5 : vector<1x16x16x128xbf16> to vector<16x16x128xbf16>
    %7 = vector.shape_cast %6 : vector<16x16x128xbf16> to vector<256x128xbf16>
    %c0_i32_6 = arith.constant 0 : i32
    %8 = arith.addi %0, %c0_i32_6 : i32
    %c0_7 = arith.constant 0 : index
    %9 = arith.index_cast %8 : i32 to index
    %c1 = arith.constant 1 : index
    %c0_8 = arith.constant 0 : index
    %10 = vector.load %arg3[%c0_7, %9, %c1, %c0_8] : memref<1x18x18x128xbf16, #tpu.memory_space<vmem>>, vector<1x16x16x128xbf16>
    %11 = vector.shape_cast %10 : vector<1x16x16x128xbf16> to vector<16x16x128xbf16>
    %12 = vector.shape_cast %11 : vector<16x16x128xbf16> to vector<256x128xbf16>
    %c0_i32_9 = arith.constant 0 : i32
    %13 = arith.addi %0, %c0_i32_9 : i32
    %c0_10 = arith.constant 0 : index
    %14 = arith.index_cast %13 : i32 to index
    %c2 = arith.constant 2 : index
    %c0_11 = arith.constant 0 : index
    %15 = vector.load %arg3[%c0_10, %14, %c2, %c0_11] : memref<1x18x18x128xbf16, #tpu.memory_space<vmem>>, vector<1x16x16x128xbf16>
    %16 = vector.shape_cast %15 : vector<1x16x16x128xbf16> to vector<16x16x128xbf16>
    %17 = vector.shape_cast %16 : vector<16x16x128xbf16> to vector<256x128xbf16>
    %c1_i32 = arith.constant 1 : i32
    %18 = arith.addi %0, %c1_i32 : i32
    %c0_12 = arith.constant 0 : index
    %19 = arith.index_cast %18 : i32 to index
    %c0_13 = arith.constant 0 : index
    %c0_14 = arith.constant 0 : index
    %20 = vector.load %arg3[%c0_12, %19, %c0_13, %c0_14] : memref<1x18x18x128xbf16, #tpu.memory_space<vmem>>, vector<1x16x16x128xbf16>
    %21 = vector.shape_cast %20 : vector<1x16x16x128xbf16> to vector<16x16x128xbf16>
    %22 = vector.shape_cast %21 : vector<16x16x128xbf16> to vector<256x128xbf16>
    %c1_i32_15 = arith.constant 1 : i32
    %23 = arith.addi %0, %c1_i32_15 : i32
    %c0_16 = arith.constant 0 : index
    %24 = arith.index_cast %23 : i32 to index
    %c1_17 = arith.constant 1 : index
    %c0_18 = arith.constant 0 : index
    %25 = vector.load %arg3[%c0_16, %24, %c1_17, %c0_18] : memref<1x18x18x128xbf16, #tpu.memory_space<vmem>>, vector<1x16x16x128xbf16>
    %26 = vector.shape_cast %25 : vector<1x16x16x128xbf16> to vector<16x16x128xbf16>
    %27 = vector.shape_cast %26 : vector<16x16x128xbf16> to vector<256x128xbf16>
    %c1_i32_19 = arith.constant 1 : i32
    %28 = arith.addi %0, %c1_i32_19 : i32
    %c0_20 = arith.constant 0 : index
    %29 = arith.index_cast %28 : i32 to index
    %c2_21 = arith.constant 2 : index
    %c0_22 = arith.constant 0 : index
    %30 = vector.load %arg3[%c0_20, %29, %c2_21, %c0_22] : memref<1x18x18x128xbf16, #tpu.memory_space<vmem>>, vector<1x16x16x128xbf16>
    %31 = vector.shape_cast %30 : vector<1x16x16x128xbf16> to vector<16x16x128xbf16>
    %32 = vector.shape_cast %31 : vector<16x16x128xbf16> to vector<256x128xbf16>
    %c2_i32 = arith.constant 2 : i32
    %33 = arith.addi %0, %c2_i32 : i32
    %c0_23 = arith.constant 0 : index
    %34 = arith.index_cast %33 : i32 to index
    %c0_24 = arith.constant 0 : index
    %c0_25 = arith.constant 0 : index
    %35 = vector.load %arg3[%c0_23, %34, %c0_24, %c0_25] : memref<1x18x18x128xbf16, #tpu.memory_space<vmem>>, vector<1x16x16x128xbf16>
    %36 = vector.shape_cast %35 : vector<1x16x16x128xbf16> to vector<16x16x128xbf16>
    %37 = vector.shape_cast %36 : vector<16x16x128xbf16> to vector<256x128xbf16>
    %c2_i32_26 = arith.constant 2 : i32
    %38 = arith.addi %0, %c2_i32_26 : i32
    %c0_27 = arith.constant 0 : index
    %39 = arith.index_cast %38 : i32 to index
    %c1_28 = arith.constant 1 : index
    %c0_29 = arith.constant 0 : index
    %40 = vector.load %arg3[%c0_27, %39, %c1_28, %c0_29] : memref<1x18x18x128xbf16, #tpu.memory_space<vmem>>, vector<1x16x16x128xbf16>
    %41 = vector.shape_cast %40 : vector<1x16x16x128xbf16> to vector<16x16x128xbf16>
    %42 = vector.shape_cast %41 : vector<16x16x128xbf16> to vector<256x128xbf16>
    %c2_i32_30 = arith.constant 2 : i32
    %43 = arith.addi %0, %c2_i32_30 : i32
    %c0_31 = arith.constant 0 : index
    %44 = arith.index_cast %43 : i32 to index
    %c2_32 = arith.constant 2 : index
    %c0_33 = arith.constant 0 : index
    %45 = vector.load %arg3[%c0_31, %44, %c2_32, %c0_33] : memref<1x18x18x128xbf16, #tpu.memory_space<vmem>>, vector<1x16x16x128xbf16>
    %46 = vector.shape_cast %45 : vector<1x16x16x128xbf16> to vector<16x16x128xbf16>
    %47 = vector.shape_cast %46 : vector<16x16x128xbf16> to vector<256x128xbf16>
    %48 = tpu.concatenate %7, %12, %22, %27 in 1 : vector<256x128xbf16>, vector<256x128xbf16>, vector<256x128xbf16>, vector<256x128xbf16> -> vector<256x512xbf16>
    %c0_34 = arith.constant 0 : index
    %c0_35 = arith.constant 0 : index
    %c0_36 = arith.constant 0 : index
    %49 = vector.load %arg4[%c0_34, %c0_35, %c0_36] : memref<4x512x128xbf16, #tpu.memory_space<vmem>>, vector<1x512x128xbf16>
    %50 = vector.shape_cast %49 : vector<1x512x128xbf16> to vector<512x128xbf16>
    %cst = arith.constant dense<0.000000e+00> : vector<256x128xf32>
    %51 = tpu.matmul %48, %50, %cst {dimension_numbers = #tpu.dot_dimension_numbers<[1], [0], [0], [1], [0, 0, 1, 1], [], []>} : vector<256x512xbf16>, vector<512x128xbf16>, vector<256x128xf32> -> vector<256x128xf32>
    %52 = vector.broadcast %1 : vector<1x128xf32> to vector<256x128xf32>
    %53 = arith.mulf %51, %52 : vector<256x128xf32>
    %54 = vector.broadcast %2 : vector<1x128xf32> to vector<256x128xf32>
    %55 = arith.addf %53, %54 : vector<256x128xf32>
    %cst_37 = arith.constant 0.000000e+00 : f32
    %56 = vector.broadcast %cst_37 : f32 to vector<256x128xf32>
    %57 = arith.maximumf %55, %56 : vector<256x128xf32>
    %58 = vector.shape_cast %57 : vector<256x128xf32> to vector<16x16x128xf32>
    %59 = arith.truncf %58 : vector<16x16x128xf32> to vector<16x16x128xbf16>
    %c0_38 = arith.constant 0 : index
    %c0_39 = arith.constant 0 : index
    %c0_40 = arith.constant 0 : index
    %c0_41 = arith.constant 0 : index
    %60 = vector.load %arg7[%c0_38, %c0_39, %c0_40, %c0_41] : memref<4x16x16x128xbf16, #tpu.memory_space<vmem>>, vector<1x16x16x128xbf16>
    %61 = vector.shape_cast %60 : vector<1x16x16x128xbf16> to vector<16x16x128xbf16>
    %62 = vector.shape_cast %59 : vector<16x16x128xbf16> to vector<1x16x16x128xbf16>
    tpu.vector_store %arg7[%c0_38, %c0_39, %c0_40, %c0_41], %62 {strides = array<i32>} : memref<4x16x16x128xbf16, #tpu.memory_space<vmem>>, vector<1x16x16x128xbf16>,
    %63 = tpu.concatenate %12, %17, %27, %32 in 1 : vector<256x128xbf16>, vector<256x128xbf16>, vector<256x128xbf16>, vector<256x128xbf16> -> vector<256x512xbf16>
    %c1_42 = arith.constant 1 : index
    %c0_43 = arith.constant 0 : index
    %c0_44 = arith.constant 0 : index
    %64 = vector.load %arg4[%c1_42, %c0_43, %c0_44] : memref<4x512x128xbf16, #tpu.memory_space<vmem>>, vector<1x512x128xbf16>
    %65 = vector.shape_cast %64 : vector<1x512x128xbf16> to vector<512x128xbf16>
    %cst_45 = arith.constant dense<0.000000e+00> : vector<256x128xf32>
    %66 = tpu.matmul %63, %65, %cst_45 {dimension_numbers = #tpu.dot_dimension_numbers<[1], [0], [0], [1], [0, 0, 1, 1], [], []>} : vector<256x512xbf16>, vector<512x128xbf16>, vector<256x128xf32> -> vector<256x128xf32>
    %67 = vector.broadcast %1 : vector<1x128xf32> to vector<256x128xf32>
    %68 = arith.mulf %66, %67 : vector<256x128xf32>
    %69 = vector.broadcast %2 : vector<1x128xf32> to vector<256x128xf32>
    %70 = arith.addf %68, %69 : vector<256x128xf32>
    %cst_46 = arith.constant 0.000000e+00 : f32
    %71 = vector.broadcast %cst_46 : f32 to vector<256x128xf32>
    %72 = arith.maximumf %70, %71 : vector<256x128xf32>
    %73 = vector.shape_cast %72 : vector<256x128xf32> to vector<16x16x128xf32>
    %74 = arith.truncf %73 : vector<16x16x128xf32> to vector<16x16x128xbf16>
    %c1_47 = arith.constant 1 : index
    %c0_48 = arith.constant 0 : index
    %c0_49 = arith.constant 0 : index
    %c0_50 = arith.constant 0 : index
    %75 = vector.load %arg7[%c1_47, %c0_48, %c0_49, %c0_50] : memref<4x16x16x128xbf16, #tpu.memory_space<vmem>>, vector<1x16x16x128xbf16>
    %76 = vector.shape_cast %75 : vector<1x16x16x128xbf16> to vector<16x16x128xbf16>
    %77 = vector.shape_cast %74 : vector<16x16x128xbf16> to vector<1x16x16x128xbf16>
    tpu.vector_store %arg7[%c1_47, %c0_48, %c0_49, %c0_50], %77 {strides = array<i32>} : memref<4x16x16x128xbf16, #tpu.memory_space<vmem>>, vector<1x16x16x128xbf16>,
    %78 = tpu.concatenate %22, %27, %37, %42 in 1 : vector<256x128xbf16>, vector<256x128xbf16>, vector<256x128xbf16>, vector<256x128xbf16> -> vector<256x512xbf16>
    %c2_51 = arith.constant 2 : index
    %c0_52 = arith.constant 0 : index
    %c0_53 = arith.constant 0 : index
    %79 = vector.load %arg4[%c2_51, %c0_52, %c0_53] : memref<4x512x128xbf16, #tpu.memory_space<vmem>>, vector<1x512x128xbf16>
    %80 = vector.shape_cast %79 : vector<1x512x128xbf16> to vector<512x128xbf16>
    %cst_54 = arith.constant dense<0.000000e+00> : vector<256x128xf32>
    %81 = tpu.matmul %78, %80, %cst_54 {dimension_numbers = #tpu.dot_dimension_numbers<[1], [0], [0], [1], [0, 0, 1, 1], [], []>} : vector<256x512xbf16>, vector<512x128xbf16>, vector<256x128xf32> -> vector<256x128xf32>
    %82 = vector.broadcast %1 : vector<1x128xf32> to vector<256x128xf32>
    %83 = arith.mulf %81, %82 : vector<256x128xf32>
    %84 = vector.broadcast %2 : vector<1x128xf32> to vector<256x128xf32>
    %85 = arith.addf %83, %84 : vector<256x128xf32>
    %cst_55 = arith.constant 0.000000e+00 : f32
    %86 = vector.broadcast %cst_55 : f32 to vector<256x128xf32>
    %87 = arith.maximumf %85, %86 : vector<256x128xf32>
    %88 = vector.shape_cast %87 : vector<256x128xf32> to vector<16x16x128xf32>
    %89 = arith.truncf %88 : vector<16x16x128xf32> to vector<16x16x128xbf16>
    %c2_56 = arith.constant 2 : index
    %c0_57 = arith.constant 0 : index
    %c0_58 = arith.constant 0 : index
    %c0_59 = arith.constant 0 : index
    %90 = vector.load %arg7[%c2_56, %c0_57, %c0_58, %c0_59] : memref<4x16x16x128xbf16, #tpu.memory_space<vmem>>, vector<1x16x16x128xbf16>
    %91 = vector.shape_cast %90 : vector<1x16x16x128xbf16> to vector<16x16x128xbf16>
    %92 = vector.shape_cast %89 : vector<16x16x128xbf16> to vector<1x16x16x128xbf16>
    tpu.vector_store %arg7[%c2_56, %c0_57, %c0_58, %c0_59], %92 {strides = array<i32>} : memref<4x16x16x128xbf16, #tpu.memory_space<vmem>>, vector<1x16x16x128xbf16>,
    %93 = tpu.concatenate %27, %32, %42, %47 in 1 : vector<256x128xbf16>, vector<256x128xbf16>, vector<256x128xbf16>, vector<256x128xbf16> -> vector<256x512xbf16>
    %c3 = arith.constant 3 : index
    %c0_60 = arith.constant 0 : index
    %c0_61 = arith.constant 0 : index
    %94 = vector.load %arg4[%c3, %c0_60, %c0_61] : memref<4x512x128xbf16, #tpu.memory_space<vmem>>, vector<1x512x128xbf16>
    %95 = vector.shape_cast %94 : vector<1x512x128xbf16> to vector<512x128xbf16>
    %cst_62 = arith.constant dense<0.000000e+00> : vector<256x128xf32>
    %96 = tpu.matmul %93, %95, %cst_62 {dimension_numbers = #tpu.dot_dimension_numbers<[1], [0], [0], [1], [0, 0, 1, 1], [], []>} : vector<256x512xbf16>, vector<512x128xbf16>, vector<256x128xf32> -> vector<256x128xf32>
    %97 = vector.broadcast %1 : vector<1x128xf32> to vector<256x128xf32>
    %98 = arith.mulf %96, %97 : vector<256x128xf32>
    %99 = vector.broadcast %2 : vector<1x128xf32> to vector<256x128xf32>
    %100 = arith.addf %98, %99 : vector<256x128xf32>
    %cst_63 = arith.constant 0.000000e+00 : f32
    %101 = vector.broadcast %cst_63 : f32 to vector<256x128xf32>
    %102 = arith.maximumf %100, %101 : vector<256x128xf32>
    %103 = vector.shape_cast %102 : vector<256x128xf32> to vector<16x16x128xf32>
    %104 = arith.truncf %103 : vector<16x16x128xf32> to vector<16x16x128xbf16>
    %c3_64 = arith.constant 3 : index
    %c0_65 = arith.constant 0 : index
    %c0_66 = arith.constant 0 : index
    %c0_67 = arith.constant 0 : index
    %105 = vector.load %arg7[%c3_64, %c0_65, %c0_66, %c0_67] : memref<4x16x16x128xbf16, #tpu.memory_space<vmem>>, vector<1x16x16x128xbf16>
    %106 = vector.shape_cast %105 : vector<1x16x16x128xbf16> to vector<16x16x128xbf16>
    %107 = vector.shape_cast %104 : vector<16x16x128xbf16> to vector<1x16x16x128xbf16>
    tpu.vector_store %arg7[%c3_64, %c0_65, %c0_66, %c0_67], %107 {strides = array<i32>} : memref<4x16x16x128xbf16, #tpu.memory_space<vmem>>, vector<1x16x16x128xbf16>,
    return
  }
  func.func @transform_0(%arg0: i32, %arg1: i32, %arg2: i32) -> (i32, i32, i32, i32) {
    %c0_i32 = arith.constant 0 : i32
    %c0_i32_0 = arith.constant 0 : i32
    %c0_i32_1 = arith.constant 0 : i32
    %c0_i32_2 = arith.constant 0 : i32
    return %arg0, %c0_i32, %c0_i32_0, %c0_i32_1 : i32, i32, i32, i32
  }
  func.func @transform_1(%arg0: i32, %arg1: i32, %arg2: i32) -> (i32, i32, i32) {
    %c0_i32 = arith.constant 0 : i32
    %c0_i32_0 = arith.constant 0 : i32
    %c0_i32_1 = arith.constant 0 : i32
    return %c0_i32, %c0_i32_0, %arg1 : i32, i32, i32
  }
  func.func @transform_2(%arg0: i32, %arg1: i32, %arg2: i32) -> (i32, i32) {
    %c0_i32 = arith.constant 0 : i32
    %c0_i32_0 = arith.constant 0 : i32
    return %c0_i32, %arg1 : i32, i32
  }
  func.func @transform_3(%arg0: i32, %arg1: i32, %arg2: i32) -> (i32, i32) {
    %c0_i32 = arith.constant 0 : i32
    %c0_i32_0 = arith.constant 0 : i32
    return %c0_i32, %arg1 : i32, i32
  }
  func.func @transform_4(%arg0: i32, %arg1: i32, %arg2: i32) -> (i32, i32, i32, i32) {
    %c0_i32 = arith.constant 0 : i32
    %c0_i32_0 = arith.constant 0 : i32
    return %arg0, %arg2, %c0_i32, %arg1 : i32, i32, i32, i32
  }
}

</mosaic_0001>

<bundles_post_ra>
// kernel: _up_conv_forward.1
= control target key start
LH: loop header
LB: loop body
LE: loop exit
PB: predicated region body
PF: predicated region fallthrough
CT: control target
= control target key end

     0   :  { %s7946_s15 = smov 0   ;;  %s7948_s16 = smov 0   ;;  %s9846_s0 = inlined_call_operand.vmem [shape: bf16[2,18,18,128], index: 0, kind: input, shape index: {}]   ;;  %s9847_s1 = inlined_call_operand.vmem [shape: bf16[4,512,128], index: 1, kind: input, shape index: {}]   ;;  %s9848_s2 = inlined_call_operand.vmem [shape: f32[1,128], index: 2, kind: input, shape index: {}]   ;;  %s9849_s3 = inlined_call_operand.vmem [shape: f32[1,128], index: 3, kind: input, shape index: {}]   ;;  %s9850_s4 = inlined_call_operand.vmem [shape: bf16[8,16,16,128], index: 4, kind: output, shape index: {}]  }
   0x1   :  { %s7950_s17 = smov 0  }
   0x2 LB: > { %s33_s18 = sadd.s32 1, %s7915_s16  ;;  %p6013_p0 = scmp.ge.s32.totalorder %s7919_s17, 1  ;;  %s7919_s17 = sphi %s7950_s17, %s14_s17   ;;  %s7915_s16 = sphi %s7948_s16, %s9907_s16   ;;  %s7911_s15 = sphi %s7946_s15, %s9906_s15  }
   0x3   : > { %p35_p1 = scmp.ge.s32.totalorder %s33_s18, 2  ;;  %p210_p2 = scmp.lt.s32.totalorder %s7919_s17, 3 }
   0x5   : > { %s9909_s18 = smov (%p35_p1, %s33_s18), 0  ;;  %p211_p3 = pnand %p6013_p0, %p210_p2 }
   0x7   : > { %214 = sbr.rel (%p211_p3) target bundleno = 1207 (0x4b7), region = 36 }
   0xc   : > { %v7244_v0 = vld [vmem:[%s9847_s1 + $0x38] sm:$0xff]  ;;  %p255_p4 = scmp.lt.s32.totalorder %s7911_s15, 1  ;;  %v7243_v4 = vld [vmem:[%s9847_s1 + $0x30] sm:$0xff]  ;;  %v7242_v8 = vld [vmem:[%s9847_s1 + $0x28] sm:$0xff]  ;;  %vm340_vm0 = vsmask.f32 3328 }
   0xd   : > { %v7252_v1 = vld [vmem:[%s9847_s1 + $0x78] sm:$0xff]  ;;  %2674 = vmatpush.bf16.msra.mxu0 %v7244_v0  ;;  %v7251_v5 = vld [vmem:[%s9847_s1 + $0x70] sm:$0xff]  ;;  %v7250_v9 = vld [vmem:[%s9847_s1 + $0x68] sm:$0xff]  ;;  %vm341_vm1 = vsmask.f32 7440  ;;  %s6015_s21 = sshll.u32 %s7911_s15, 2 }
   0xe   : > { %v7260_v2 = vld [vmem:[%s9847_s1 + $0xb8] sm:$0xff]  ;;  %2763 = vmatpush.bf16.msra.mxu1 %v7252_v1  ;;  %s256_s5 = scalar_select %p255_p4, %s7911_s15, 1  ;;  %v7259_v6 = vld [vmem:[%s9847_s1 + $0xb0] sm:$0xff]  ;;  %v7258_v10 = vld [vmem:[%s9847_s1 + $0xa8] sm:$0xff]  ;;  %vm791_vm3 = vcmask 1042432   ;;  %vm792_vm4 = vcmask 1046532  }
   0xf   : > { %v7268_v3 = vld [vmem:[%s9847_s1 + $0xf8] sm:$0xff]  ;;  %2852 = vmatpush.bf16.msra.mxu2 %v7260_v2  ;;  %v7267_v7 = vld [vmem:[%s9847_s1 + $0xf0] sm:$0xff]  ;;  %v7266_v11 = vld [vmem:[%s9847_s1 + $0xe8] sm:$0xff]  ;;  %p8375_p5 = scmp.lt.s32.totalorder %s6015_s21, 7 }
  0x10   : > { %2941 = vmatpush.bf16.msra.mxu3 %v7268_v3  ;;  %s7748_s10 = smul.u32 216, %s256_s5  ;;  %v7241_v12 = vld [vmem:[%s9847_s1 + $0x20] sm:$0xff]  ;;  %v7240_v19 = vld [vmem:[%s9847_s1 + $0x18] sm:$0xff]  ;;  %v7239_v38 = vld [vmem:[%s9847_s1 + $0x10] sm:$0xff] }
  0x11   : > { %2675 = vmatpush.bf16.msra.mxu0 %v7243_v4  ;;  %v7249_v13 = vld [vmem:[%s9847_s1 + $0x60] sm:$0xff]  ;;  %v7248_v24 = vld [vmem:[%s9847_s1 + $0x58] sm:$0xff]  ;;  %v7247_v43 = vld [vmem:[%s9847_s1 + $0x50] sm:$0xff]  ;;  %s9911_s21 = smov (!%p8375_p5, %s6015_s21), 7 }
  0x12   : > { %2764 = vmatpush.bf16.msra.mxu1 %v7251_v5  ;;  %s8007_s25 = scalar_lea.vmem %s9846_s0, %s7748_s10  ;;  %v7257_v14 = vld [vmem:[%s9847_s1 + $0xa0] sm:$0xff]  ;;  %v7256_v25 = vld [vmem:[%s9847_s1 + $0x98] sm:$0xff]  ;;  %vm8048_vm2 = vmor %vm340_vm0, %vm341_vm1  ;;  %s7188_s15 = sshll.u32 %s9911_s21, 7 }
  0x13   : > { %2853 = vmatpush.bf16.msra.mxu2 %v7259_v6  ;;  %v7265_v15 = vld [vmem:[%s9847_s1 + $0xe0] sm:$0xff]  ;;  %v324_v18 = vld [vmem:[%s8007_s25 + $0x8] sm:$0x1]  ;;  %v6034_v27 = vld [vmem:[%s8007_s25 + $0xc] sm:$0xf]  ;;  %s8430_s12 = scalar_lea.vmem %s9850_s4, %s7188_s15 }
  0x14   : > { %2942 = vmatpush.bf16.msra.mxu3 %v7267_v7  ;;  %v292_v16 = vld [vmem:[%s8007_s25] sm:$0xf]  ;;  %v293_v17 = vld [vmem:[%s8007_s25 + $0x4] sm:$0xf]  ;;  %v363_v26 = vshll.u32 %v324_v18, 16  ;;  %v7264_v33 = vld [vmem:[%s9847_s1 + $0xd8] sm:$0xff] }
  0x15   : > { %2676 = vmatpush.bf16.msra.mxu0 %v7242_v8  ;;  %v344_v20 = vshrl.u32 %v292_v16, 16  ;;  %v347_v21 = vshll.u32 %v292_v16, 16  ;;  %v353_v22 = vshll.u32 %v293_v17, 16  ;;  %v357_v23 = vshrl.u32 %v293_v17, 16  ;;  %v6035_v32 = vld [vmem:[%s8007_s25 + $0x10] sm:$0xf]  ;;  %vm8602_vm5 = vmor %vm791_vm3, %vm792_vm4 }
  0x16   : > { %2765 = vmatpush.bf16.msra.mxu1 %v7250_v9  ;;  %v6066_v34 = vld [vmem:[%s8007_s25 + $0x14] sm:$0x1]  ;;  %v959_v35 = vshrl.u32 %v6034_v27, 16  ;;  %v962_v36 = vshll.u32 %v6034_v27, 16  ;;  %v968_v37 = vshll.u32 %v6035_v32, 16  ;;  %v972_v41 = vshrl.u32 %v6035_v32, 16 }
  0x17   : > { %2854 = vmatpush.bf16.msra.mxu2 %v7258_v10  ;;  %v346_v28 = vrot.slane %v344_v20, 4  ;;  %v349_v29 = vrot.slane %v347_v21, 5  ;;  %v355_v30 = vrot.slane %v353_v22, 5  ;;  %v359_v31 = vrot.slane %v357_v23, 4  ;;  %v294_v47 = vld [vmem:[%s8007_s25 + $0xc] sm:$0xf] }
  0x18   : > { %2943 = vmatpush.bf16.msra.mxu3 %v7266_v11  ;;  %v978_v42 = vshll.u32 %v6066_v34, 16  ;;  %v961_v44 = vrot.slane %v959_v35, 4  ;;  %v964_v45 = vrot.slane %v962_v36, 5  ;;  %v970_v46 = vrot.slane %v968_v37, 5  ;;  %v295_v53 = vld [vmem:[%s8007_s25 + $0x10] sm:$0xf] }
  0x19   : > { %2677 = vmatpush.bf16.msra.mxu0 %v7241_v12  ;;  %v350_v39 = vor.u32 %v349_v29, %v346_v28  ;;  %v360_v40 = vor.u32 %v359_v31, %v355_v30  ;;  %v365_v51 = vrot.slane %v363_v26, 5  ;;  %v974_v52 = vrot.slane %v972_v41, 4  ;;  %v7255_v54 = vld [vmem:[%s9847_s1 + $0x90] sm:$0xff]  ;;  %v6036_v61 = vld [vmem:[%s8007_s25 + $0x18] sm:$0xf]  ;;  %v7238_v2 = vld [vmem:[%s9847_s1 + $0x8] sm:$0xff] }
  0x1a   : > { %2766 = vmatpush.bf16.msra.mxu1 %v7249_v13  ;;  %v7263_v55 = vld [vmem:[%s9847_s1 + $0xd0] sm:$0xff]  ;;  %v965_v56 = vor.u32 %v964_v45, %v961_v44  ;;  %v980_v58 = vrot.slane %v978_v42, 5  ;;  %v368_v59 = vshrl.u32 %v294_v47, 16  ;;  %v371_v60 = vshll.u32 %v294_v47, 16  ;;  %v7246_v3 = vld [vmem:[%s9847_s1 + $0x48] sm:$0xff]  ;;  %v7245_v20 = vld [vmem:[%s9847_s1 + $0x40] sm:$0xff] }
  0x1b   : > { %2855 = vmatpush.bf16.msra.mxu2 %v7257_v14  ;;  %v351_v49 = vrot.slane %v350_v39, 4  ;;  %v361_v50 = vrot.slane %v360_v40, 4  ;;  %v975_v57 = vor.u32 %v974_v52, %v970_v46  ;;  %v377_v0 = vshll.u32 %v295_v53, 16  ;;  %v7254_v6 = vld [vmem:[%s9847_s1 + $0x88] sm:$0xff]  ;;  %v6037_v9 = vld [vmem:[%s8007_s25 + $0x1c] sm:$0xf] }
  0x1c   : > { %2944 = vmatpush.bf16.msra.mxu3 %v7265_v15  ;;  %v966_v63 = vrot.slane %v965_v56, 4  ;;  %v381_v1 = vshrl.u32 %v295_v53, 16  ;;  %v7262_v7 = vld [vmem:[%s9847_s1 + $0xc8] sm:$0xff]  ;;  %v983_v10 = vshrl.u32 %v6036_v61, 16  ;;  %v370_v13 = vrot.slane %v368_v59, 4  ;;  %v7253_v26 = vld [vmem:[%s9847_s1 + $0x80] sm:$0xff] }
  0x1d   : > { %2678 = vmatpush.bf16.msra.mxu0 %v7240_v19  ;;  %v356_v62 = vsel %vm8048_vm2, %v351_v49, %v355_v30  ;;  %v366_v4 = vsel %vm8048_vm2, %v361_v50, %v365_v51  ;;  %v976_v5 = vrot.slane %v975_v57, 4  ;;  %v373_v14 = vrot.slane %v371_v60, 5  ;;  %v7237_v19 = vld [vmem:[%s9847_s1] sm:$0xff]  ;;  %v325_v23 = vld [vmem:[%s8007_s25 + $0x14] sm:$0x1]  ;;  %v7292_v30 = vld [vmem:[%s9847_s1 + $0x1b8] sm:$0xff] }
  0x1e   : > { %2767 = vmatpush.bf16.msra.mxu1 %v7248_v24  ;;  %v971_v8 = vsel %vm8048_vm2, %v966_v63, %v970_v46  ;;  %v2210_v11 = vunpack.c.l.b16 %v356_v62  ;;  %v2211_v15 = vunpack.c.l.b16 %v366_v4  ;;  %v8081_v16 = vrot.slane %v377_v0, 5  ;;  %v7261_v27 = vld [vmem:[%s9847_s1 + $0xc0] sm:$0xff]  ;;  %v7300_v31 = vld [vmem:[%s9847_s1 + $0x1f8] sm:$0xff]  ;;  %v7205_v40 = vld [vmem:[%s8007_s25 + $0xc] sm:$0xff] }
  0x1f   : > { %2856 = vmatpush.bf16.msra.mxu2 %v7256_v25  ;;  %v981_v12 = vsel %vm8048_vm2, %v976_v5, %v980_v58  ;;  %v383_v17 = vrot.slane %v381_v1, 4  ;;  %v986_v18 = vshll.u32 %v6036_v61, 16  ;;  %v2354_v21 = vunpack.c.l.b16 %v971_v8  ;;  %v7189_v36 = vld [vmem:[%s8007_s25] sm:$0xff]  ;;  %v7276_v42 = vld [vmem:[%s9847_s1 + $0x138] sm:$0xff]  ;;  %v7275_v59 = vld [vmem:[%s9847_s1 + $0x130] sm:$0xff] }
  0x20   : > { %2945 = vmatpush.bf16.msra.mxu3 %v7264_v33  ;;  %v2355_v22 = vunpack.c.l.b16 %v981_v12  ;;  %v992_v24 = vshll.u32 %v6037_v9, 16  ;;  %v996_v25 = vshrl.u32 %v6037_v9, 16  ;;  %v985_v28 = vrot.slane %v983_v10, 4  ;;  %v6067_v33 = vld [vmem:[%s8007_s25 + $0x20] sm:$0x1]  ;;  %v7283_v60 = vld [vmem:[%s9847_s1 + $0x170] sm:$0xff] }
  0x21   : > { %2679 = vmatpush.bf16.msra.mxu0 %v7239_v38  ;;  %v988_v29 = vrot.slane %v986_v18, 5  ;;  %v374_v32 = vor.u32 %v373_v14, %v370_v13  ;;  %v8104_v37 = vpack.c.b16 %v2211_v15, %v2210_v11  ;;  %v384_v38 = vor.u32 %v383_v17, %v8081_v16  ;;  %v296_v51 = vld [vmem:[%s8007_s25 + $0x18] sm:$0xf]  ;;  %v297_v52 = vld [vmem:[%s8007_s25 + $0x1c] sm:$0xf] }
  0x22   : > { %2768 = vmatpush.bf16.msra.mxu1 %v7247_v43  ;;  %v994_v34 = vrot.slane %v992_v24, 5  ;;  %v998_v35 = vrot.slane %v996_v25, 4  ;;  %v387_v39 = vshll.u32 %v325_v23, 16  ;;  %v8108_v41 = vpack.c.b16 %v2355_v22, %v2354_v21  ;;  %v7284_v43 = vld [vmem:[%s9847_s1 + $0x178] sm:$0xff]  ;;  %v6038_v53 = vld [vmem:[%s8007_s25 + $0x24] sm:$0xf] }
  0x23   : > { %2857 = vmatpush.bf16.msra.mxu2 %v7255_v54  ;;  %v989_v44 = vor.u32 %v988_v29, %v985_v28  ;;  %v1002_v46 = vshll.u32 %v6067_v33, 16  ;;  %v375_v47 = vrot.slane %v374_v32, 4  ;;  %v385_v49 = vrot.slane %v384_v38, 4  ;;  %v7291_v54 = vld [vmem:[%s9847_s1 + $0x1b0] sm:$0xff]  ;;  %v6039_v63 = vld [vmem:[%s8007_s25 + $0x28] sm:$0xf] }
  0x24   : > { %2946 = vmatpush.bf16.msra.mxu3 %v7263_v55  ;;  %v999_v45 = vor.u32 %v998_v35, %v994_v34  ;;  %v389_v50 = vrot.slane %v387_v39, 5  ;;  %v7299_v55 = vld [vmem:[%s9847_s1 + $0x1f0] sm:$0xff]  ;;  %v392_v62 = vshrl.u32 %v296_v51, 16  ;;  %v395_v1 = vshll.u32 %v296_v51, 16  ;;  %v326_v18 = vld [vmem:[%s8007_s25 + $0x20] sm:$0x1] }
  0x25   : > { %2680 = vmatpush.bf16.msra.mxu0 %v7238_v2  ;;  %v990_v56 = vrot.slane %v989_v44, 4  ;;  %v1004_v58 = vrot.slane %v1002_v46, 5  ;;  %v380_v61 = vsel %vm8048_vm2, %v375_v47, %v8081_v16  ;;  %v401_v2 = vshll.u32 %v297_v52, 16  ;;  %v6068_v21 = vld [vmem:[%s8007_s25 + $0x2c] sm:$0x1]  ;;  %v7206_v28 = vld [vmem:[%s8007_s25 + $0x18] sm:$0xff] }
  0x26   : > { %2769 = vmatpush.bf16.msra.mxu1 %v7246_v3  ;;  %v1000_v57 = vrot.slane %v999_v45, 4  ;;  %v390_v0 = vsel %vm8048_vm2, %v385_v49, %v389_v50  ;;  %v405_v3 = vshrl.u32 %v297_v52, 16  ;;  %v1007_v4 = vshrl.u32 %v6038_v53, 16  ;;  %v7190_v24 = vld [vmem:[%s8007_s25 + $0xc] sm:$0xff]  ;;  %v299_v35 = vld [vmem:[%s8007_s25 + $0x28] sm:$0xf] }
  0x27   : > { %2858 = vmatpush.bf16.msra.mxu2 %v7254_v6  ;;  %v1010_v5 = vshll.u32 %v6038_v53, 16  ;;  %v995_v6 = vsel %vm8048_vm2, %v990_v56, %v994_v34  ;;  %v1016_v8 = vshll.u32 %v6039_v63, 16  ;;  %v1020_v9 = vshrl.u32 %v6039_v63, 16  ;;  %v298_v34 = vld [vmem:[%s8007_s25 + $0x24] sm:$0xf] }
  0x28   : > { %2947 = vmatpush.bf16.msra.mxu3 %v7262_v7  ;;  %v1005_v7 = vsel %vm8048_vm2, %v1000_v57, %v1004_v58  ;;  %v2212_v10 = vunpack.c.l.b16 %v380_v61  ;;  %v2213_v11 = vunpack.c.l.b16 %v390_v0  ;;  %v394_v12 = vrot.slane %v392_v62, 4  ;;  %v6040_v39 = vld [vmem:[%s8007_s25 + $0x30] sm:$0xf]  ;;  %v327_v63 = vld [vmem:[%s8007_s25 + $0x2c] sm:$0x1] }
  0x29   : > { %2681 = vmatpush.bf16.msra.mxu0 %v7237_v19  ;;  %v397_v13 = vrot.slane %v395_v1, 5  ;;  %v403_v14 = vrot.slane %v401_v2, 5  ;;  %v407_v15 = vrot.slane %v405_v3, 4  ;;  %v2356_v16 = vunpack.c.l.b16 %v995_v6  ;;  %v6069_v6 = vld [vmem:[%s8007_s25 + $0x38] sm:$0x1] }
  0x2a   : > { %2770 = vmatpush.bf16.msra.mxu1 %v7245_v20  ;;  %v2357_v17 = vunpack.c.l.b16 %v1005_v7  ;;  %v1009_v19 = vrot.slane %v1007_v4, 4  ;;  %v1012_v20 = vrot.slane %v1010_v5, 5  ;;  %v1018_v22 = vrot.slane %v1016_v8, 5 }
  0x2b   : > { %2859 = vmatpush.bf16.msra.mxu2 %v7253_v26  ;;  %v1022_v23 = vrot.slane %v1020_v9, 4  ;;  %v8146_v25 = vpack.c.b16 %v2213_v11, %v2212_v10  ;;  %v398_v26 = vor.u32 %v397_v13, %v394_v12  ;;  %v1026_v32 = vshll.u32 %v6068_v21, 16 }
  0x2c   : > { %2948 = vmatpush.bf16.msra.mxu3 %v7261_v27  ;;  %2682 = vmatmul.bf16.vlgmr.msra.gmra.mxu0 %v7189_v36  ;;  %v411_v27 = vshll.u32 %v326_v18, 16  ;;  %v8149_v29 = vpack.c.b16 %v2357_v17, %v2356_v16  ;;  %v416_v45 = vshrl.u32 %v298_v34, 16  ;;  %v419_v47 = vshll.u32 %v298_v34, 16  ;;  %v7207_v17 = vld [vmem:[%s8007_s25 + $0x24] sm:$0xff]  ;;  %v6043_v34 = vld [vmem:[%s8007_s25 + $0x40] sm:$0xf] }
  0x2d   : > { %2771 = vmatmul.bf16.vlgmr.msra.gmra.mxu1 %v8104_v37  ;;  %3581 = vmatpush.bf16.msrb.mxu0 %v7276_v42  ;;  %v1023_v33 = vor.u32 %v1022_v23, %v1018_v22  ;;  %v399_v36 = vrot.slane %v398_v26, 4  ;;  %v1028_v44 = vrot.slane %v1026_v32, 5  ;;  %v425_v49 = vshll.u32 %v299_v35, 16  ;;  %v300_v26 = vld [vmem:[%s8007_s25 + $0x30] sm:$0xf] }
  0x2e   : > { %2860 = vmatmul.bf16.vlgmr.msra.gmra.mxu2 %v7205_v40  ;;  %3670 = vmatpush.bf16.msrb.mxu1 %v7284_v43  ;;  %v413_v38 = vrot.slane %v411_v27, 5  ;;  %v6041_v40 = vld [vmem:[%s8007_s25 + $0x34] sm:$0xf]  ;;  %v429_v50 = vshrl.u32 %v299_v35, 16  ;;  %v1031_v51 = vshrl.u32 %v6040_v39, 16  ;;  %v1034_v52 = vshll.u32 %v6040_v39, 16 }
  0x2f   : > { %3759 = vmatpush.bf16.msrb.mxu2 %v7292_v30  ;;  %2949 = vmatmul.bf16.vlgmr.msra.gmra.mxu3 %v8108_v41  ;;  %v408_v30 = vor.u32 %v407_v15, %v403_v14  ;;  %v1024_v46 = vrot.slane %v1023_v33, 4  ;;  %v1040_v53 = vshll.u32 %v6041_v40, 16  ;;  %v418_v58 = vrot.slane %v416_v45, 4  ;;  %v7191_v15 = vld [vmem:[%s8007_s25 + $0x18] sm:$0xff]  ;;  %v301_v27 = vld [vmem:[%s8007_s25 + $0x34] sm:$0xf] }
  0x30   : > { %3848 = vmatpush.bf16.msrb.mxu3 %v7300_v31  ;;  %v1013_v31 = vor.u32 %v1012_v20, %v1009_v19  ;;  %v427_v61 = vrot.slane %v425_v49, 5  ;;  %v431_v62 = vrot.slane %v429_v50, 4  ;;  %v1033_v0 = vrot.slane %v1031_v51, 4  ;;  %v6042_v33 = vld [vmem:[%s8007_s25 + $0x3c] sm:$0xf]  ;;  %v7282_v35 = vld [vmem:[%s9847_s1 + $0x168] sm:$0xff] }
  0x31   : > { %3582 = vmatpush.bf16.msrb.mxu0 %v7275_v59  ;;  %v409_v42 = vrot.slane %v408_v30, 4  ;;  %v1029_v59 = vsel %vm8048_vm2, %v1024_v46, %v1028_v44  ;;  %v1036_v1 = vrot.slane %v1034_v52, 5  ;;  %v1042_v2 = vrot.slane %v1040_v53, 5  ;;  %v7298_v30 = vld [vmem:[%s9847_s1 + $0x1e8] sm:$0xff] }
  0x32   : > { %3671 = vmatpush.bf16.msrb.mxu1 %v7283_v60  ;;  %v1014_v43 = vrot.slane %v1013_v31, 4  ;;  %v421_v60 = vrot.slane %v419_v47, 5  ;;  %v2359_v8 = vunpack.c.l.b16 %v1029_v59  ;;  %v435_v10 = vshll.u32 %v327_v63, 16  ;;  %v7274_v31 = vld [vmem:[%s9847_s1 + $0x128] sm:$0xff]  ;;  %v6070_v63 = vld [vmem:[%s8007_s25 + $0x44] sm:$0x1] }
  0x33   : > { %3760 = vmatpush.bf16.msrb.mxu2 %v7291_v54  ;;  %v1044_v54 = vshrl.u32 %v6041_v40, 16  ;;  %v414_v56 = vsel %vm8048_vm2, %v409_v42, %v413_v38  ;;  %v432_v11 = vor.u32 %v431_v62, %v427_v61  ;;  %v1037_v12 = vor.u32 %v1036_v1, %v1033_v0  ;;  %v7192_v0 = vld [vmem:[%s8007_s25 + $0x24] sm:$0xff] }
  0x34   : > { %3849 = vmatpush.bf16.msrb.mxu3 %v7299_v55  ;;  %v404_v55 = vsel %vm8048_vm2, %v399_v36, %v403_v14  ;;  %v1019_v57 = vsel %vm8048_vm2, %v1014_v43, %v1018_v22  ;;  %v2215_v5 = vunpack.c.l.b16 %v414_v56  ;;  %v422_v9 = vor.u32 %v421_v60, %v418_v58  ;;  %v328_v58 = vld [vmem:[%s8007_s25 + $0x38] sm:$0x1] }
  0x35   : > { %v1046_v3 = vrot.slane %v1044_v54, 4  ;;  %v2214_v4 = vunpack.c.l.b16 %v404_v55  ;;  %v2358_v7 = vunpack.c.l.b16 %v1019_v57  ;;  %v1050_v14 = vshll.u32 %v6069_v6, 16  ;;  %3583 = vmatpush.bf16.msrb.mxu0 %v7274_v31 }
  0x36   : > { %v423_v19 = vrot.slane %v422_v9, 4  ;;  %v437_v20 = vrot.slane %v435_v10, 5  ;;  %v433_v21 = vrot.slane %v432_v11, 4  ;;  %v1038_v22 = vrot.slane %v1037_v12, 4  ;;  %3672 = vmatpush.bf16.msrb.mxu1 %v7282_v35  ;;  %v302_v10 = vld [vmem:[%s8007_s25 + $0x3c] sm:$0xf] }
  0x37   : > { %v1047_v13 = vor.u32 %v1046_v3, %v1042_v2  ;;  %v8168_v16 = vpack.c.b16 %v2215_v5, %v2214_v4  ;;  %v8171_v18 = vpack.c.b16 %v2359_v8, %v2358_v7  ;;  %v440_v40 = vshrl.u32 %v300_v26, 16  ;;  %v7208_v5 = vld [vmem:[%s8007_s25 + $0x30] sm:$0xff]  ;;  %v303_v11 = vld [vmem:[%s8007_s25 + $0x40] sm:$0xf] }
  0x38   : > { %v428_v32 = vsel %vm8048_vm2, %v423_v19, %v427_v61  ;;  %v438_v36 = vsel %vm8048_vm2, %v433_v21, %v437_v20  ;;  %v1043_v38 = vsel %vm8048_vm2, %v1038_v22, %v1042_v2  ;;  %3850 = vmatpush.bf16.msrb.mxu3 %v7298_v30  ;;  %v443_v42 = vshll.u32 %v300_v26, 16 }
  0x39   : > { %v1048_v23 = vrot.slane %v1047_v13, 4  ;;  %v449_v43 = vshll.u32 %v301_v27, 16  ;;  %v453_v44 = vshrl.u32 %v301_v27, 16  ;;  %v1055_v45 = vshrl.u32 %v6042_v33, 16 }
  0x3a   : > { %v1058_v46 = vshll.u32 %v6042_v33, 16  ;;  %v1064_v47 = vshll.u32 %v6043_v34, 16  ;;  %v1068_v49 = vshrl.u32 %v6043_v34, 16  ;;  %v2216_v50 = vunpack.c.l.b16 %v428_v32 }
  0x3b   : > { %v2217_v51 = vunpack.c.l.b16 %v438_v36  ;;  %v2360_v52 = vunpack.c.l.b16 %v1043_v38  ;;  %v442_v54 = vrot.slane %v440_v40, 4  ;;  %v445_v55 = vrot.slane %v443_v42, 5  ;;  %v329_v42 = vld [vmem:[%s8007_s25 + $0x44] sm:$0x1] }
  0x3c   : > { %2687 = vmatmul.bf16.gmra.mxu0 %v7190_v24  ;;  %v1052_v24 = vrot.slane %v1050_v14, 5  ;;  %v451_v56 = vrot.slane %v449_v43, 5  ;;  %v455_v57 = vrot.slane %v453_v44, 4  ;;  %v1057_v59 = vrot.slane %v1055_v45, 4  ;;  %v6044_v14 = vld [vmem:[%s8007_s25 + $0x48] sm:$0xf] }
  0x3d   : > { %2776 = vmatmul.bf16.gmra.mxu1 %v8146_v25  ;;  %v1060_v60 = vrot.slane %v1058_v46, 5  ;;  %v1066_v61 = vrot.slane %v1064_v47, 5  ;;  %v1070_v62 = vrot.slane %v1068_v49, 4  ;;  %v8202_v1 = vpack.c.b16 %v2217_v51, %v2216_v50  ;;  %v6071_v50 = vld [vmem:[%s8007_s25 + $0x50] sm:$0x1] }
  0x3e   : > { %2865 = vmatmul.bf16.gmra.mxu2 %v7206_v28  ;;  %v7290_v28 = vld [vmem:[%s9847_s1 + $0x1a8] sm:$0xff]  ;;  %v1053_v39 = vsel %vm8048_vm2, %v1048_v23, %v1052_v24  ;;  %v446_v3 = vor.u32 %v445_v55, %v442_v54  ;;  %v459_v4 = vshll.u32 %v328_v58, 16  ;;  %v456_v6 = vor.u32 %v455_v57, %v451_v56 }
  0x3f   : > { %2954 = vmatmul.bf16.gmra.mxu3 %v8149_v29  ;;  %3761 = vmatpush.bf16.msrb.mxu2 %v7290_v28  ;;  %v2361_v53 = vunpack.c.l.b16 %v1053_v39  ;;  %v1061_v7 = vor.u32 %v1060_v60, %v1057_v59  ;;  %v1071_v8 = vor.u32 %v1070_v62, %v1066_v61  ;;  %v1074_v9 = vshll.u32 %v6070_v63, 16  ;;  %v7193_v59 = vld [vmem:[%s8007_s25 + $0x30] sm:$0xff] }
  0x40   : > { %v447_v12 = vrot.slane %v446_v3, 4  ;;  %v461_v13 = vrot.slane %v459_v4, 5  ;;  %v464_v22 = vshrl.u32 %v302_v10, 16  ;;  %v467_v23 = vshll.u32 %v302_v10, 16  ;;  %v7297_v10 = vld [vmem:[%s9847_s1 + $0x1e0] sm:$0xff] }
  0x41   : > { %v8204_v2 = vpack.c.b16 %v2361_v53, %v2360_v52  ;;  %v1062_v19 = vrot.slane %v1061_v7, 4  ;;  %v1072_v20 = vrot.slane %v1071_v8, 4  ;;  %v1076_v21 = vrot.slane %v1074_v9, 5  ;;  %v304_v7 = vld [vmem:[%s8007_s25 + $0x48] sm:$0xf]  ;;  %v7289_v9 = vld [vmem:[%s9847_s1 + $0x1a0] sm:$0xff]  ;;  %3851 = vmatpush.bf16.msrb.mxu3 %v7297_v10 }
  0x42   : > { %v473_v24 = vshll.u32 %v303_v11, 16  ;;  %v477_v26 = vshrl.u32 %v303_v11, 16  ;;  %v1079_v27 = vshrl.u32 %v6044_v14, 16  ;;  %v1082_v28 = vshll.u32 %v6044_v14, 16  ;;  %v305_v8 = vld [vmem:[%s8007_s25 + $0x4c] sm:$0xf] }
  0x43   : > { %v452_v32 = vsel %vm8048_vm2, %v447_v12, %v451_v56  ;;  %v1067_v34 = vsel %vm8048_vm2, %v1062_v19, %v1066_v61  ;;  %v1077_v35 = vsel %vm8048_vm2, %v1072_v20, %v1076_v21  ;;  %v466_v36 = vrot.slane %v464_v22, 4  ;;  %v7209_v61 = vld [vmem:[%s8007_s25 + $0x3c] sm:$0xff]  ;;  %v6047_v14 = vld [vmem:[%s8007_s25 + $0x58] sm:$0xf]  ;;  %3762 = vmatpush.bf16.msrb.mxu2 %v7289_v9 }
  0x44   : > { %v469_v38 = vrot.slane %v467_v23, 5  ;;  %v475_v39 = vrot.slane %v473_v24, 5  ;;  %v479_v40 = vrot.slane %v477_v26, 4  ;;  %v1081_v43 = vrot.slane %v1079_v27, 4  ;;  %v7273_v11 = vld [vmem:[%s9847_s1 + $0x120] sm:$0xff] }
  0x45   : > { %v1084_v44 = vrot.slane %v1082_v28, 5  ;;  %v2218_v47 = vunpack.c.l.b16 %v452_v32  ;;  %v2362_v51 = vunpack.c.l.b16 %v1067_v34  ;;  %v2363_v52 = vunpack.c.l.b16 %v1077_v35  ;;  %3584 = vmatpush.bf16.msrb.mxu0 %v7273_v11 }
  0x46   : > { %v470_v53 = vor.u32 %v469_v38, %v466_v36  ;;  %v483_v54 = vshll.u32 %v329_v42, 16  ;;  %v480_v55 = vor.u32 %v479_v40, %v475_v39  ;;  %v1098_v58 = vshll.u32 %v6071_v50, 16 }
  0x47   : > { %v1085_v56 = vor.u32 %v1084_v44, %v1081_v43  ;;  %v8227_v62 = vpack.c.b16 %v2363_v52, %v2362_v51  ;;  %v488_v21 = vshrl.u32 %v304_v7, 16  ;;  %v491_v22 = vshll.u32 %v304_v7, 16 }
  0x48   : > { %v471_v63 = vrot.slane %v470_v53, 4  ;;  %v481_v3 = vrot.slane %v480_v55, 4  ;;  %v497_v23 = vshll.u32 %v305_v8, 16  ;;  %v501_v24 = vshrl.u32 %v305_v8, 16  ;;  %v7210_v53 = vld [vmem:[%s8007_s25 + $0x48] sm:$0xff] }
  0x49   : > { %v1086_v4 = vrot.slane %v1085_v56, 4  ;;  %v1112_v28 = vshll.u32 %v6047_v14, 16  ;;  %v490_v35 = vrot.slane %v488_v21, 4  ;;  %v493_v36 = vrot.slane %v491_v22, 5 }
  0x4a   : > { %v476_v12 = vsel %vm8048_vm2, %v471_v63, %v475_v39  ;;  %v499_v38 = vrot.slane %v497_v23, 5  ;;  %v503_v39 = vrot.slane %v501_v24, 4 }
  0x4b   : > { %v1114_v43 = vrot.slane %v1112_v28, 5  ;;  %v494_v51 = vor.u32 %v493_v36, %v490_v35  ;;  %v6073_v35 = vld [vmem:[%s8007_s25 + $0x68] sm:$0x1] }
  0x4c   : > { %2692 = vmatmul.bf16.gmra.mxu0 %v7191_v15  ;;  %v6045_v15 = vld [vmem:[%s8007_s25 + $0x4c] sm:$0xf]  ;;  %v504_v52 = vor.u32 %v503_v39, %v499_v38 }
  0x4d   : > { %2781 = vmatmul.bf16.gmra.mxu1 %v8168_v16  ;;  %v1088_v30 = vshll.u32 %v6045_v15, 16  ;;  %v1092_v31 = vshrl.u32 %v6045_v15, 16  ;;  %v7281_v15 = vld [vmem:[%s9847_s1 + $0x160] sm:$0xff] }
  0x4e   : > { %2870 = vmatmul.bf16.gmra.mxu2 %v7207_v17  ;;  %v457_v17 = vrot.slane %v456_v6, 4  ;;  %v1100_v6 = vrot.slane %v1098_v58, 5  ;;  %3673 = vmatpush.bf16.msrb.mxu1 %v7281_v15  ;;  %v306_v58 = vld [vmem:[%s8007_s25 + $0x54] sm:$0xf]  ;;  %v505_v63 = vrot.slane %v504_v52, 4 }
  0x4f   : > { %2959 = vmatmul.bf16.gmra.mxu3 %v8171_v18  ;;  %v1090_v45 = vrot.slane %v1088_v30, 5  ;;  %v1094_v46 = vrot.slane %v1092_v31, 4  ;;  %v1116_v30 = vshrl.u32 %v6047_v14, 16  ;;  %v2220_v31 = vunpack.c.l.b16 %v476_v12 }
  0x50   : > { %v462_v33 = vsel %vm8048_vm2, %v457_v17, %v461_v13  ;;  %v6046_v13 = vld [vmem:[%s8007_s25 + $0x54] sm:$0xf]  ;;  %v512_v8 = vshrl.u32 %v306_v58, 16  ;;  %v515_v9 = vshll.u32 %v306_v58, 16 }
  0x51   : > { %v2219_v49 = vunpack.c.l.b16 %v462_v33  ;;  %v1095_v57 = vor.u32 %v1094_v46, %v1090_v45  ;;  %v1091_v19 = vsel %vm8048_vm2, %v1086_v4, %v1090_v45  ;;  %v1103_v26 = vshrl.u32 %v6046_v13, 16  ;;  %v330_v45 = vld [vmem:[%s8007_s25 + $0x50] sm:$0x1]  ;;  %v6072_v46 = vld [vmem:[%s8007_s25 + $0x5c] sm:$0x1] }
  0x52   : > { %v1106_v27 = vshll.u32 %v6046_v13, 16  ;;  %v2364_v33 = vunpack.c.l.b16 %v1091_v19  ;;  %v1118_v44 = vrot.slane %v1116_v30, 4  ;;  %v514_v22 = vrot.slane %v512_v8, 4 }
  0x53   : > { %v8224_v60 = vpack.c.b16 %v2219_v49, %v2218_v47  ;;  %v1105_v40 = vrot.slane %v1103_v26, 4  ;;  %v7194_v47 = vld [vmem:[%s8007_s25 + $0x3c] sm:$0xff]  ;;  %v517_v23 = vrot.slane %v515_v9, 5 }
  0x54   : > { %v1108_v42 = vrot.slane %v1106_v27, 5  ;;  %v1119_v56 = vor.u32 %v1118_v44, %v1114_v43 }
  0x55   : > { %v518_v39 = vor.u32 %v517_v23, %v514_v22 }
  0x56   : > { %v1109_v55 = vor.u32 %v1108_v42, %v1105_v40 }
  0x5c   : > { %2697 = vmatmul.bf16.gmra.mxu0 %v7192_v0  ;;  %v485_v0 = vrot.slane %v483_v54, 5  ;;  %v507_v54 = vshll.u32 %v330_v45, 16  ;;  %v1146_v45 = vshll.u32 %v6073_v35, 16  ;;  %v7196_v35 = vld [vmem:[%s8007_s25 + $0x54] sm:$0xff] }
  0x5d   : > { %2786 = vmatmul.bf16.gmra.mxu1 %v8202_v1 }
  0x5e   : > { %2875 = vmatmul.bf16.gmra.mxu2 %v7208_v5  ;;  %v1096_v5 = vrot.slane %v1095_v57, 4  ;;  %v486_v17 = vsel %vm8048_vm2, %v481_v3, %v485_v0  ;;  %v1122_v57 = vshll.u32 %v6072_v46, 16  ;;  %v6048_v0 = vld [vmem:[%s8007_s25 + $0x60] sm:$0xf]  ;;  %v6049_v3 = vld [vmem:[%s8007_s25 + $0x64] sm:$0xf] }
  0x5f   : > { %2964 = vmatmul.bf16.gmra.mxu3 %v8204_v2  ;;  %v2221_v32 = vunpack.c.l.b16 %v486_v17  ;;  %v509_v4 = vrot.slane %v507_v54, 5  ;;  %v1127_v12 = vshrl.u32 %v6048_v0, 16  ;;  %v1130_v13 = vshll.u32 %v6048_v0, 16  ;;  %v7195_v46 = vld [vmem:[%s8007_s25 + $0x48] sm:$0xff]  ;;  %v7296_v0 = vld [vmem:[%s9847_s1 + $0x1d8] sm:$0xff] }
  0x60   : > { %v1101_v20 = vsel %vm8048_vm2, %v1096_v5, %v1100_v6  ;;  %v1110_v5 = vrot.slane %v1109_v55, 4  ;;  %v1120_v6 = vrot.slane %v1119_v56, 4  ;;  %v1124_v7 = vrot.slane %v1122_v57, 5  ;;  %3852 = vmatpush.bf16.msrb.mxu3 %v7296_v0  ;;  %v6052_v0 = vld [vmem:[%s8007_s25 + $0x78] sm:$0xf] }
  0x61   : > { %v2365_v34 = vunpack.c.l.b16 %v1101_v20  ;;  %v8258_v49 = vpack.c.b16 %v2221_v32, %v2220_v31  ;;  %v1136_v14 = vshll.u32 %v6049_v3, 16  ;;  %v1140_v15 = vshrl.u32 %v6049_v3, 16 }
  0x62   : > { %v510_v19 = vsel %vm8048_vm2, %v505_v63, %v509_v4  ;;  %v1115_v20 = vsel %vm8048_vm2, %v1110_v5, %v1114_v43  ;;  %v1125_v21 = vsel %vm8048_vm2, %v1120_v6, %v1124_v7  ;;  %v1129_v27 = vrot.slane %v1127_v12, 4  ;;  %v7288_v63 = vld [vmem:[%s9847_s1 + $0x198] sm:$0xff]  ;;  %v6050_v4 = vld [vmem:[%s8007_s25 + $0x6c] sm:$0xf]  ;;  %v6051_v5 = vld [vmem:[%s8007_s25 + $0x70] sm:$0xf] }
  0x63   : > { %v8260_v50 = vpack.c.b16 %v2365_v34, %v2364_v33  ;;  %v1132_v28 = vrot.slane %v1130_v13, 5  ;;  %v1138_v30 = vrot.slane %v1136_v14, 5  ;;  %v1142_v31 = vrot.slane %v1140_v15, 4  ;;  %v331_v34 = vld [vmem:[%s8007_s25 + $0x5c] sm:$0x1]  ;;  %3763 = vmatpush.bf16.msrb.mxu2 %v7288_v63 }
  0x64   : > { %v2223_v33 = vunpack.c.l.b16 %v510_v19  ;;  %v2366_v36 = vunpack.c.l.b16 %v1115_v20  ;;  %v531_v42 = vshll.u32 %v331_v34, 16  ;;  %v1148_v58 = vrot.slane %v1146_v45, 5  ;;  %v6074_v34 = vld [vmem:[%s8007_s25 + $0x74] sm:$0x1]  ;;  %v311_v63 = vld [vmem:[%s8007_s25 + $0x70] sm:$0xf] }
  0x65   : > { %v1133_v43 = vor.u32 %v1132_v28, %v1129_v27  ;;  %v1143_v44 = vor.u32 %v1142_v31, %v1138_v30  ;;  %v1151_v13 = vshrl.u32 %v6050_v4, 16  ;;  %v1154_v14 = vshll.u32 %v6050_v4, 16  ;;  %v332_v28 = vld [vmem:[%s8007_s25 + $0x68] sm:$0x1] }
  0x66   : > { %v533_v55 = vrot.slane %v531_v42, 5  ;;  %v1160_v15 = vshll.u32 %v6051_v5, 16  ;;  %v7212_v42 = vld [vmem:[%s8007_s25 + $0x60] sm:$0xff] }
  0x67   : > { %v1134_v56 = vrot.slane %v1133_v43, 4  ;;  %v1144_v57 = vrot.slane %v1143_v44, 4  ;;  %v1156_v31 = vrot.slane %v1154_v14, 5 }
  0x69   : > { %v1139_v7 = vsel %vm8048_vm2, %v1134_v56, %v1138_v30  ;;  %v1149_v8 = vsel %vm8048_vm2, %v1144_v57, %v1148_v58  ;;  %v1153_v30 = vrot.slane %v1151_v13, 4  ;;  %v1178_v13 = vshll.u32 %v6052_v0, 16 }
  0x6a   : > { %v2369_v22 = vunpack.c.l.b16 %v1149_v8 }
  0x6b   : > { %v1157_v44 = vor.u32 %v1156_v31, %v1153_v30  ;;  %v1180_v31 = vrot.slane %v1178_v13, 5 }
  0x6c   : > { %2702 = vmatmul.bf16.gmra.mxu0 %v7193_v59  ;;  %v307_v59 = vld [vmem:[%s8007_s25 + $0x58] sm:$0xf] }
  0x6d   : > { %2791 = vmatmul.bf16.gmra.mxu1 %v8224_v60  ;;  %v521_v10 = vshll.u32 %v307_v59, 16  ;;  %v525_v11 = vshrl.u32 %v307_v59, 16  ;;  %v308_v59 = vld [vmem:[%s8007_s25 + $0x60] sm:$0xf]  ;;  %v1158_v57 = vrot.slane %v1157_v44, 4 }
  0x6e   : > { %2880 = vmatmul.bf16.gmra.mxu2 %v7209_v61  ;;  %v495_v61 = vrot.slane %v494_v51, 4  ;;  %v7211_v51 = vld [vmem:[%s8007_s25 + $0x54] sm:$0xff]  ;;  %v536_v9 = vshrl.u32 %v308_v59, 16 }
  0x6f   : > { %2969 = vmatmul.bf16.gmra.mxu3 %v8227_v62  ;;  %v523_v24 = vrot.slane %v521_v10, 5  ;;  %v527_v26 = vrot.slane %v525_v11, 4  ;;  %v539_v10 = vshll.u32 %v308_v59, 16 }
  0x70   : > { %v500_v17 = vsel %vm8048_vm2, %v495_v61, %v499_v38  ;;  %v2367_v38 = vunpack.c.l.b16 %v1125_v21  ;;  %v309_v61 = vld [vmem:[%s8007_s25 + $0x64] sm:$0xf]  ;;  %v2368_v21 = vunpack.c.l.b16 %v1139_v7  ;;  %v538_v23 = vrot.slane %v536_v9, 4 }
  0x71   : > { %v2222_v32 = vunpack.c.l.b16 %v500_v17  ;;  %v528_v40 = vor.u32 %v527_v26, %v523_v24  ;;  %v545_v11 = vshll.u32 %v309_v61, 16  ;;  %v549_v12 = vshrl.u32 %v309_v61, 16  ;;  %v310_v61 = vld [vmem:[%s8007_s25 + $0x6c] sm:$0xf] }
  0x72   : > { %v8283_v52 = vpack.c.b16 %v2367_v38, %v2366_v36  ;;  %v1164_v17 = vshrl.u32 %v6051_v5, 16  ;;  %v8311_v43 = vpack.c.b16 %v2369_v22, %v2368_v21  ;;  %v563_v7 = vshll.u32 %v310_v61, 16 }
  0x73   : > { %v529_v54 = vrot.slane %v528_v40, 4  ;;  %v547_v26 = vrot.slane %v545_v11, 5  ;;  %v551_v27 = vrot.slane %v549_v12, 4  ;;  %v555_v40 = vshll.u32 %v332_v28, 16  ;;  %v6075_v28 = vld [vmem:[%s8007_s25 + $0x80] sm:$0x1] }
  0x74   : > { %v573_v11 = vshrl.u32 %v311_v63, 16  ;;  %v1175_v12 = vshrl.u32 %v6052_v0, 16  ;;  %v565_v21 = vrot.slane %v563_v7, 5 }
  0x75   : > { %v534_v6 = vsel %vm8048_vm2, %v529_v54, %v533_v55  ;;  %v557_v56 = vrot.slane %v555_v40, 5 }
  0x76   : > { %v2225_v20 = vunpack.c.l.b16 %v534_v6  ;;  %v560_v6 = vshrl.u32 %v310_v61, 16  ;;  %v1177_v30 = vrot.slane %v1175_v12, 4 }
  0x7c   : > { %2707 = vmatmul.bf16.gmra.mxu0 %v7194_v47  ;;  %v8280_v47 = vpack.c.b16 %v2223_v33, %v2222_v32  ;;  %v1162_v32 = vrot.slane %v1160_v15, 5  ;;  %v1166_v33 = vrot.slane %v1164_v17, 4 }
  0x7d   : > { %2796 = vmatmul.bf16.gmra.mxu1 %v8258_v49 }
  0x7e   : > { %2885 = vmatmul.bf16.gmra.mxu2 %v7210_v53  ;;  %v519_v53 = vrot.slane %v518_v39, 4  ;;  %v552_v39 = vor.u32 %v551_v27, %v547_v26  ;;  %v1167_v45 = vor.u32 %v1166_v33, %v1162_v32  ;;  %v1163_v8 = vsel %vm8048_vm2, %v1158_v57, %v1162_v32  ;;  %v313_v57 = vld [vmem:[%s8007_s25 + $0x7c] sm:$0xf] }
  0x7f   : > { %2974 = vmatmul.bf16.gmra.mxu3 %v8260_v50  ;;  %v2370_v22 = vunpack.c.l.b16 %v1163_v8  ;;  %v575_v27 = vrot.slane %v573_v11, 4  ;;  %v593_v8 = vshll.u32 %v313_v57, 16 }
  0x80   : > { %v524_v3 = vsel %vm8048_vm2, %v519_v53, %v523_v24  ;;  %v541_v24 = vrot.slane %v539_v10, 5  ;;  %v7280_v53 = vld [vmem:[%s9847_s1 + $0x158] sm:$0xff]  ;;  %v553_v55 = vrot.slane %v552_v39, 4  ;;  %v1168_v58 = vrot.slane %v1167_v45, 4 }
  0x81   : > { %v2224_v19 = vunpack.c.l.b16 %v524_v3  ;;  %3674 = vmatpush.bf16.msrb.mxu1 %v7280_v53  ;;  %v6053_v3 = vld [vmem:[%s8007_s25 + $0x7c] sm:$0xf]  ;;  %v569_v10 = vshll.u32 %v311_v63, 16  ;;  %v1181_v53 = vor.u32 %v1180_v31, %v1177_v30  ;;  %v8356_v30 = vrot.slane %v593_v8, 5 }
  0x82   : > { %v542_v38 = vor.u32 %v541_v24, %v538_v23  ;;  %v558_v5 = vsel %vm8048_vm2, %v553_v55, %v557_v56  ;;  %v1184_v14 = vshll.u32 %v6053_v3, 16  ;;  %v1188_v15 = vshrl.u32 %v6053_v3, 16  ;;  %v333_v24 = vld [vmem:[%s8007_s25 + $0x74] sm:$0x1]  ;;  %v312_v55 = vld [vmem:[%s8007_s25 + $0x78] sm:$0xf] }
  0x83   : > { %v8308_v36 = vpack.c.b16 %v2225_v20, %v2224_v19  ;;  %v2227_v19 = vunpack.c.l.b16 %v558_v5  ;;  %v562_v20 = vrot.slane %v560_v6, 4  ;;  %v6055_v3 = vld [vmem:[%s8007_s25 + $0x88] sm:$0xf]  ;;  %v584_v6 = vshrl.u32 %v312_v55, 16 }
  0x84   : > { %v543_v54 = vrot.slane %v542_v38, 4  ;;  %v1186_v32 = vrot.slane %v1184_v14, 5  ;;  %v1190_v33 = vrot.slane %v1188_v15, 4  ;;  %v587_v7 = vshll.u32 %v312_v55, 16  ;;  %v7295_v55 = vld [vmem:[%s9847_s1 + $0x1d0] sm:$0xff] }
  0x85   : > { %v566_v38 = vor.u32 %v565_v21, %v562_v20  ;;  %v1208_v14 = vshll.u32 %v6055_v3, 16  ;;  %v1212_v15 = vshrl.u32 %v6055_v3, 16  ;;  %3853 = vmatpush.bf16.msrb.mxu3 %v7295_v55 }
  0x86   : > { %v548_v4 = vsel %vm8048_vm2, %v543_v54, %v547_v26  ;;  %v571_v26 = vrot.slane %v569_v10, 5  ;;  %v1191_v54 = vor.u32 %v1190_v33, %v1186_v32 }
  0x87   : > { %v2226_v17 = vunpack.c.l.b16 %v548_v4  ;;  %v567_v56 = vrot.slane %v566_v38, 4  ;;  %v1182_v4 = vrot.slane %v1181_v53, 4  ;;  %v6076_v53 = vld [vmem:[%s8007_s25 + $0x8c] sm:$0x1] }
  0x88   : > { %v576_v45 = vor.u32 %v575_v27, %v571_v26  ;;  %v1192_v5 = vrot.slane %v1191_v54, 4  ;;  %v586_v27 = vrot.slane %v584_v6, 4  ;;  %v7287_v54 = vld [vmem:[%s9847_s1 + $0x190] sm:$0xff]  ;;  %v7214_v6 = vld [vmem:[%s8007_s25 + $0x78] sm:$0xff]  ;;  %v1218_v8 = vshll.u32 %v6076_v53, 16 }
  0x89   : > { %v572_v21 = vsel %vm8048_vm2, %v567_v56, %v571_v26  ;;  %v8361_v26 = vld [vmem:[%s9848_s2] ss:$0 sm:$0xff]  ;;  %3764 = vmatpush.bf16.msrb.mxu2 %v7287_v54 }
  0x8a   : > { %v577_v61 = vrot.slane %v576_v45, 4  ;;  %v2228_v38 = vunpack.c.l.b16 %v572_v21 }
  0x8c   : > { %2712 = vmatmul.bf16.gmra.mxu0 %v7195_v46  ;;  %v1170_v46 = vshll.u32 %v6074_v34, 16  ;;  %v7197_v34 = vld [vmem:[%s8007_s25 + $0x60] sm:$0xff] }
  0x8d   : > { %2801 = vmatmul.bf16.gmra.mxu1 %v8280_v47 }
  0x8e   : > { %2890 = vmatmul.bf16.gmra.mxu2 %v7211_v51  ;;  %v7272_v51 = vld [vmem:[%s9847_s1 + $0x118] sm:$0xff]  ;;  %v1172_v59 = vrot.slane %v1170_v46, 5  ;;  %v579_v46 = vshll.u32 %v333_v24, 16 }
  0x8f   : > { %2979 = vmatmul.bf16.gmra.mxu3 %v8283_v52  ;;  %3585 = vmatpush.bf16.msrb.mxu0 %v7272_v51  ;;  %v1194_v51 = vshll.u32 %v6075_v28, 16  ;;  %v589_v28 = vrot.slane %v587_v7, 5 }
  0x90   : > { %v1173_v9 = vsel %vm8048_vm2, %v1168_v58, %v1172_v59  ;;  %v6054_v58 = vld [vmem:[%s8007_s25 + $0x84] sm:$0xf]  ;;  %v581_v63 = vrot.slane %v579_v46, 5 }
  0x91   : > { %v2371_v23 = vunpack.c.l.b16 %v1173_v9  ;;  %v1196_v0 = vrot.slane %v1194_v51, 5  ;;  %v597_v9 = vshrl.u32 %v313_v57, 16  ;;  %v1199_v10 = vshrl.u32 %v6054_v58, 16 }
  0x92   : > { %v1202_v11 = vshll.u32 %v6054_v58, 16  ;;  %v590_v56 = vor.u32 %v589_v28, %v586_v27  ;;  %v6056_v27 = vld [vmem:[%s8007_s25 + $0x90] sm:$0xf] }
  0x93   : > { %v8339_v44 = vpack.c.b16 %v2371_v23, %v2370_v22  ;;  %v582_v22 = vsel %vm8048_vm2, %v577_v61, %v581_v63  ;;  %v1187_v23 = vsel %vm8048_vm2, %v1182_v4, %v1186_v32  ;;  %v1197_v24 = vsel %vm8048_vm2, %v1192_v5, %v1196_v0  ;;  %v8383_v63 = vld [vmem:[%s9849_s3] ss:$0 sm:$0xff]  ;;  %v7198_v4 = vld [vmem:[%s8007_s25 + $0x6c] sm:$0xff] }
  0x94   : > { %v599_v31 = vrot.slane %v597_v9, 4  ;;  %v1201_v33 = vrot.slane %v1199_v10, 4  ;;  %v2229_v32 = vunpack.c.l.b16 %v582_v22  ;;  %v2372_v46 = vunpack.c.l.b16 %v1187_v23 }
  0x95   : > { %v2373_v51 = vunpack.c.l.b16 %v1197_v24  ;;  %v1226_v53 = vshll.u32 %v6056_v27, 16 }
  0x96   : > { %v600_v58 = vor.u32 %v599_v31, %v8356_v30  ;;  %v8386_v5 = vpack.c.b16 %v2229_v32, %v2228_v38  ;;  %v1220_v31 = vrot.slane %v1218_v8, 5 }
  0x98   : > { %v601_v22 = vrot.slane %v600_v58, 4 }
  0x9c   : > { %2717 = vmatmul.bf16.gmra.mxu0 %v7196_v35  ;;  %v8336_v35 = vpack.c.b16 %v2227_v19, %v2226_v17 }
  0x9d   : > { %2806 = vmatmul.bf16.gmra.mxu1 %v8308_v36 }
  0x9e   : > { %2895 = vmatmul.bf16.gmra.mxu2 %v7212_v42  ;;  %v7213_v42 = vld [vmem:[%s8007_s25 + $0x6c] sm:$0xff] }
  0x9f   : > { %2984 = vmatmul.bf16.gmra.mxu3 %v8311_v43 }
  0xa9   : > { %v2683_v39 = vpop.f32.mrf.mxu0 }
  0xaa   : > { %v2772_v40 = vpop.f32.mrf.mxu1 }
  0xab   : > { %v2773_v59 = vadd.f32 %v2772_v40, %v2683_v39  ;;  %v334_v39 = vld [vmem:[%s8007_s25 + $0x80] sm:$0x1]  ;;  %v8364_v40 = vrot.slane %v1208_v14, 5  ;;  %v7271_v14 = vld [vmem:[%s9847_s1 + $0x110] sm:$0xff] }
  0xac   : > { %2722 = vmatmul.bf16.gmra.mxu0 %v7197_v34  ;;  %v1204_v34 = vrot.slane %v1202_v11, 5 }
  0xad   : > { %2811 = vmatmul.bf16.gmra.mxu1 %v8336_v35  ;;  %3586 = vmatpush.bf16.msrb.mxu0 %v7271_v14  ;;  %v1228_v14 = vrot.slane %v1226_v53, 5 }
  0xae   : > { %2900 = vmatmul.bf16.gmra.mxu2 %v7213_v42  ;;  %v1214_v42 = vrot.slane %v1212_v15, 4  ;;  %v1205_v61 = vor.u32 %v1204_v34, %v1201_v33  ;;  %v7279_v15 = vld [vmem:[%s9847_s1 + $0x150] sm:$0xff] }
  0xaf   : > { %2989 = vmatmul.bf16.gmra.mxu3 %v8339_v44  ;;  %3675 = vmatpush.bf16.msrb.mxu1 %v7279_v15 }
  0xb0   : > { %v1215_v7 = vor.u32 %v1214_v42, %v8364_v40  ;;  %v1206_v24 = vrot.slane %v1205_v61, 4 }
  0xb1   : > { %v2861_v12 = vpop.f32.mrf.mxu2  ;;  %v2685_v19 = vpop.f32.mrf.mxu0 }
  0xb2   : > { %v2950_v13 = vpop.f32.mrf.mxu3  ;;  %v2862_v17 = vadd.f32 %v2861_v12, %v2773_v59  ;;  %v2774_v20 = vpop.f32.mrf.mxu1  ;;  %v603_v59 = vshll.u32 %v334_v39, 16  ;;  %v1216_v28 = vrot.slane %v1215_v7, 4 }
  0xb3   : > { %v2775_v57 = vadd.f32 %v2774_v20, %v2685_v19  ;;  %v591_v19 = vrot.slane %v590_v56, 4  ;;  %v315_v20 = vld [vmem:[%s8007_s25 + $0x88] sm:$0xf] }
  0xb4   : > { %v2951_v45 = vadd.f32 %v2950_v13, %v2862_v17  ;;  %v8391_v13 = vpack.c.b16 %v2373_v51, %v2372_v46  ;;  %v314_v17 = vld [vmem:[%s8007_s25 + $0x84] sm:$0xf]  ;;  %v605_v23 = vrot.slane %v603_v59, 5  ;;  %v617_v42 = vshll.u32 %v315_v20, 16 }
  0xb5   : > { %v608_v33 = vshrl.u32 %v314_v17, 16  ;;  %v611_v34 = vshll.u32 %v314_v17, 16  ;;  %v621_v46 = vshrl.u32 %v315_v20, 16  ;;  %v1223_v51 = vshrl.u32 %v6056_v27, 16 }
  0xb6   : > { %v3033_v9 = vmul.f32 %v8361_v26, %v2951_v45  ;;  %9872 = vst [vmem:[#allocation2_spill] sm:$0xff] %v8391_v13  ;;  %v6057_v45 = vld [vmem:[%s8007_s25 + $0x94] sm:$0xf]  ;;  %v596_v55 = vsel %vm8048_vm2, %v591_v19, %v8356_v30  ;;  %v606_v56 = vsel %vm8048_vm2, %v601_v22, %v605_v23  ;;  %v1221_v61 = vsel %vm8048_vm2, %v1216_v28, %v1220_v31  ;;  %v6077_v31 = vld [vmem:[%s8007_s25 + $0x98] sm:$0x1] }
  0xb7   : > { %v1236_v15 = vshrl.u32 %v6057_v45, 16  ;;  %v2230_v19 = vunpack.c.l.b16 %v596_v55  ;;  %v2231_v20 = vunpack.c.l.b16 %v606_v56  ;;  %v2375_v22 = vunpack.c.l.b16 %v1221_v61 }
  0xb8   : > { %v3068_v38 = vadd.f32 %v8383_v63, %v3033_v9 }
  0xb9   : > { %v2863_v0 = vpop.f32.mrf.mxu2  ;;  %v2688_v11 = vpop.f32.mrf.mxu0 }
  0xba   : > { %v2952_v3 = vpop.f32.mrf.mxu3  ;;  %v2864_v10 = vadd.f32 %v2863_v0, %v2775_v57  ;;  %v2777_v12 = vpop.f32.mrf.mxu1  ;;  %v1211_v57 = vsel %vm8048_vm2, %v1206_v24, %v8364_v40  ;;  %v610_v0 = vrot.slane %v608_v33, 4  ;;  %v335_v40 = vld [vmem:[%s8007_s25 + $0x8c] sm:$0x1] }
  0xbb   : > { %v2778_v39 = vadd.f32 %v2777_v12, %v2688_v11  ;;  %v623_v11 = vrot.slane %v621_v46, 4  ;;  %v1225_v12 = vrot.slane %v1223_v51, 4  ;;  %v627_v27 = vshll.u32 %v335_v40, 16 }
  0xbc   : > { %v2953_v21 = vadd.f32 %v2952_v3, %v2864_v10  ;;  %2727 = vmatmul.bf16.gmra.mxu0 %v7198_v4  ;;  %v613_v3 = vrot.slane %v611_v34, 5  ;;  %v1232_v4 = vshll.u32 %v6057_v45, 16  ;;  %v8425_v10 = vrot.slane %v617_v42, 5  ;;  %v7199_v45 = vld [vmem:[%s8007_s25 + $0x78] sm:$0xff] }
  0xbd   : > { %2816 = vmatmul.bf16.gmra.mxu1 %v8386_v5  ;;  %v1229_v33 = vor.u32 %v1228_v14, %v1225_v12  ;;  %v8437_v46 = vpack.c.b16 %v2231_v20, %v2230_v19  ;;  %v6058_v12 = vld [vmem:[%s8007_s25 + $0x9c] sm:$0xf]  ;;  %v6059_v14 = vld [vmem:[%s8007_s25 + $0xa0] sm:$0xf] }
  0xbe   : > { %v3034_v32 = vmul.f32 %v8361_v26, %v2953_v21  ;;  %2905 = vmatmul.bf16.gmra.mxu2 %v7214_v6  ;;  %v3100_v6 = vmax.f32 %v3068_v38, 0.0  ;;  %v2374_v21 = vunpack.c.l.b16 %v1211_v57  ;;  %v614_v24 = vor.u32 %v613_v3, %v610_v0  ;;  %v7215_v57 = vld [vmem:[%s8007_s25 + $0x84] sm:$0xff] }
  0xbf   : > { %2994 = vmatmul.bf16.gmra.mxu3 %v8391_v13  ;;  %v624_v28 = vor.u32 %v623_v11, %v8425_v10  ;;  %v1234_v34 = vrot.slane %v1232_v4, 5  ;;  %v1238_v38 = vrot.slane %v1236_v15, 4  ;;  %v629_v0 = vrot.slane %v627_v27, 5 }
  0xc0   : > { %v3069_v54 = vadd.f32 %v8383_v63, %v3034_v32  ;;  %v8439_v51 = vpack.c.b16 %v2375_v22, %v2374_v21  ;;  %v1230_v3 = vrot.slane %v1229_v33, 4  ;;  %v1247_v33 = vshrl.u32 %v6058_v12, 16 }
  0xc1   : > { %v2866_v58 = vpop.f32.mrf.mxu2  ;;  %v2690_v30 = vpop.f32.mrf.mxu0  ;;  %v625_v61 = vrot.slane %v624_v28, 4  ;;  %v1239_v4 = vor.u32 %v1238_v38, %v1234_v34  ;;  %v1250_v38 = vshll.u32 %v6058_v12, 16 }
  0xc2   : > { %v2955_v59 = vpop.f32.mrf.mxu3  ;;  %v3101_v7 = vmax.f32 %v3069_v54, 0.0  ;;  %v2867_v8 = vadd.f32 %v2866_v58, %v2778_v39  ;;  %v2779_v9 = vpop.f32.mrf.mxu1  ;;  %v615_v58 = vrot.slane %v614_v24, 4  ;;  %v1235_v19 = vsel %vm8048_vm2, %v1230_v3, %v1234_v34 }
  0xc3   : > { %v2780_v32 = vadd.f32 %v2779_v9, %v2690_v30  ;;  %v1240_v20 = vrot.slane %v1239_v4, 4 }
  0xc4   : > { %v7368_v17 = vpack.c.bf16 %v3101_v7, %v3100_v6  ;;  %v2956_v23 = vadd.f32 %v2955_v59, %v2867_v8  ;;  %v1242_v59 = vshll.u32 %v6077_v31, 16  ;;  %v316_v7 = vld [vmem:[%s8007_s25 + $0x90] sm:$0xf]  ;;  %v317_v8 = vld [vmem:[%s8007_s25 + $0x94] sm:$0xf]  ;;  %v620_v15 = vsel %vm8048_vm2, %v615_v58, %v8425_v10 }
  0xc5   : > { %v632_v22 = vshrl.u32 %v316_v7, 16  ;;  %v641_v24 = vshll.u32 %v317_v8, 16  ;;  %v645_v31 = vshrl.u32 %v317_v8, 16  ;;  %v2376_v58 = vunpack.c.l.b16 %v1235_v19 }
  0xc6   : > { %7369 = vst [vmem:[%s8430_s12] sm:$0xff] %v7368_v17   ;;  %v3035_v53 = vmul.f32 %v8361_v26, %v2956_v23  ;;  %v1244_v11 = vrot.slane %v1242_v59, 5  ;;  %v630_v17 = vsel %vm8048_vm2, %v625_v61, %v629_v0  ;;  %v635_v23 = vshll.u32 %v316_v7, 16  ;;  %v336_v59 = vld [vmem:[%s8007_s25 + $0x98] sm:$0x1] }
  0xc7   : > { %v634_v61 = vrot.slane %v632_v22, 4  ;;  %v8462_v3 = vrot.slane %v641_v24, 5  ;;  %v647_v4 = vrot.slane %v645_v31, 4  ;;  %v1249_v7 = vrot.slane %v1247_v33, 4  ;;  %v7200_v22 = vld [vmem:[%s8007_s25 + $0x84] sm:$0xff] }
  0xc8   : > { %v3070_v30 = vadd.f32 %v8383_v63, %v3035_v53  ;;  %v1260_v53 = vshrl.u32 %v6059_v14, 16  ;;  %v637_v0 = vrot.slane %v635_v23, 5  ;;  %v1252_v8 = vrot.slane %v1250_v38, 5 }
  0xc9   : > { %v2868_v39 = vpop.f32.mrf.mxu2  ;;  %v2693_v55 = vpop.f32.mrf.mxu0  ;;  %v648_v23 = vor.u32 %v647_v4, %v8462_v3  ;;  %v651_v24 = vshll.u32 %v336_v59, 16 }
  0xca   : > { %v2957_v42 = vpop.f32.mrf.mxu3  ;;  %v2869_v54 = vadd.f32 %v2868_v39, %v2780_v32  ;;  %v2782_v56 = vpop.f32.mrf.mxu1  ;;  %v1256_v32 = vshll.u32 %v6059_v14, 16  ;;  %v3102_v10 = vmax.f32 %v3070_v30, 0.0  ;;  %v1262_v12 = vrot.slane %v1260_v53, 4  ;;  %v7294_v14 = vld [vmem:[%s9847_s1 + $0x1c8] sm:$0xff] }
  0xcb   : > { %v2783_v40 = vadd.f32 %v2782_v56, %v2693_v55  ;;  %v2233_v55 = vunpack.c.l.b16 %v630_v17  ;;  %v1245_v56 = vsel %vm8048_vm2, %v1240_v20, %v1244_v11  ;;  %v7286_v11 = vld [vmem:[%s9847_s1 + $0x188] sm:$0xff]  ;;  %v638_v19 = vor.u32 %v637_v0, %v634_v61  ;;  %3854 = vmatpush.bf16.msrb.mxu3 %v7294_v14 }
  0xcc   : > { %v2958_v6 = vadd.f32 %v2957_v42, %v2869_v54  ;;  %2732 = vmatmul.bf16.gmra.mxu0 %v7199_v45  ;;  %v2232_v54 = vunpack.c.l.b16 %v620_v15  ;;  %3765 = vmatpush.bf16.msrb.mxu2 %v7286_v11  ;;  %v6060_v0 = vld [vmem:[%s8007_s25 + $0xa8] sm:$0xf] }
  0xcd   : > { %2821 = vmatmul.bf16.gmra.mxu1 %v8437_v46 }
  0xce   : > { %v3036_v9 = vmul.f32 %v8361_v26, %v2958_v6  ;;  %2910 = vmatmul.bf16.gmra.mxu2 %v7215_v57  ;;  %v6078_v6 = vld [vmem:[%s8007_s25 + $0xa4] sm:$0x1]  ;;  %v8474_v17 = vpack.c.b16 %v2233_v55, %v2232_v54  ;;  %v639_v54 = vrot.slane %v638_v19, 4  ;;  %v318_v55 = vld [vmem:[%s8007_s25 + $0x9c] sm:$0xf] }
  0xcf   : > { %2999 = vmatmul.bf16.gmra.mxu3 %v8439_v51 }
  0xd0   : > { %v3071_v21 = vadd.f32 %v8383_v63, %v3036_v9  ;;  %v2377_v9 = vunpack.c.l.b16 %v1245_v56  ;;  %v319_v56 = vld [vmem:[%s8007_s25 + $0xa0] sm:$0xf]  ;;  %v644_v19 = vsel %vm8048_vm2, %v639_v54, %v8462_v3 }
  0xd1   : > { %v2871_v27 = vpop.f32.mrf.mxu2  ;;  %v2695_v45 = vpop.f32.mrf.mxu0  ;;  %v665_v11 = vshll.u32 %v319_v56, 16  ;;  %v669_v14 = vshrl.u32 %v319_v56, 16  ;;  %v337_v56 = vld [vmem:[%s8007_s25 + $0xa4] sm:$0x1] }
  0xd2   : > { %v2960_v28 = vpop.f32.mrf.mxu3  ;;  %v3103_v39 = vmax.f32 %v3071_v21, 0.0  ;;  %v2872_v42 = vadd.f32 %v2871_v27, %v2783_v40  ;;  %v2784_v34 = vpop.f32.mrf.mxu1  ;;  %v8466_v40 = vrot.slane %v1256_v32, 5  ;;  %v1253_v27 = vor.u32 %v1252_v8, %v1249_v7 }
  0xd3   : > { %v2785_v15 = vadd.f32 %v2784_v34, %v2695_v45  ;;  %v7270_v45 = vld [vmem:[%s9847_s1 + $0x108] sm:$0xff]  ;;  %v671_v54 = vrot.slane %v669_v14, 4 }
  0xd4   : > { %v7373_v57 = vpack.c.bf16 %v3103_v39, %v3102_v10  ;;  %v2961_v30 = vadd.f32 %v2960_v28, %v2872_v42  ;;  %v1266_v28 = vshll.u32 %v6078_v6, 16  ;;  %v7216_v10 = vld [vmem:[%s8007_s25 + $0x90] sm:$0xff]  ;;  %v8480_v39 = vpack.c.b16 %v2377_v9, %v2376_v58  ;;  %v7278_v34 = vld [vmem:[%s9847_s1 + $0x148] sm:$0xff]  ;;  %3587 = vmatpush.bf16.msrb.mxu0 %v7270_v45 }
  0xd5   : > { %v1263_v42 = vor.u32 %v1262_v12, %v8466_v40  ;;  %3676 = vmatpush.bf16.msrb.mxu1 %v7278_v34  ;;  %v653_v58 = vrot.slane %v651_v24, 5  ;;  %v1254_v59 = vrot.slane %v1253_v27, 4  ;;  %v656_v9 = vshrl.u32 %v318_v55, 16 }
  0xd6   : > { %7685 = vst [vmem:[%s8430_s12 + $0x8] sm:$0xff] %v7373_v57   ;;  %v3037_v31 = vmul.f32 %v8361_v26, %v2961_v30  ;;  %v649_v57 = vrot.slane %v648_v23, 4  ;;  %v1268_v61 = vrot.slane %v1266_v28, 5  ;;  %v6061_v30 = vld [vmem:[%s8007_s25 + $0xac] sm:$0xf]  ;;  %v659_v12 = vshll.u32 %v318_v55, 16 }
  0xd7   : > { %9873 = vst [vmem:[#allocation3_spill] sm:$0xff] %v8480_v39  ;;  %v1264_v8 = vrot.slane %v1263_v42, 4  ;;  %v1259_v27 = vsel %vm8048_vm2, %v1254_v59, %v8466_v40  ;;  %v1280_v28 = vshll.u32 %v6061_v30, 16  ;;  %v658_v45 = vrot.slane %v656_v9, 4 }
  0xd8   : > { %v3072_v4 = vadd.f32 %v8383_v63, %v3037_v31  ;;  %v654_v24 = vsel %vm8048_vm2, %v649_v57, %v653_v58  ;;  %v1284_v31 = vshrl.u32 %v6061_v30, 16  ;;  %v661_v34 = vrot.slane %v659_v12, 5 }
  0xd9   : > { %v2873_v20 = vpop.f32.mrf.mxu2  ;;  %v2698_v38 = vpop.f32.mrf.mxu0  ;;  %v1269_v42 = vsel %vm8048_vm2, %v1264_v8, %v1268_v61  ;;  %v2234_v58 = vunpack.c.l.b16 %v644_v19  ;;  %v2235_v59 = vunpack.c.l.b16 %v654_v24  ;;  %v2378_v30 = vunpack.c.l.b16 %v1259_v27 }
  0xda   : > { %v2962_v21 = vpop.f32.mrf.mxu3  ;;  %v2874_v33 = vadd.f32 %v2873_v20, %v2785_v15  ;;  %v2787_v32 = vpop.f32.mrf.mxu1  ;;  %v1271_v20 = vshrl.u32 %v6060_v0, 16  ;;  %v2379_v61 = vunpack.c.l.b16 %v1269_v42  ;;  %v662_v8 = vor.u32 %v661_v34, %v658_v45 }
  0xdb   : > { %v2788_v7 = vadd.f32 %v2787_v32, %v2698_v38  ;;  %v675_v12 = vshll.u32 %v337_v56, 16  ;;  %v6062_v56 = vld [vmem:[%s8007_s25 + $0xb4] sm:$0xf] }
  0xdc   : > { %v2963_v53 = vadd.f32 %v2962_v21, %v2874_v33  ;;  %2737 = vmatmul.bf16.gmra.mxu0 %v7200_v22  ;;  %v1274_v21 = vshll.u32 %v6060_v0, 16  ;;  %v3104_v33 = vmax.f32 %v3072_v4, 0.0  ;;  %v1273_v40 = vrot.slane %v1271_v20, 4  ;;  %v6079_v0 = vld [vmem:[%s8007_s25 + $0xb0] sm:$0x1] }
  0xdd   : > { %2826 = vmatmul.bf16.gmra.mxu1 %v8474_v17  ;;  %v8512_v4 = vrot.slane %v1280_v28, 5  ;;  %v677_v45 = vrot.slane %v675_v12, 5 }
  0xde   : > { %v3038_v6 = vmul.f32 %v8361_v26, %v2963_v53  ;;  %2915 = vmatmul.bf16.gmra.mxu2 %v7216_v10  ;;  %v8508_v53 = vrot.slane %v665_v11, 5  ;;  %v1276_v57 = vrot.slane %v1274_v21, 5  ;;  %v7201_v21 = vld [vmem:[%s8007_s25 + $0x90] sm:$0xff] }
  0xdf   : > { %3004 = vmatmul.bf16.gmra.mxu3 %v8480_v39 }
  0xe0   : > { %v3073_v15 = vadd.f32 %v8383_v63, %v3038_v6  ;;  %v1286_v6 = vrot.slane %v1284_v31, 4  ;;  %v672_v9 = vor.u32 %v671_v54, %v8508_v53  ;;  %v1277_v14 = vor.u32 %v1276_v57, %v1273_v40  ;;  %v6063_v40 = vld [vmem:[%s8007_s25 + $0xb8] sm:$0xf] }
  0xe1   : > { %v2876_v22 = vpop.f32.mrf.mxu2  ;;  %v2700_v10 = vpop.f32.mrf.mxu0  ;;  %v1304_v12 = vshll.u32 %v6063_v40, 16 }
  0xe2   : > { %v2965_v23 = vpop.f32.mrf.mxu3  ;;  %v3105_v38 = vmax.f32 %v3073_v15, 0.0  ;;  %v2877_v32 = vadd.f32 %v2876_v22, %v2788_v7  ;;  %v2789_v3 = vpop.f32.mrf.mxu1  ;;  %v1290_v15 = vshll.u32 %v6079_v0, 16  ;;  %v8517_v22 = vpack.c.b16 %v2235_v59, %v2234_v58 }
  0xe3   : > { %v2790_v11 = vadd.f32 %v2789_v3, %v2700_v10  ;;  %v321_v10 = vld [vmem:[%s8007_s25 + $0xac] sm:$0xf]  ;;  %v663_v3 = vrot.slane %v662_v8, 4  ;;  %v673_v42 = vrot.slane %v672_v9, 4  ;;  %v1278_v54 = vrot.slane %v1277_v14, 4 }
  0xe4   : > { %v7378_v55 = vpack.c.bf16 %v3105_v38, %v3104_v33  ;;  %v2966_v7 = vadd.f32 %v2965_v23, %v2877_v32  ;;  %v1287_v23 = vor.u32 %v1286_v6, %v8512_v4  ;;  %v7217_v33 = vld [vmem:[%s8007_s25 + $0x9c] sm:$0xff]  ;;  %v8522_v38 = vpack.c.b16 %v2379_v61, %v2378_v30  ;;  %v320_v32 = vld [vmem:[%s8007_s25 + $0xa8] sm:$0xf] }
  0xe5   : > { %v680_v58 = vshrl.u32 %v320_v32, 16  ;;  %v683_v59 = vshll.u32 %v320_v32, 16  ;;  %v689_v0 = vshll.u32 %v321_v10, 16  ;;  %v693_v61 = vshrl.u32 %v321_v10, 16 }
  0xe6   : > { %7686 = vst [vmem:[%s8430_s12 + $0x10] sm:$0xff] %v7378_v55   ;;  %v3039_v24 = vmul.f32 %v8361_v26, %v2966_v7  ;;  %v1292_v55 = vrot.slane %v1290_v15, 5  ;;  %v1288_v57 = vrot.slane %v1287_v23, 4  ;;  %v1295_v8 = vshrl.u32 %v6062_v56, 16 }
  0xe7   : > { %9874 = vst [vmem:[#allocation4_spill] sm:$0xff] %v8522_v38  ;;  %v1298_v9 = vshll.u32 %v6062_v56, 16  ;;  %v668_v15 = vsel %vm8048_vm2, %v663_v3, %v8508_v53 }
  0xe8   : > { %v3074_v6 = vadd.f32 %v8383_v63, %v3039_v24  ;;  %v1293_v24 = vsel %vm8048_vm2, %v1288_v57, %v1292_v55  ;;  %v6080_v55 = vld [vmem:[%s8007_s25 + $0xbc] sm:$0x1]  ;;  %v2236_v57 = vunpack.c.l.b16 %v668_v15 }
  0xe9   : > { %v2878_v19 = vpop.f32.mrf.mxu2  ;;  %v2703_v28 = vpop.f32.mrf.mxu0 }
  0xea   : > { %v2967_v20 = vpop.f32.mrf.mxu3  ;;  %v2879_v27 = vadd.f32 %v2878_v19, %v2790_v11  ;;  %v2792_v31 = vpop.f32.mrf.mxu1  ;;  %v1308_v11 = vshrl.u32 %v6063_v40, 16  ;;  %v678_v19 = vsel %vm8048_vm2, %v673_v42, %v677_v45  ;;  %v695_v42 = vrot.slane %v693_v61, 4  ;;  %v338_v45 = vld [vmem:[%s8007_s25 + $0xb0] sm:$0x1]  ;;  %v7285_v61 = vld [vmem:[%s9847_s1 + $0x180] sm:$0xff] }
  0xeb   : > { %v2793_v30 = vadd.f32 %v2792_v31, %v2703_v28  ;;  %v685_v28 = vrot.slane %v683_v59, 5  ;;  %v8543_v31 = vrot.slane %v689_v0, 5  ;;  %v2381_v0 = vunpack.c.l.b16 %v1293_v24  ;;  %3766 = vmatpush.bf16.msrb.mxu2 %v7285_v61 }
  0xec   : > { %v2968_v34 = vadd.f32 %v2967_v20, %v2879_v27  ;;  %2742 = vmatmul.bf16.gmra.mxu0 %v7201_v21  ;;  %v1283_v20 = vsel %vm8048_vm2, %v1278_v54, %v8512_v4  ;;  %v682_v27 = vrot.slane %v680_v58, 4  ;;  %v1300_v4 = vrot.slane %v1298_v9, 5 }
  0xed   : > { %2831 = vmatmul.bf16.gmra.mxu1 %v8517_v22  ;;  %v8546_v54 = vrot.slane %v1304_v12, 5  ;;  %v1310_v56 = vrot.slane %v1308_v11, 4  ;;  %v2237_v58 = vunpack.c.l.b16 %v678_v19  ;;  %v2380_v59 = vunpack.c.l.b16 %v1283_v20 }
  0xee   : > { %v3040_v7 = vmul.f32 %v8361_v26, %v2968_v34  ;;  %2920 = vmatmul.bf16.gmra.mxu2 %v7217_v33  ;;  %v3106_v33 = vmax.f32 %v3074_v6, 0.0  ;;  %v1297_v34 = vrot.slane %v1295_v8, 4  ;;  %v7293_v8 = vld [vmem:[%s9847_s1 + $0x1c0] sm:$0xff]  ;;  %v696_v9 = vor.u32 %v695_v42, %v8543_v31 }
  0xef   : > { %3009 = vmatmul.bf16.gmra.mxu3 %v8522_v38  ;;  %v1311_v11 = vor.u32 %v1310_v56, %v8546_v54  ;;  %v8561_v24 = vpack.c.b16 %v2381_v0, %v2380_v59 }
  0xf0   : > { %v3075_v14 = vadd.f32 %v8383_v63, %v3040_v7  ;;  %v686_v7 = vor.u32 %v685_v28, %v682_v27  ;;  %v1301_v12 = vor.u32 %v1300_v4, %v1297_v34  ;;  %3855 = vmatpush.bf16.msrb.mxu3 %v7293_v8  ;;  %v697_v34 = vrot.slane %v696_v9, 4 }
  0xf1   : > { %v2881_v21 = vpop.f32.mrf.mxu2  ;;  %v2705_v10 = vpop.f32.mrf.mxu0  ;;  %9876 = vst [vmem:[#allocation6_spill] sm:$0xff] %v8561_v24  ;;  %v1312_v56 = vrot.slane %v1311_v11, 4 }
  0xf2   : > { %v2970_v23 = vpop.f32.mrf.mxu3  ;;  %v3107_v32 = vmax.f32 %v3075_v14, 0.0  ;;  %v2882_v53 = vadd.f32 %v2881_v21, %v2793_v30  ;;  %v2794_v3 = vpop.f32.mrf.mxu1  ;;  %v699_v30 = vshll.u32 %v338_v45, 16  ;;  %v1314_v14 = vshll.u32 %v6080_v55, 16  ;;  %v7202_v21 = vld [vmem:[%s8007_s25 + $0x9c] sm:$0xff] }
  0xf3   : > { %v2795_v15 = vadd.f32 %v2794_v3, %v2705_v10  ;;  %v687_v42 = vrot.slane %v686_v7, 4  ;;  %v7269_v10 = vld [vmem:[%s9847_s1 + $0x100] sm:$0xff]  ;;  %v1302_v4 = vrot.slane %v1301_v12, 4 }
  0xf4   : > { %v7383_v40 = vpack.c.bf16 %v3107_v32, %v3106_v33  ;;  %v2971_v6 = vadd.f32 %v2970_v23, %v2882_v53  ;;  %v8559_v23 = vpack.c.b16 %v2237_v58, %v2236_v57  ;;  %v7218_v53 = vld [vmem:[%s8007_s25 + $0xa8] sm:$0xff]  ;;  %v701_v45 = vrot.slane %v699_v30, 5  ;;  %v7277_v3 = vld [vmem:[%s9847_s1 + $0x140] sm:$0xff]  ;;  %3588 = vmatpush.bf16.msrb.mxu0 %v7269_v10  ;;  %v322_v57 = vld [vmem:[%s8007_s25 + $0xb4] sm:$0xf] }
  0xf5   : > { %3677 = vmatpush.bf16.msrb.mxu1 %v7277_v3  ;;  %v323_v58 = vld [vmem:[%s8007_s25 + $0xb8] sm:$0xf]  ;;  %v6064_v7 = vld [vmem:[%s8007_s25 + $0xc0] sm:$0xf]  ;;  %v6065_v30 = vld [vmem:[%s8007_s25 + $0xc4] sm:$0xf]  ;;  %v692_v61 = vsel %vm8048_vm2, %v687_v42, %v8543_v31  ;;  %v1307_v9 = vsel %vm8048_vm2, %v1302_v4, %v8546_v54 }
  0xf6   : > { %7687 = vst [vmem:[%s8430_s12 + $0x18] sm:$0xff] %v7383_v40   ;;  %v3041_v27 = vmul.f32 %v8361_v26, %v2971_v6  ;;  %v1316_v40 = vrot.slane %v1314_v14, 5  ;;  %v702_v8 = vsel %vm8048_vm2, %v697_v34, %v701_v45  ;;  %v704_v14 = vshrl.u32 %v322_v57, 16  ;;  %v7775_v3 = vld [vmem:[%s8007_s25 + $0x4] sm:$0xf] }
  0xf7   : > { %9875 = vst [vmem:[#allocation5_spill] sm:$0xff] %v8559_v23  ;;  %v1319_v31 = vshrl.u32 %v6064_v7, 16  ;;  %v1332_v10 = vshrl.u32 %v6065_v30, 16  ;;  %v796_v34 = vrot.slane %v7775_v3, 5  ;;  %v2238_v4 = vunpack.c.l.b16 %v692_v61 }
  0xf8   : > { %v3076_v59 = vadd.f32 %v8383_v63, %v3041_v27  ;;  %v1317_v12 = vsel %vm8048_vm2, %v1312_v56, %v1316_v40  ;;  %v717_v27 = vshrl.u32 %v323_v58, 16  ;;  %v2239_v56 = vunpack.c.l.b16 %v702_v8 }
  0xf9   : > { %v2883_v19 = vpop.f32.mrf.mxu2  ;;  %v2708_v33 = vpop.f32.mrf.mxu0  ;;  %v2382_v40 = vunpack.c.l.b16 %v1307_v9  ;;  %v1334_v8 = vrot.slane %v1332_v10, 4  ;;  %v727_v9 = vld [vmem:[%s8007_s25] sm:$0xe] }
  0xfa   : > { %v2972_v20 = vpop.f32.mrf.mxu3  ;;  %v2884_v28 = vadd.f32 %v2883_v19, %v2795_v15  ;;  %v2797_v32 = vpop.f32.mrf.mxu1  ;;  %v707_v15 = vshll.u32 %v322_v57, 16  ;;  %v713_v19 = vshll.u32 %v323_v58, 16  ;;  %v2383_v57 = vunpack.c.l.b16 %v1317_v12 }
  0xfb   : > { %v2798_v6 = vadd.f32 %v2797_v32, %v2708_v33  ;;  %v1328_v33 = vshll.u32 %v6065_v30, 16  ;;  %v3108_v32 = vmax.f32 %v3076_v59, 0.0  ;;  %v706_v58 = vrot.slane %v704_v14, 4  ;;  %v339_v59 = vld [vmem:[%s8007_s25 + $0xbc] sm:$0x1] }
  0xfc   : > { %v2973_v55 = vadd.f32 %v2972_v20, %v2884_v28  ;;  %2747 = vmatmul.bf16.gmra.mxu0 %v7202_v21  ;;  %v1322_v28 = vshll.u32 %v6064_v7, 16  ;;  %v7776_v7 = vld [vmem:[%s8007_s25 + $0x8] sm:$0x1]  ;;  %v6018_v12 = vrot.slane %v727_v9, 9  ;;  %v798_v14 = vrot.slane %v796_v34, 4 }
  0xfd   : > { %2836 = vmatmul.bf16.gmra.mxu1 %v8559_v23  ;;  %v1330_v61 = vrot.slane %v1328_v33, 5  ;;  %v7203_v33 = vld [vmem:[%s8007_s25 + $0xa8] sm:$0xff]  ;;  %v723_v10 = vshll.u32 %v339_v59, 16 }
  0xfe   : > { %v3042_v0 = vmul.f32 %v8361_v26, %v2973_v55  ;;  %2925 = vmatmul.bf16.gmra.mxu2 %v7218_v53  ;;  %v1324_v23 = vrot.slane %v1322_v28, 5 }
  0xff   : > { %3014 = vmatmul.bf16.gmra.mxu3 %v8561_v24  ;;  %v799_v24 = vrot.slane %v7776_v7, 5  ;;  %v1335_v7 = vor.u32 %v1334_v8, %v1330_v61  ;;  %v725_v59 = vrot.slane %v723_v10, 5 }
 0x100   : > { %v3077_v11 = vadd.f32 %v8383_v63, %v3042_v0  ;;  %v709_v0 = vrot.slane %v707_v15, 5 }
 0x101   : > { %v2886_v20 = vpop.f32.mrf.mxu2  ;;  %v2710_v42 = vpop.f32.mrf.mxu0 }
 0x102   : > { %v2975_v21 = vpop.f32.mrf.mxu3  ;;  %v3109_v53 = vmax.f32 %v3077_v11, 0.0  ;;  %v2887_v54 = vadd.f32 %v2886_v20, %v2798_v6  ;;  %v2799_v45 = vpop.f32.mrf.mxu1  ;;  %v8593_v11 = vrot.slane %v713_v19, 5  ;;  %v719_v6 = vrot.slane %v717_v27, 4 }
 0x103   : > { %v1321_v20 = vrot.slane %v1319_v31, 4  ;;  %v2800_v15 = vadd.f32 %v2799_v45, %v2710_v42  ;;  %v8599_v19 = vpack.c.b16 %v2383_v57, %v2382_v40  ;;  %v710_v27 = vor.u32 %v709_v0, %v706_v58 }
 0x104   : > { %v7388_v55 = vpack.c.bf16 %v3109_v53, %v3108_v32  ;;  %v2976_v30 = vadd.f32 %v2975_v21, %v2887_v54  ;;  %v8597_v32 = vpack.c.b16 %v2239_v56, %v2238_v4  ;;  %v6081_v53 = vld [vmem:[%s8007_s25 + $0xc8] sm:$0x1]  ;;  %v720_v54 = vor.u32 %v719_v6, %v8593_v11 }
 0x105   : > { %v797_v42 = vsel %vm8602_vm5, %v6018_v12, %v796_v34  ;;  %v800_v45 = vsel %vm8602_vm5, %v798_v14, %v799_v24  ;;  %v1325_v0 = vor.u32 %v1324_v23, %v1321_v20  ;;  %v1338_v9 = vshll.u32 %v6081_v53, 16 }
 0x106   : > { %7688 = vst [vmem:[%s8430_s12 + $0x20] sm:$0xff] %v7388_v55   ;;  %v3043_v3 = vmul.f32 %v8361_v26, %v2976_v30  ;;  %v7219_v55 = vld [vmem:[%s8007_s25 + $0xb4] sm:$0xff]  ;;  %v3196_v57 = vunpack.c.l.b16 %v797_v42  ;;  %v3197_v58 = vunpack.c.l.b16 %v800_v45  ;;  %v711_v34 = vrot.slane %v710_v27, 4 }
 0x107   : > { %v721_v14 = vrot.slane %v720_v54, 4  ;;  %v1326_v23 = vrot.slane %v1325_v0, 4  ;;  %v1336_v20 = vrot.slane %v1335_v7, 4  ;;  %v1340_v8 = vrot.slane %v1338_v9, 5 }
 0x108   : > { %v8614_v6 = vpack.c.b16 %v3197_v58, %v3196_v57  ;;  %v3078_v24 = vadd.f32 %v8383_v63, %v3043_v3  ;;  %v716_v27 = vsel %vm8048_vm2, %v711_v34, %v8593_v11  ;;  %v7324_v58 = vld [vmem:[%s9847_s1 + $0x2b8] sm:$0xff] }
 0x109   : > { %v2888_v21 = vpop.f32.mrf.mxu2  ;;  %v2713_v56 = vpop.f32.mrf.mxu0  ;;  %v726_v54 = vsel %vm8048_vm2, %v721_v14, %v725_v59  ;;  %v1331_v45 = vsel %vm8048_vm2, %v1326_v23, %v1330_v61  ;;  %v1341_v3 = vsel %vm8048_vm2, %v1336_v20, %v1340_v8  ;;  %v7332_v61 = vld [vmem:[%s9847_s1 + $0x2f8] sm:$0xff]  ;;  %4677 = vmatpush.bf16.msra.mxu2 %v7324_v58  ;;  %v7220_v23 = vld [vmem:[%s8007_s25 + $0xc0] sm:$0xff] }
 0x10a   : > { %v2977_v28 = vpop.f32.mrf.mxu3  ;;  %v2889_v4 = vadd.f32 %v2888_v21, %v2800_v15  ;;  %v2802_v40 = vpop.f32.mrf.mxu1  ;;  %v2385_v57 = vunpack.c.l.b16 %v1341_v3  ;;  %4766 = vmatpush.bf16.msra.mxu3 %v7332_v61  ;;  %v7204_v34 = vld [vmem:[%s8007_s25 + $0xb4] sm:$0xff] }
 0x10b   : > { %v2803_v12 = vadd.f32 %v2802_v40, %v2713_v56  ;;  %v2240_v56 = vunpack.c.l.b16 %v716_v27  ;;  %v2241_v40 = vunpack.c.l.b16 %v726_v54  ;;  %v7308_v8 = vld [vmem:[%s9847_s1 + $0x238] sm:$0xff] }
 0x10c   : > { %v2978_v38 = vadd.f32 %v2977_v28, %v2889_v4  ;;  %2752 = vmatmul.bf16.gmra.mxu0 %v7203_v33  ;;  %v3110_v28 = vmax.f32 %v3078_v24, 0.0 }
 0x10d   : > { %2841 = vmatmul.bf16.gmra.mxu1 %v8597_v32  ;;  %v8638_v59 = vpack.c.b16 %v2241_v40, %v2240_v56  ;;  %4499 = vmatpush.bf16.msra.mxu0 %v7308_v8 }
 0x10e   : > { %v3044_v30 = vmul.f32 %v8361_v26, %v2978_v38  ;;  %2930 = vmatmul.bf16.gmra.mxu2 %v7219_v55  ;;  %v2384_v55 = vunpack.c.l.b16 %v1331_v45  ;;  %v7778_v45 = vld [vmem:[%s8007_s25 + $0x14] sm:$0x1] }
 0x10f   : > { %3019 = vmatmul.bf16.gmra.mxu3 %v8599_v19  ;;  %v1411_v3 = vrot.slane %v7778_v45, 5  ;;  %v6083_v45 = vld [vmem:[%s8007_s25 + $0x18] sm:$0xe] }
 0x110   : > { %v3079_v15 = vadd.f32 %v8383_v63, %v3044_v30  ;;  %v8642_v20 = vpack.c.b16 %v2385_v57, %v2384_v55 }
 0x111   : > { %v2891_v53 = vpop.f32.mrf.mxu2  ;;  %v2715_v10 = vpop.f32.mrf.mxu0 }
 0x112   : > { %v2980_v21 = vpop.f32.mrf.mxu3  ;;  %v3111_v33 = vmax.f32 %v3079_v15, 0.0  ;;  %v2892_v38 = vadd.f32 %v2891_v53, %v2803_v12  ;;  %v2804_v42 = vpop.f32.mrf.mxu1  ;;  %v7316_v15 = vld [vmem:[%s9847_s1 + $0x278] sm:$0xff]  ;;  %v7777_v53 = vld [vmem:[%s8007_s25 + $0x10] sm:$0xf] }
 0x113   : > { %v2805_v0 = vadd.f32 %v2804_v42, %v2715_v10  ;;  %4588 = vmatpush.bf16.msra.mxu1 %v7316_v15  ;;  %v8667_v15 = vld [vmem:[%s9848_s2] ss:$0 sm:$0xff] }
 0x114   : > { %v7393_v4 = vpack.c.bf16 %v3111_v33, %v3110_v28  ;;  %v2981_v11 = vadd.f32 %v2980_v21, %v2892_v38  ;;  %v1408_v21 = vrot.slane %v7777_v53, 5  ;;  %v6082_v28 = vld [vmem:[%s8007_s25 + $0xc] sm:$0xe] }
 0x115   : > { %v6098_v42 = vrot.slane %v6082_v28, 9 }
 0x116   : > { %7689 = vst [vmem:[%s8430_s12 + $0x28] sm:$0xff] %v7393_v4   ;;  %v3045_v24 = vmul.f32 %v8361_v26, %v2981_v11  ;;  %v1410_v54 = vrot.slane %v1408_v21, 4 }
 0x118   : > { %v3080_v33 = vadd.f32 %v8383_v63, %v3045_v24 }
 0x119   : > { %v2893_v7 = vpop.f32.mrf.mxu2  ;;  %v2718_v12 = vpop.f32.mrf.mxu0 }
 0x11a   : > { %v2982_v9 = vpop.f32.mrf.mxu3  ;;  %v2894_v30 = vadd.f32 %v2893_v7, %v2805_v0  ;;  %v2807_v14 = vpop.f32.mrf.mxu1  ;;  %v3112_v11 = vmax.f32 %v3080_v33, 0.0  ;;  %v1412_v0 = vsel %vm8602_vm5, %v1410_v54, %v1411_v3 }
 0x11b   : > { %v2808_v10 = vadd.f32 %v2807_v14, %v2718_v12  ;;  %v3261_v24 = vunpack.c.l.b16 %v1412_v0 }
 0x11c   : > { %v2983_v27 = vadd.f32 %v2982_v9, %v2894_v30  ;;  %2757 = vmatmul.bf16.gmra.mxu0 %v7204_v34 }
 0x11d   : > { %2846 = vmatmul.bf16.gmra.mxu1 %v8638_v59 }
 0x11e   : > { %v3046_v38 = vmul.f32 %v8361_v26, %v2983_v27  ;;  %2935 = vmatmul.bf16.gmra.mxu2 %v7220_v23  ;;  %v1409_v26 = vsel %vm8602_vm5, %v6098_v42, %v1408_v21  ;;  %v7779_v23 = vld [vmem:[%s8007_s25 + $0x10] sm:$0xf] }
 0x11f   : > { %3024 = vmatmul.bf16.gmra.mxu3 %v8642_v20  ;;  %v3260_v34 = vunpack.c.l.b16 %v1409_v26  ;;  %v803_v8 = vrot.slane %v7779_v23, 5  ;;  %v7783_v26 = vld [vmem:[%s8007_s25 + $0x20] sm:$0x1] }
 0x120   : > { %v3081_v4 = vadd.f32 %v8383_v63, %v3046_v38  ;;  %v728_v38 = vld [vmem:[%s8007_s25 + $0xc] sm:$0xe]  ;;  %v1418_v0 = vrot.slane %v7783_v26, 5 }
 0x121   : > { %v2896_v56 = vpop.f32.mrf.mxu2  ;;  %v2720_v58 = vpop.f32.mrf.mxu0  ;;  %v8670_v33 = vpack.c.b16 %v3261_v24, %v3260_v34  ;;  %v6019_v3 = vrot.slane %v728_v38, 9 }
 0x122   : > { %v2985_v40 = vpop.f32.mrf.mxu3  ;;  %v3113_v55 = vmax.f32 %v3081_v4, 0.0  ;;  %v2897_v57 = vadd.f32 %v2896_v56, %v2808_v10  ;;  %v2809_v61 = vpop.f32.mrf.mxu1  ;;  %v7781_v10 = vld [vmem:[%s8007_s25 + $0x1c] sm:$0xf]  ;;  %v805_v4 = vrot.slane %v803_v8, 4 }
 0x123   : > { %v2810_v30 = vadd.f32 %v2809_v61, %v2720_v58  ;;  %v1415_v42 = vrot.slane %v7781_v10, 5  ;;  %v6099_v58 = vrot.slane %v6083_v45, 9  ;;  %v7323_v45 = vld [vmem:[%s9847_s1 + $0x2b0] sm:$0xff] }
 0x124   : > { %v7398_v7 = vpack.c.bf16 %v3113_v55, %v3112_v11  ;;  %v2986_v9 = vadd.f32 %v2985_v40, %v2897_v57  ;;  %v7782_v55 = vld [vmem:[%s8007_s25 + $0x14] sm:$0x1]  ;;  %4678 = vmatpush.bf16.msra.mxu2 %v7323_v45 }
 0x125   : > { %v806_v57 = vrot.slane %v7782_v55, 5  ;;  %v1417_v61 = vrot.slane %v1415_v42, 4 }
 0x126   : > { %7690 = vst [vmem:[%s8430_s12 + $0x30] sm:$0xff] %v7398_v7   ;;  %v3047_v53 = vmul.f32 %v8667_v15, %v2986_v9  ;;  %v804_v9 = vsel %vm8602_vm5, %v6019_v3, %v803_v8 }
 0x127   : > { %v807_v23 = vsel %vm8602_vm5, %v805_v4, %v806_v57 }
 0x128   : > { %v3082_v56 = vadd.f32 %v8383_v63, %v3047_v53  ;;  %v1416_v53 = vsel %vm8602_vm5, %v6099_v58, %v1415_v42  ;;  %v3199_v38 = vunpack.c.l.b16 %v807_v23  ;;  %v7331_v42 = vld [vmem:[%s9847_s1 + $0x2f0] sm:$0xff] }
 0x129   : > { %v2898_v12 = vpop.f32.mrf.mxu2  ;;  %v2723_v27 = vpop.f32.mrf.mxu0  ;;  %v3262_v10 = vunpack.c.l.b16 %v1416_v53  ;;  %4767 = vmatpush.bf16.msra.mxu3 %v7331_v42 }
 0x12a   : > { %v2987_v14 = vpop.f32.mrf.mxu3  ;;  %v2899_v21 = vadd.f32 %v2898_v12, %v2810_v30  ;;  %v2812_v28 = vpop.f32.mrf.mxu1  ;;  %v3114_v34 = vmax.f32 %v3082_v56, 0.0 }
 0x12b   : > { %v2813_v11 = vadd.f32 %v2812_v28, %v2723_v27  ;;  %v3198_v28 = vunpack.c.l.b16 %v804_v9  ;;  %v7786_v9 = vld [vmem:[%s8007_s25 + $0x28] sm:$0xf] }
 0x12c   : > { %v2988_v54 = vadd.f32 %v2987_v14, %v2899_v21  ;;  %3589 = vmatmul.bf16.vlgmr.msrb.gmra.mxu0 %v8104_v37  ;;  %v8686_v37 = vld [vmem:[%s9849_s3] ss:$0 sm:$0xff]  ;;  %v1419_v21 = vsel %vm8602_vm5, %v1417_v61, %v1418_v0 }
 0x12d   : > { %3678 = vmatmul.bf16.vlgmr.msrb.gmra.mxu1 %v8614_v6 }
 0x12e   : > { %v3048_v40 = vmul.f32 %v8667_v15, %v2988_v54  ;;  %3767 = vmatmul.bf16.vlgmr.msrb.gmra.mxu2 %v8108_v41  ;;  %v3263_v54 = vunpack.c.l.b16 %v1419_v21 }
 0x12f   : > { %3856 = vmatmul.bf16.vlgmr.msrb.gmra.mxu3 %v8670_v33 }
 0x130   : > { %v3083_v63 = vadd.f32 %v8686_v37, %v3048_v40  ;;  %v3229_v40 = vpack.c.b16 %v3199_v38, %v3198_v28  ;;  %v8706_v0 = vpack.c.b16 %v3263_v54, %v3262_v10  ;;  %v7788_v10 = vld [vmem:[%s8007_s25 + $0x2c] sm:$0x1] }
 0x131   : > { %v2901_v6 = vpop.f32.mrf.mxu2  ;;  %v2725_v12 = vpop.f32.mrf.mxu0  ;;  %v1425_v54 = vrot.slane %v7788_v10, 5  ;;  %v730_v10 = vld [vmem:[%s8007_s25 + $0x24] sm:$0xe] }
 0x132   : > { %v2990_v7 = vpop.f32.mrf.mxu3  ;;  %v3115_v24 = vmax.f32 %v3083_v63, 0.0  ;;  %v2902_v30 = vadd.f32 %v2901_v6, %v2813_v11  ;;  %v2814_v14 = vpop.f32.mrf.mxu1  ;;  %v7785_v11 = vld [vmem:[%s8007_s25 + $0x1c] sm:$0xf]  ;;  %v729_v63 = vld [vmem:[%s8007_s25 + $0x18] sm:$0xe]  ;;  %v7307_v6 = vld [vmem:[%s9847_s1 + $0x230] sm:$0xff] }
 0x133   : > { %v2815_v3 = vadd.f32 %v2814_v14, %v2725_v12  ;;  %v810_v55 = vrot.slane %v7785_v11, 5  ;;  %4500 = vmatpush.bf16.msra.mxu0 %v7307_v6  ;;  %v6020_v12 = vrot.slane %v729_v63, 9 }
 0x134   : > { %v7403_v27 = vpack.c.bf16 %v3115_v24, %v3114_v34  ;;  %v2991_v8 = vadd.f32 %v2990_v7, %v2902_v30  ;;  %v7315_v7 = vld [vmem:[%s9847_s1 + $0x270] sm:$0xff]  ;;  %v1422_v34 = vrot.slane %v7786_v9, 5  ;;  %v6084_v30 = vld [vmem:[%s8007_s25 + $0x24] sm:$0xe] }
 0x135   : > { %4589 = vmatpush.bf16.msra.mxu1 %v7315_v7  ;;  %v812_v14 = vrot.slane %v810_v55, 4  ;;  %v6100_v38 = vrot.slane %v6084_v30, 9 }
 0x136   : > { %7691 = vst [vmem:[%s8430_s12 + $0x38] sm:$0xff] %v7403_v27   ;;  %v3049_v57 = vmul.f32 %v8667_v15, %v2991_v8  ;;  %v7787_v27 = vld [vmem:[%s8007_s25 + $0x20] sm:$0x1]  ;;  %v1424_v8 = vrot.slane %v1422_v34, 4 }
 0x137   : > { %v813_v28 = vrot.slane %v7787_v27, 5 }
 0x138   : > { %v3084_v23 = vadd.f32 %v8686_v37, %v3049_v57 }
 0x139   : > { %v2903_v4 = vpop.f32.mrf.mxu2  ;;  %v2728_v61 = vpop.f32.mrf.mxu0 }
 0x13a   : > { %v2992_v56 = vpop.f32.mrf.mxu3  ;;  %v2904_v58 = vadd.f32 %v2903_v4, %v2815_v3  ;;  %v2817_v26 = vpop.f32.mrf.mxu1  ;;  %v811_v3 = vsel %vm8602_vm5, %v6020_v12, %v810_v55  ;;  %v3116_v4 = vmax.f32 %v3084_v23, 0.0 }
 0x13b   : > { %v2818_v21 = vadd.f32 %v2817_v26, %v2728_v61  ;;  %v1423_v61 = vsel %vm8602_vm5, %v6100_v38, %v1422_v34  ;;  %v1426_v26 = vsel %vm8602_vm5, %v1424_v8, %v1425_v54  ;;  %v3200_v6 = vunpack.c.l.b16 %v811_v3  ;;  %v7790_v54 = vld [vmem:[%s8007_s25 + $0x34] sm:$0xf] }
 0x13c   : > { %v2993_v24 = vadd.f32 %v2992_v56, %v2904_v58  ;;  %3594 = vmatmul.bf16.gmra.mxu0 %v8146_v25  ;;  %v814_v58 = vsel %vm8602_vm5, %v812_v14, %v813_v28  ;;  %v3264_v9 = vunpack.c.l.b16 %v1423_v61  ;;  %v6021_v3 = vrot.slane %v730_v10, 9 }
 0x13d   : > { %3683 = vmatmul.bf16.gmra.mxu1 %v3229_v40  ;;  %v3201_v7 = vunpack.c.l.b16 %v814_v58 }
 0x13e   : > { %v3050_v53 = vmul.f32 %v8667_v15, %v2993_v24  ;;  %3772 = vmatmul.bf16.gmra.mxu2 %v8149_v29  ;;  %v3265_v24 = vunpack.c.l.b16 %v1426_v26 }
 0x13f   : > { %3861 = vmatmul.bf16.gmra.mxu3 %v8706_v0  ;;  %v3230_v14 = vpack.c.b16 %v3201_v7, %v3200_v6 }
 0x140   : > { %v3085_v25 = vadd.f32 %v8686_v37, %v3050_v53  ;;  %v7789_v53 = vld [vmem:[%s8007_s25 + $0x28] sm:$0xf]  ;;  %v8736_v8 = vpack.c.b16 %v3265_v24, %v3264_v9 }
 0x141   : > { %v2906_v45 = vpop.f32.mrf.mxu2  ;;  %v2730_v11 = vpop.f32.mrf.mxu0 }
 0x142   : > { %v2995_v42 = vpop.f32.mrf.mxu3  ;;  %v3117_v56 = vmax.f32 %v3085_v25, 0.0  ;;  %v2907_v40 = vadd.f32 %v2906_v45, %v2818_v21  ;;  %v2819_v57 = vpop.f32.mrf.mxu1  ;;  %v817_v21 = vrot.slane %v7789_v53, 5  ;;  %v1429_v25 = vrot.slane %v7790_v54, 5 }
 0x143   : > { %v2820_v30 = vadd.f32 %v2819_v57, %v2730_v11  ;;  %v7791_v57 = vld [vmem:[%s8007_s25 + $0x2c] sm:$0x1] }
 0x144   : > { %v7408_v63 = vpack.c.bf16 %v3117_v56, %v3116_v4  ;;  %v2996_v55 = vadd.f32 %v2995_v42, %v2907_v40  ;;  %v6085_v42 = vld [vmem:[%s8007_s25 + $0x30] sm:$0xe]  ;;  %v819_v4 = vrot.slane %v817_v21, 4  ;;  %v820_v58 = vrot.slane %v7791_v57, 5 }
 0x145   : > { %v6101_v61 = vrot.slane %v6085_v42, 9  ;;  %v1431_v26 = vrot.slane %v1429_v25, 4  ;;  %v818_v9 = vsel %vm8602_vm5, %v6021_v3, %v817_v21  ;;  %v7322_v42 = vld [vmem:[%s9847_s1 + $0x2a8] sm:$0xff] }
 0x146   : > { %7692 = vst [vmem:[%s8430_s12 + $0x40] sm:$0xff] %v7408_v63   ;;  %v3051_v34 = vmul.f32 %v8667_v15, %v2996_v55  ;;  %v7792_v63 = vld [vmem:[%s8007_s25 + $0x38] sm:$0x1]  ;;  %v821_v53 = vsel %vm8602_vm5, %v819_v4, %v820_v58  ;;  %4679 = vmatpush.bf16.msra.mxu2 %v7322_v42 }
 0x147   : > { %v1432_v6 = vrot.slane %v7792_v63, 5  ;;  %v3203_v10 = vunpack.c.l.b16 %v821_v53 }
 0x148   : > { %v3086_v56 = vadd.f32 %v8686_v37, %v3051_v34  ;;  %v1430_v34 = vsel %vm8602_vm5, %v6101_v61, %v1429_v25  ;;  %v7330_v25 = vld [vmem:[%s9847_s1 + $0x2e8] sm:$0xff] }
 0x149   : > { %v2908_v12 = vpop.f32.mrf.mxu2  ;;  %v2733_v28 = vpop.f32.mrf.mxu0  ;;  %v3266_v54 = vunpack.c.l.b16 %v1430_v34  ;;  %4768 = vmatpush.bf16.msra.mxu3 %v7330_v25 }
 0x14a   : > { %v2997_v23 = vpop.f32.mrf.mxu3  ;;  %v2909_v27 = vadd.f32 %v2908_v12, %v2820_v30  ;;  %v2822_v38 = vpop.f32.mrf.mxu1  ;;  %v3118_v24 = vmax.f32 %v3086_v56, 0.0 }
 0x14b   : > { %v2823_v11 = vadd.f32 %v2822_v38, %v2733_v28  ;;  %v3202_v38 = vunpack.c.l.b16 %v818_v9  ;;  %v7794_v9 = vld [vmem:[%s8007_s25 + $0x40] sm:$0xf] }
 0x14c   : > { %v2998_v45 = vadd.f32 %v2997_v23, %v2909_v27  ;;  %3599 = vmatmul.bf16.gmra.mxu0 %v8168_v16  ;;  %v1433_v27 = vsel %vm8602_vm5, %v1431_v26, %v1432_v6 }
 0x14d   : > { %3688 = vmatmul.bf16.gmra.mxu1 %v3230_v14 }
 0x14e   : > { %v3052_v40 = vmul.f32 %v8667_v15, %v2998_v45  ;;  %3777 = vmatmul.bf16.gmra.mxu2 %v8171_v18  ;;  %v3267_v45 = vunpack.c.l.b16 %v1433_v27 }
 0x14f   : > { %3866 = vmatmul.bf16.gmra.mxu3 %v8736_v8 }
 0x150   : > { %v3087_v16 = vadd.f32 %v8686_v37, %v3052_v40  ;;  %v3231_v40 = vpack.c.b16 %v3203_v10, %v3202_v38  ;;  %v8766_v6 = vpack.c.b16 %v3267_v45, %v3266_v54  ;;  %v7796_v54 = vld [vmem:[%s8007_s25 + $0x44] sm:$0x1] }
 0x151   : > { %v2911_v7 = vpop.f32.mrf.mxu2  ;;  %v2735_v23 = vpop.f32.mrf.mxu0  ;;  %v1439_v45 = vrot.slane %v7796_v54, 5  ;;  %v732_v54 = vld [vmem:[%s8007_s25 + $0x3c] sm:$0xe] }
 0x152   : > { %v3000_v55 = vpop.f32.mrf.mxu3  ;;  %v3119_v30 = vmax.f32 %v3087_v16, 0.0  ;;  %v2912_v12 = vadd.f32 %v2911_v7, %v2823_v11  ;;  %v2824_v14 = vpop.f32.mrf.mxu1  ;;  %v7793_v11 = vld [vmem:[%s8007_s25 + $0x34] sm:$0xf]  ;;  %v731_v16 = vld [vmem:[%s8007_s25 + $0x30] sm:$0xe]  ;;  %v7306_v7 = vld [vmem:[%s9847_s1 + $0x228] sm:$0xff] }
 0x153   : > { %v2825_v3 = vadd.f32 %v2824_v14, %v2735_v23  ;;  %v824_v57 = vrot.slane %v7793_v11, 5  ;;  %4501 = vmatpush.bf16.msra.mxu0 %v7306_v7  ;;  %v6022_v23 = vrot.slane %v731_v16, 9 }
 0x154   : > { %v7413_v28 = vpack.c.bf16 %v3119_v30, %v3118_v24  ;;  %v3001_v21 = vadd.f32 %v3000_v55, %v2912_v12  ;;  %v7314_v55 = vld [vmem:[%s9847_s1 + $0x268] sm:$0xff]  ;;  %v1436_v24 = vrot.slane %v7794_v9, 5  ;;  %v6086_v12 = vld [vmem:[%s8007_s25 + $0x3c] sm:$0xe] }
 0x155   : > { %4590 = vmatpush.bf16.msra.mxu1 %v7314_v55  ;;  %v826_v14 = vrot.slane %v824_v57, 4  ;;  %v6102_v10 = vrot.slane %v6086_v12, 9 }
 0x156   : > { %7693 = vst [vmem:[%s8430_s12 + $0x48] sm:$0xff] %v7413_v28   ;;  %v3053_v58 = vmul.f32 %v8667_v15, %v3001_v21  ;;  %v7795_v28 = vld [vmem:[%s8007_s25 + $0x38] sm:$0x1]  ;;  %v1438_v21 = vrot.slane %v1436_v24, 4 }
 0x157   : > { %v827_v38 = vrot.slane %v7795_v28, 5 }
 0x158   : > { %v3088_v53 = vadd.f32 %v8686_v37, %v3053_v58 }
 0x159   : > { %v2913_v4 = vpop.f32.mrf.mxu2  ;;  %v2738_v26 = vpop.f32.mrf.mxu0 }
 0x15a   : > { %v3002_v56 = vpop.f32.mrf.mxu3  ;;  %v2914_v61 = vadd.f32 %v2913_v4, %v2825_v3  ;;  %v2827_v63 = vpop.f32.mrf.mxu1  ;;  %v825_v3 = vsel %vm8602_vm5, %v6022_v23, %v824_v57  ;;  %v3120_v4 = vmax.f32 %v3088_v53, 0.0 }
 0x15b   : > { %v2828_v27 = vadd.f32 %v2827_v63, %v2738_v26  ;;  %v1437_v26 = vsel %vm8602_vm5, %v6102_v10, %v1436_v24  ;;  %v1440_v63 = vsel %vm8602_vm5, %v1438_v21, %v1439_v45  ;;  %v3204_v7 = vunpack.c.l.b16 %v825_v3  ;;  %v7798_v45 = vld [vmem:[%s8007_s25 + $0x4c] sm:$0xf] }
 0x15c   : > { %v3003_v30 = vadd.f32 %v3002_v56, %v2914_v61  ;;  %3604 = vmatmul.bf16.gmra.mxu0 %v8202_v1  ;;  %v828_v61 = vsel %vm8602_vm5, %v826_v14, %v827_v38  ;;  %v3268_v9 = vunpack.c.l.b16 %v1437_v26  ;;  %v6023_v3 = vrot.slane %v732_v54, 9 }
 0x15d   : > { %3693 = vmatmul.bf16.gmra.mxu1 %v3231_v40  ;;  %v3205_v55 = vunpack.c.l.b16 %v828_v61 }
 0x15e   : > { %v3054_v34 = vmul.f32 %v8667_v15, %v3003_v30  ;;  %3782 = vmatmul.bf16.gmra.mxu2 %v8204_v2  ;;  %v3269_v30 = vunpack.c.l.b16 %v1440_v63 }
 0x15f   : > { %3871 = vmatmul.bf16.gmra.mxu3 %v8766_v6  ;;  %v3232_v14 = vpack.c.b16 %v3205_v55, %v3204_v7 }
 0x160   : > { %v3089_v1 = vadd.f32 %v8686_v37, %v3054_v34  ;;  %v7797_v34 = vld [vmem:[%s8007_s25 + $0x40] sm:$0xf]  ;;  %v8796_v21 = vpack.c.b16 %v3269_v30, %v3268_v9 }
 0x161   : > { %v2916_v42 = vpop.f32.mrf.mxu2  ;;  %v2740_v11 = vpop.f32.mrf.mxu0 }
 0x162   : > { %v3005_v25 = vpop.f32.mrf.mxu3  ;;  %v3121_v56 = vmax.f32 %v3089_v1, 0.0  ;;  %v2917_v40 = vadd.f32 %v2916_v42, %v2828_v27  ;;  %v2829_v58 = vpop.f32.mrf.mxu1  ;;  %v831_v27 = vrot.slane %v7797_v34, 5  ;;  %v1443_v1 = vrot.slane %v7798_v45, 5 }
 0x163   : > { %v2830_v12 = vadd.f32 %v2829_v58, %v2740_v11  ;;  %v7799_v58 = vld [vmem:[%s8007_s25 + $0x44] sm:$0x1] }
 0x164   : > { %v7418_v16 = vpack.c.bf16 %v3121_v56, %v3120_v4  ;;  %v3006_v57 = vadd.f32 %v3005_v25, %v2917_v40  ;;  %v6087_v25 = vld [vmem:[%s8007_s25 + $0x48] sm:$0xe]  ;;  %v833_v4 = vrot.slane %v831_v27, 4  ;;  %v834_v61 = vrot.slane %v7799_v58, 5 }
 0x165   : > { %v6103_v26 = vrot.slane %v6087_v25, 9  ;;  %v1445_v63 = vrot.slane %v1443_v1, 4  ;;  %v832_v9 = vsel %vm8602_vm5, %v6023_v3, %v831_v27  ;;  %v7321_v25 = vld [vmem:[%s9847_s1 + $0x2a0] sm:$0xff] }
 0x166   : > { %7694 = vst [vmem:[%s8430_s12 + $0x50] sm:$0xff] %v7418_v16   ;;  %v3055_v24 = vmul.f32 %v8667_v15, %v3006_v57  ;;  %v7800_v16 = vld [vmem:[%s8007_s25 + $0x50] sm:$0x1]  ;;  %v835_v34 = vsel %vm8602_vm5, %v833_v4, %v834_v61  ;;  %4680 = vmatpush.bf16.msra.mxu2 %v7321_v25 }
 0x167   : > { %v1446_v7 = vrot.slane %v7800_v16, 5  ;;  %v3207_v54 = vunpack.c.l.b16 %v835_v34 }
 0x168   : > { %v3090_v56 = vadd.f32 %v8686_v37, %v3055_v24  ;;  %v1444_v24 = vsel %vm8602_vm5, %v6103_v26, %v1443_v1  ;;  %v7329_v1 = vld [vmem:[%s9847_s1 + $0x2e0] sm:$0xff] }
 0x169   : > { %v2918_v23 = vpop.f32.mrf.mxu2  ;;  %v2743_v38 = vpop.f32.mrf.mxu0  ;;  %v3270_v45 = vunpack.c.l.b16 %v1444_v24  ;;  %4769 = vmatpush.bf16.msra.mxu3 %v7329_v1 }
 0x16a   : > { %v3007_v53 = vpop.f32.mrf.mxu3  ;;  %v2919_v28 = vadd.f32 %v2918_v23, %v2830_v12  ;;  %v2832_v10 = vpop.f32.mrf.mxu1  ;;  %v3122_v30 = vmax.f32 %v3090_v56, 0.0 }
 0x16b   : > { %v2833_v11 = vadd.f32 %v2832_v10, %v2743_v38  ;;  %v3206_v10 = vunpack.c.l.b16 %v832_v9  ;;  %v7802_v9 = vld [vmem:[%s8007_s25 + $0x58] sm:$0xf] }
 0x16c   : > { %v3008_v42 = vadd.f32 %v3007_v53, %v2919_v28  ;;  %3609 = vmatmul.bf16.gmra.mxu0 %v8224_v60  ;;  %v1447_v28 = vsel %vm8602_vm5, %v1445_v63, %v1446_v7 }
 0x16d   : > { %3698 = vmatmul.bf16.gmra.mxu1 %v3232_v14 }
 0x16e   : > { %v3056_v40 = vmul.f32 %v8667_v15, %v3008_v42  ;;  %3787 = vmatmul.bf16.gmra.mxu2 %v8227_v62  ;;  %v3271_v42 = vunpack.c.l.b16 %v1447_v28 }
 0x16f   : > { %3876 = vmatmul.bf16.gmra.mxu3 %v8796_v21 }
 0x170   : > { %v3091_v60 = vadd.f32 %v8686_v37, %v3056_v40  ;;  %v3233_v40 = vpack.c.b16 %v3207_v54, %v3206_v10  ;;  %v8826_v7 = vpack.c.b16 %v3271_v42, %v3270_v45  ;;  %v7804_v45 = vld [vmem:[%s8007_s25 + $0x5c] sm:$0x1] }
 0x171   : > { %v2921_v55 = vpop.f32.mrf.mxu2  ;;  %v2745_v53 = vpop.f32.mrf.mxu0  ;;  %v1453_v42 = vrot.slane %v7804_v45, 5  ;;  %v734_v45 = vld [vmem:[%s8007_s25 + $0x54] sm:$0xe] }
 0x172   : > { %v3010_v57 = vpop.f32.mrf.mxu3  ;;  %v3123_v12 = vmax.f32 %v3091_v60, 0.0  ;;  %v2922_v23 = vadd.f32 %v2921_v55, %v2833_v11  ;;  %v2834_v14 = vpop.f32.mrf.mxu1  ;;  %v7801_v11 = vld [vmem:[%s8007_s25 + $0x4c] sm:$0xf]  ;;  %v733_v60 = vld [vmem:[%s8007_s25 + $0x48] sm:$0xe]  ;;  %v7305_v55 = vld [vmem:[%s9847_s1 + $0x220] sm:$0xff] }
 0x173   : > { %v2835_v3 = vadd.f32 %v2834_v14, %v2745_v53  ;;  %v838_v58 = vrot.slane %v7801_v11, 5  ;;  %4502 = vmatpush.bf16.msra.mxu0 %v7305_v55  ;;  %v6024_v53 = vrot.slane %v733_v60, 9 }
 0x174   : > { %v7423_v38 = vpack.c.bf16 %v3123_v12, %v3122_v30  ;;  %v3011_v27 = vadd.f32 %v3010_v57, %v2922_v23  ;;  %v7313_v57 = vld [vmem:[%s9847_s1 + $0x260] sm:$0xff]  ;;  %v1450_v30 = vrot.slane %v7802_v9, 5  ;;  %v6088_v23 = vld [vmem:[%s8007_s25 + $0x54] sm:$0xe] }
 0x175   : > { %4591 = vmatpush.bf16.msra.mxu1 %v7313_v57  ;;  %v840_v14 = vrot.slane %v838_v58, 4  ;;  %v6104_v54 = vrot.slane %v6088_v23, 9 }
 0x176   : > { %7695 = vst [vmem:[%s8430_s12 + $0x58] sm:$0xff] %v7423_v38   ;;  %v3057_v61 = vmul.f32 %v8667_v15, %v3011_v27  ;;  %v7803_v38 = vld [vmem:[%s8007_s25 + $0x50] sm:$0x1]  ;;  %v1452_v27 = vrot.slane %v1450_v30, 4 }
 0x177   : > { %v841_v10 = vrot.slane %v7803_v38, 5 }
 0x178   : > { %v3092_v34 = vadd.f32 %v8686_v37, %v3057_v61 }
 0x179   : > { %v2923_v4 = vpop.f32.mrf.mxu2  ;;  %v2748_v63 = vpop.f32.mrf.mxu0 }
 0x17a   : > { %v3012_v56 = vpop.f32.mrf.mxu3  ;;  %v2924_v26 = vadd.f32 %v2923_v4, %v2835_v3  ;;  %v2837_v16 = vpop.f32.mrf.mxu1  ;;  %v839_v3 = vsel %vm8602_vm5, %v6024_v53, %v838_v58  ;;  %v3124_v4 = vmax.f32 %v3092_v34, 0.0 }
 0x17b   : > { %v2838_v28 = vadd.f32 %v2837_v16, %v2748_v63  ;;  %v1451_v63 = vsel %vm8602_vm5, %v6104_v54, %v1450_v30  ;;  %v1454_v16 = vsel %vm8602_vm5, %v1452_v27, %v1453_v42  ;;  %v3208_v55 = vunpack.c.l.b16 %v839_v3  ;;  %v7806_v42 = vld [vmem:[%s8007_s25 + $0x64] sm:$0xf] }
 0x17c   : > { %v3013_v12 = vadd.f32 %v3012_v56, %v2924_v26  ;;  %3614 = vmatmul.bf16.gmra.mxu0 %v8258_v49  ;;  %v842_v26 = vsel %vm8602_vm5, %v840_v14, %v841_v10  ;;  %v3272_v9 = vunpack.c.l.b16 %v1451_v63  ;;  %v6025_v3 = vrot.slane %v734_v45, 9 }
 0x17d   : > { %3703 = vmatmul.bf16.gmra.mxu1 %v3233_v40  ;;  %v3209_v57 = vunpack.c.l.b16 %v842_v26 }
 0x17e   : > { %v3058_v24 = vmul.f32 %v8667_v15, %v3013_v12  ;;  %3792 = vmatmul.bf16.gmra.mxu2 %v8260_v50  ;;  %v3273_v12 = vunpack.c.l.b16 %v1454_v16 }
 0x17f   : > { %3881 = vmatmul.bf16.gmra.mxu3 %v8826_v7  ;;  %v3234_v14 = vpack.c.b16 %v3209_v57, %v3208_v55 }
 0x180   : > { %v3093_v49 = vadd.f32 %v8686_v37, %v3058_v24  ;;  %v7805_v24 = vld [vmem:[%s8007_s25 + $0x58] sm:$0xf]  ;;  %v8856_v27 = vpack.c.b16 %v3273_v12, %v3272_v9 }
 0x181   : > { %v2926_v25 = vpop.f32.mrf.mxu2  ;;  %v2750_v11 = vpop.f32.mrf.mxu0 }
 0x182   : > { %v3015_v1 = vpop.f32.mrf.mxu3  ;;  %v3125_v56 = vmax.f32 %v3093_v49, 0.0  ;;  %v2927_v40 = vadd.f32 %v2926_v25, %v2838_v28  ;;  %v2839_v61 = vpop.f32.mrf.mxu1  ;;  %v845_v28 = vrot.slane %v7805_v24, 5  ;;  %v1457_v49 = vrot.slane %v7806_v42, 5 }
 0x183   : > { %v2840_v23 = vadd.f32 %v2839_v61, %v2750_v11  ;;  %v7807_v61 = vld [vmem:[%s8007_s25 + $0x5c] sm:$0x1] }
 0x184   : > { %v7428_v60 = vpack.c.bf16 %v3125_v56, %v3124_v4  ;;  %v3016_v58 = vadd.f32 %v3015_v1, %v2927_v40  ;;  %v6089_v1 = vld [vmem:[%s8007_s25 + $0x60] sm:$0xe]  ;;  %v847_v4 = vrot.slane %v845_v28, 4  ;;  %v848_v26 = vrot.slane %v7807_v61, 5 }
 0x185   : > { %v6105_v63 = vrot.slane %v6089_v1, 9  ;;  %v1459_v16 = vrot.slane %v1457_v49, 4  ;;  %v846_v9 = vsel %vm8602_vm5, %v6025_v3, %v845_v28  ;;  %v7320_v1 = vld [vmem:[%s9847_s1 + $0x298] sm:$0xff] }
 0x186   : > { %7696 = vst [vmem:[%s8430_s12 + $0x60] sm:$0xff] %v7428_v60   ;;  %v3059_v30 = vmul.f32 %v8667_v15, %v3016_v58  ;;  %v7808_v60 = vld [vmem:[%s8007_s25 + $0x68] sm:$0x1]  ;;  %v849_v24 = vsel %vm8602_vm5, %v847_v4, %v848_v26  ;;  %4681 = vmatpush.bf16.msra.mxu2 %v7320_v1 }
 0x187   : > { %v1460_v55 = vrot.slane %v7808_v60, 5  ;;  %v3211_v45 = vunpack.c.l.b16 %v849_v24 }
 0x188   : > { %v3094_v56 = vadd.f32 %v8686_v37, %v3059_v30  ;;  %v1458_v30 = vsel %vm8602_vm5, %v6105_v63, %v1457_v49  ;;  %v7328_v49 = vld [vmem:[%s9847_s1 + $0x2d8] sm:$0xff] }
 0x189   : > { %v2928_v53 = vpop.f32.mrf.mxu2  ;;  %v2753_v10 = vpop.f32.mrf.mxu0  ;;  %v3274_v42 = vunpack.c.l.b16 %v1458_v30  ;;  %4770 = vmatpush.bf16.msra.mxu3 %v7328_v49 }
 0x18a   : > { %v3017_v34 = vpop.f32.mrf.mxu3  ;;  %v2929_v38 = vadd.f32 %v2928_v53, %v2840_v23  ;;  %v2842_v54 = vpop.f32.mrf.mxu1  ;;  %v3126_v12 = vmax.f32 %v3094_v56, 0.0 }
 0x18b   : > { %v2843_v11 = vadd.f32 %v2842_v54, %v2753_v10  ;;  %v3210_v54 = vunpack.c.l.b16 %v846_v9  ;;  %v7810_v9 = vld [vmem:[%s8007_s25 + $0x70] sm:$0xf] }
 0x18c   : > { %v3018_v25 = vadd.f32 %v3017_v34, %v2929_v38  ;;  %3619 = vmatmul.bf16.gmra.mxu0 %v8280_v47  ;;  %v1461_v38 = vsel %vm8602_vm5, %v1459_v16, %v1460_v55 }
 0x18d   : > { %3708 = vmatmul.bf16.gmra.mxu1 %v3234_v14 }
 0x18e   : > { %v3060_v40 = vmul.f32 %v8667_v15, %v3018_v25  ;;  %3797 = vmatmul.bf16.gmra.mxu2 %v8283_v52  ;;  %v3275_v25 = vunpack.c.l.b16 %v1461_v38 }
 0x18f   : > { %3886 = vmatmul.bf16.gmra.mxu3 %v8856_v27 }
 0x190   : > { %v3095_v47 = vadd.f32 %v8686_v37, %v3060_v40  ;;  %v3235_v40 = vpack.c.b16 %v3211_v45, %v3210_v54  ;;  %v8886_v55 = vpack.c.b16 %v3275_v25, %v3274_v42  ;;  %v7812_v42 = vld [vmem:[%s8007_s25 + $0x74] sm:$0x1] }
 0x191   : > { %v2931_v57 = vpop.f32.mrf.mxu2  ;;  %v2755_v34 = vpop.f32.mrf.mxu0  ;;  %v1467_v25 = vrot.slane %v7812_v42, 5  ;;  %v736_v42 = vld [vmem:[%s8007_s25 + $0x6c] sm:$0xe] }
 0x192   : > { %v3020_v58 = vpop.f32.mrf.mxu3  ;;  %v3127_v23 = vmax.f32 %v3095_v47, 0.0  ;;  %v2932_v53 = vadd.f32 %v2931_v57, %v2843_v11  ;;  %v2844_v14 = vpop.f32.mrf.mxu1  ;;  %v7809_v11 = vld [vmem:[%s8007_s25 + $0x64] sm:$0xf]  ;;  %v735_v47 = vld [vmem:[%s8007_s25 + $0x60] sm:$0xe]  ;;  %v7304_v57 = vld [vmem:[%s9847_s1 + $0x218] sm:$0xff] }
 0x193   : > { %v2845_v3 = vadd.f32 %v2844_v14, %v2755_v34  ;;  %v852_v61 = vrot.slane %v7809_v11, 5  ;;  %4503 = vmatpush.bf16.msra.mxu0 %v7304_v57  ;;  %v6026_v34 = vrot.slane %v735_v47, 9 }
 0x194   : > { %v7433_v10 = vpack.c.bf16 %v3127_v23, %v3126_v12  ;;  %v3021_v28 = vadd.f32 %v3020_v58, %v2932_v53  ;;  %v7312_v58 = vld [vmem:[%s9847_s1 + $0x258] sm:$0xff]  ;;  %v1464_v12 = vrot.slane %v7810_v9, 5  ;;  %v6090_v53 = vld [vmem:[%s8007_s25 + $0x6c] sm:$0xe] }
 0x195   : > { %4592 = vmatpush.bf16.msra.mxu1 %v7312_v58  ;;  %v854_v14 = vrot.slane %v852_v61, 4  ;;  %v6106_v45 = vrot.slane %v6090_v53, 9 }
 0x196   : > { %7697 = vst [vmem:[%s8430_s12 + $0x68] sm:$0xff] %v7433_v10   ;;  %v3061_v26 = vmul.f32 %v8667_v15, %v3021_v28  ;;  %v7811_v10 = vld [vmem:[%s8007_s25 + $0x68] sm:$0x1]  ;;  %v1466_v28 = vrot.slane %v1464_v12, 4 }
 0x197   : > { %v855_v54 = vrot.slane %v7811_v10, 5 }
 0x198   : > { %v3096_v24 = vadd.f32 %v8686_v37, %v3061_v26 }
 0x199   : > { %v2933_v4 = vpop.f32.mrf.mxu2  ;;  %v2758_v16 = vpop.f32.mrf.mxu0 }
 0x19a   : > { %v3022_v56 = vpop.f32.mrf.mxu3  ;;  %v2934_v63 = vadd.f32 %v2933_v4, %v2845_v3  ;;  %v2847_v60 = vpop.f32.mrf.mxu1  ;;  %v853_v3 = vsel %vm8602_vm5, %v6026_v34, %v852_v61  ;;  %v3128_v4 = vmax.f32 %v3096_v24, 0.0 }
 0x19b   : > { %v2848_v38 = vadd.f32 %v2847_v60, %v2758_v16  ;;  %v1465_v16 = vsel %vm8602_vm5, %v6106_v45, %v1464_v12  ;;  %v1468_v60 = vsel %vm8602_vm5, %v1466_v28, %v1467_v25  ;;  %v3212_v57 = vunpack.c.l.b16 %v853_v3  ;;  %v7814_v25 = vld [vmem:[%s8007_s25 + $0x7c] sm:$0xf] }
 0x19c   : > { %v3023_v23 = vadd.f32 %v3022_v56, %v2934_v63  ;;  %3624 = vmatmul.bf16.gmra.mxu0 %v8308_v36  ;;  %v856_v63 = vsel %vm8602_vm5, %v854_v14, %v855_v54  ;;  %v3276_v9 = vunpack.c.l.b16 %v1465_v16  ;;  %v6027_v3 = vrot.slane %v736_v42, 9 }
 0x19d   : > { %3713 = vmatmul.bf16.gmra.mxu1 %v3235_v40  ;;  %v3213_v58 = vunpack.c.l.b16 %v856_v63 }
 0x19e   : > { %v3062_v30 = vmul.f32 %v8667_v15, %v3023_v23  ;;  %3802 = vmatmul.bf16.gmra.mxu2 %v8311_v43  ;;  %v3277_v23 = vunpack.c.l.b16 %v1468_v60 }
 0x19f   : > { %3891 = vmatmul.bf16.gmra.mxu3 %v8886_v55  ;;  %v3236_v14 = vpack.c.b16 %v3213_v58, %v3212_v57 }
 0x1a0   : > { %v3097_v36 = vadd.f32 %v8686_v37, %v3062_v30  ;;  %v7813_v30 = vld [vmem:[%s8007_s25 + $0x70] sm:$0xf]  ;;  %v8916_v28 = vpack.c.b16 %v3277_v23, %v3276_v9 }
 0x1a1   : > { %v2936_v1 = vpop.f32.mrf.mxu2  ;;  %v2760_v11 = vpop.f32.mrf.mxu0 }
 0x1a2   : > { %v3025_v49 = vpop.f32.mrf.mxu3  ;;  %v3129_v56 = vmax.f32 %v3097_v36, 0.0  ;;  %v2937_v40 = vadd.f32 %v2936_v1, %v2848_v38  ;;  %v2849_v26 = vpop.f32.mrf.mxu1  ;;  %v859_v38 = vrot.slane %v7813_v30, 5  ;;  %9879 = vst [vmem:[#allocation7_spill] sm:$0xff] %v8916_v28  ;;  %v1471_v36 = vrot.slane %v7814_v25, 5 }
 0x1a3   : > { %v2850_v53 = vadd.f32 %v2849_v26, %v2760_v11  ;;  %v7815_v26 = vld [vmem:[%s8007_s25 + $0x74] sm:$0x1] }
 0x1a4   : > { %v7438_v47 = vpack.c.bf16 %v3129_v56, %v3128_v4  ;;  %v3026_v61 = vadd.f32 %v3025_v49, %v2937_v40  ;;  %v6091_v49 = vld [vmem:[%s8007_s25 + $0x78] sm:$0xe]  ;;  %v861_v4 = vrot.slane %v859_v38, 4  ;;  %v862_v63 = vrot.slane %v7815_v26, 5 }
 0x1a5   : > { %v6107_v16 = vrot.slane %v6091_v49, 9  ;;  %v1473_v60 = vrot.slane %v1471_v36, 4  ;;  %v860_v9 = vsel %vm8602_vm5, %v6027_v3, %v859_v38  ;;  %v7319_v49 = vld [vmem:[%s9847_s1 + $0x290] sm:$0xff] }
 0x1a6   : > { %7698 = vst [vmem:[%s8430_s12 + $0x70] sm:$0xff] %v7438_v47   ;;  %v3063_v12 = vmul.f32 %v8667_v15, %v3026_v61  ;;  %v7816_v47 = vld [vmem:[%s8007_s25 + $0x80] sm:$0x1]  ;;  %v863_v30 = vsel %vm8602_vm5, %v861_v4, %v862_v63  ;;  %4682 = vmatpush.bf16.msra.mxu2 %v7319_v49 }
 0x1a7   : > { %v1474_v57 = vrot.slane %v7816_v47, 5  ;;  %v3215_v42 = vunpack.c.l.b16 %v863_v30 }
 0x1a8   : > { %v3098_v56 = vadd.f32 %v8686_v37, %v3063_v12  ;;  %v1472_v12 = vsel %vm8602_vm5, %v6107_v16, %v1471_v36  ;;  %v7327_v36 = vld [vmem:[%s9847_s1 + $0x2d0] sm:$0xff] }
 0x1a9   : > { %v2938_v34 = vpop.f32.mrf.mxu2  ;;  %v3590_v54 = vpop.f32.mrf.mxu0  ;;  %v3278_v25 = vunpack.c.l.b16 %v1472_v12  ;;  %4771 = vmatpush.bf16.msra.mxu3 %v7327_v36 }
 0x1aa   : > { %v3027_v24 = vpop.f32.mrf.mxu3  ;;  %v2939_v10 = vadd.f32 %v2938_v34, %v2850_v53  ;;  %v3679_v45 = vpop.f32.mrf.mxu1  ;;  %v3130_v23 = vmax.f32 %v3098_v56, 0.0 }
 0x1ab   : > { %v3680_v11 = vadd.f32 %v3679_v45, %v3590_v54  ;;  %v3214_v45 = vunpack.c.l.b16 %v860_v9  ;;  %v7818_v9 = vld [vmem:[%s8007_s25 + $0x88] sm:$0xf] }
 0x1ac   : > { %v3028_v1 = vadd.f32 %v3027_v24, %v2939_v10  ;;  %3629 = vmatmul.bf16.gmra.mxu0 %v8336_v35  ;;  %v1475_v10 = vsel %vm8602_vm5, %v1473_v60, %v1474_v57 }
 0x1ad   : > { %3718 = vmatmul.bf16.gmra.mxu1 %v3236_v14 }
 0x1ae   : > { %v3064_v40 = vmul.f32 %v8667_v15, %v3028_v1  ;;  %3807 = vmatmul.bf16.gmra.mxu2 %v8339_v44  ;;  %v3279_v1 = vunpack.c.l.b16 %v1475_v10 }
 0x1af   : > { %3896 = vmatmul.bf16.gmra.mxu3 %v8916_v28 }
 0x1b0   : > { %v3099_v35 = vadd.f32 %v8686_v37, %v3064_v40  ;;  %v3237_v40 = vpack.c.b16 %v3215_v42, %v3214_v45  ;;  %v8946_v57 = vpack.c.b16 %v3279_v1, %v3278_v25  ;;  %v7820_v25 = vld [vmem:[%s8007_s25 + $0x8c] sm:$0x1] }
 0x1b1   : > { %v3768_v58 = vpop.f32.mrf.mxu2  ;;  %v3592_v24 = vpop.f32.mrf.mxu0  ;;  %v1481_v1 = vrot.slane %v7820_v25, 5  ;;  %v738_v25 = vld [vmem:[%s8007_s25 + $0x84] sm:$0xe] }
 0x1b2   : > { %v3857_v61 = vpop.f32.mrf.mxu3  ;;  %v3131_v53 = vmax.f32 %v3099_v35, 0.0  ;;  %v3769_v34 = vadd.f32 %v3768_v58, %v3680_v11  ;;  %v3681_v14 = vpop.f32.mrf.mxu1  ;;  %v7817_v11 = vld [vmem:[%s8007_s25 + $0x7c] sm:$0xf]  ;;  %9880 = vst [vmem:[#allocation8_spill] sm:$0xff] %v8946_v57  ;;  %v737_v35 = vld [vmem:[%s8007_s25 + $0x78] sm:$0xe] }
 0x1b3   : > { %v3682_v3 = vadd.f32 %v3681_v14, %v3592_v24  ;;  %v866_v26 = vrot.slane %v7817_v11, 5  ;;  %v7303_v58 = vld [vmem:[%s9847_s1 + $0x210] sm:$0xff]  ;;  %v6028_v24 = vrot.slane %v737_v35, 9 }
 0x1b4   : > { %v7443_v54 = vpack.c.bf16 %v3131_v53, %v3130_v23  ;;  %v3858_v38 = vadd.f32 %v3857_v61, %v3769_v34  ;;  %v7311_v61 = vld [vmem:[%s9847_s1 + $0x250] sm:$0xff]  ;;  %v1478_v23 = vrot.slane %v7818_v9, 5  ;;  %v6092_v34 = vld [vmem:[%s8007_s25 + $0x84] sm:$0xe]  ;;  %4504 = vmatpush.bf16.msra.mxu0 %v7303_v58 }
 0x1b5   : > { %4593 = vmatpush.bf16.msra.mxu1 %v7311_v61  ;;  %v868_v14 = vrot.slane %v866_v26, 4  ;;  %v6108_v42 = vrot.slane %v6092_v34, 9 }
 0x1b6   : > { %7699 = vst [vmem:[%s8430_s12 + $0x78] sm:$0xff] %v7443_v54   ;;  %v3937_v63 = vmul.f32 %v8667_v15, %v3858_v38  ;;  %v7819_v54 = vld [vmem:[%s8007_s25 + $0x80] sm:$0x1]  ;;  %v1480_v38 = vrot.slane %v1478_v23, 4 }
 0x1b7   : > { %v869_v45 = vrot.slane %v7819_v54, 5 }
 0x1b8   : > { %v3969_v30 = vadd.f32 %v8686_v37, %v3937_v63 }
 0x1b9   : > { %v3770_v4 = vpop.f32.mrf.mxu2  ;;  %v3595_v60 = vpop.f32.mrf.mxu0 }
 0x1ba   : > { %v3859_v56 = vpop.f32.mrf.mxu3  ;;  %v3771_v16 = vadd.f32 %v3770_v4, %v3682_v3  ;;  %v3684_v47 = vpop.f32.mrf.mxu1  ;;  %v867_v3 = vsel %vm8602_vm5, %v6028_v24, %v866_v26  ;;  %v4001_v4 = vmax.f32 %v3969_v30, 0.0 }
 0x1bb   : > { %v3685_v10 = vadd.f32 %v3684_v47, %v3595_v60  ;;  %v1479_v60 = vsel %vm8602_vm5, %v6108_v42, %v1478_v23  ;;  %v1482_v47 = vsel %vm8602_vm5, %v1480_v38, %v1481_v1  ;;  %v3216_v58 = vunpack.c.l.b16 %v867_v3  ;;  %v7822_v1 = vld [vmem:[%s8007_s25 + $0x94] sm:$0xf] }
 0x1bc   : > { %v3860_v53 = vadd.f32 %v3859_v56, %v3771_v16  ;;  %3634 = vmatmul.bf16.gmra.mxu0 %v8386_v5  ;;  %v870_v16 = vsel %vm8602_vm5, %v868_v14, %v869_v45  ;;  %v3280_v9 = vunpack.c.l.b16 %v1479_v60  ;;  %v6029_v3 = vrot.slane %v738_v25, 9 }
 0x1bd   : > { %3723 = vmatmul.bf16.gmra.mxu1 %v3237_v40  ;;  %v3217_v61 = vunpack.c.l.b16 %v870_v16 }
 0x1be   : > { %v3938_v12 = vmul.f32 %v8667_v15, %v3860_v53  ;;  %3812 = vmatmul.bf16.gmra.mxu2 %v8391_v13  ;;  %v3281_v53 = vunpack.c.l.b16 %v1482_v47  ;;  %v7825_v47 = vld [vmem:[%s8007_s25 + $0x98] sm:$0x1] }
 0x1bf   : > { %3901 = vmatmul.bf16.gmra.mxu3 %v8946_v57  ;;  %v3238_v14 = vpack.c.b16 %v3217_v61, %v3216_v58 }
 0x1c0   : > { %v3970_v5 = vadd.f32 %v8686_v37, %v3938_v12  ;;  %v7821_v12 = vld [vmem:[%s8007_s25 + $0x88] sm:$0xf]  ;;  %v8976_v38 = vpack.c.b16 %v3281_v53, %v3280_v9 }
 0x1c1   : > { %v3773_v49 = vpop.f32.mrf.mxu2  ;;  %v3597_v11 = vpop.f32.mrf.mxu0 }
 0x1c2   : > { %v3862_v36 = vpop.f32.mrf.mxu3  ;;  %v4002_v56 = vmax.f32 %v3970_v5, 0.0  ;;  %v3774_v40 = vadd.f32 %v3773_v49, %v3685_v10  ;;  %v3686_v63 = vpop.f32.mrf.mxu1  ;;  %v873_v10 = vrot.slane %v7821_v12, 5  ;;  %9881 = vst [vmem:[#allocation9_spill] sm:$0xff] %v8976_v38  ;;  %v1485_v5 = vrot.slane %v7822_v1, 5 }
 0x1c3   : > { %v3687_v34 = vadd.f32 %v3686_v63, %v3597_v11  ;;  %v7824_v63 = vld [vmem:[%s8007_s25 + $0x8c] sm:$0x1] }
 0x1c4   : > { %v7448_v35 = vpack.c.bf16 %v4002_v56, %v4001_v4  ;;  %v3863_v26 = vadd.f32 %v3862_v36, %v3774_v40  ;;  %v6093_v36 = vld [vmem:[%s8007_s25 + $0x90] sm:$0xe]  ;;  %v875_v4 = vrot.slane %v873_v10, 4  ;;  %v876_v16 = vrot.slane %v7824_v63, 5 }
 0x1c5   : > { %v1487_v60 = vrot.slane %v1485_v5, 4  ;;  %v874_v9 = vsel %vm8602_vm5, %v6029_v3, %v873_v10 }
 0x1c6   : > { %7700 = vst [vmem:[%s8430_s12 + $0x80] sm:$0xff] %v7448_v35   ;;  %v3939_v23 = vmul.f32 %v8667_v15, %v3863_v26  ;;  %v8986_v15 = vld [vmem:[%s9848_s2] ss:$0 sm:$0xff]  ;;  %v1488_v35 = vrot.slane %v7825_v47, 5  ;;  %v877_v12 = vsel %vm8602_vm5, %v875_v4, %v876_v16 }
 0x1c8   : > { %v3971_v56 = vadd.f32 %v8686_v37, %v3939_v23 }
 0x1c9   : > { %v3775_v24 = vpop.f32.mrf.mxu2  ;;  %v3600_v45 = vpop.f32.mrf.mxu0 }
 0x1ca   : > { %v3864_v30 = vpop.f32.mrf.mxu3  ;;  %v3776_v54 = vadd.f32 %v3775_v24, %v3687_v34  ;;  %v3689_v42 = vpop.f32.mrf.mxu1  ;;  %v4003_v53 = vmax.f32 %v3971_v56, 0.0 }
 0x1cb   : > { %v3690_v11 = vadd.f32 %v3689_v42, %v3600_v45  ;;  %v3218_v45 = vunpack.c.l.b16 %v874_v9  ;;  %v3219_v42 = vunpack.c.l.b16 %v877_v12 }
 0x1cc   : > { %v3865_v49 = vadd.f32 %v3864_v30, %v3776_v54  ;;  %3639 = vmatmul.bf16.gmra.mxu0 %v8437_v46  ;;  %v6109_v46 = vrot.slane %v6093_v36, 9  ;;  %v1489_v54 = vsel %vm8602_vm5, %v1487_v60, %v1488_v35  ;;  %v739_v35 = vld [vmem:[%s8007_s25 + $0x90] sm:$0xe] }
 0x1cd   : > { %3728 = vmatmul.bf16.gmra.mxu1 %v3238_v14  ;;  %v3283_v1 = vunpack.c.l.b16 %v1489_v54  ;;  %v3239_v56 = vpack.c.b16 %v3219_v42, %v3218_v45 }
 0x1ce   : > { %v3940_v40 = vmul.f32 %v8986_v15, %v3865_v49  ;;  %3817 = vmatmul.bf16.gmra.mxu2 %v8439_v51  ;;  %v1486_v23 = vsel %vm8602_vm5, %v6109_v46, %v1485_v5  ;;  %v7318_v49 = vld [vmem:[%s9847_s1 + $0x288] sm:$0xff] }
 0x1cf   : > { %3906 = vmatmul.bf16.gmra.mxu3 %v8976_v38  ;;  %v3282_v25 = vunpack.c.l.b16 %v1486_v23  ;;  %v7326_v5 = vld [vmem:[%s9847_s1 + $0x2c8] sm:$0xff]  ;;  %4683 = vmatpush.bf16.msra.mxu2 %v7318_v49 }
 0x1d0   : > { %v3972_v58 = vadd.f32 %v8686_v37, %v3940_v40  ;;  %4772 = vmatpush.bf16.msra.mxu3 %v7326_v5  ;;  %v7826_v40 = vld [vmem:[%s8007_s25 + $0x94] sm:$0xf] }
 0x1d1   : > { %v3778_v61 = vpop.f32.mrf.mxu2  ;;  %v3602_v30 = vpop.f32.mrf.mxu0  ;;  %v9011_v47 = vpack.c.b16 %v3283_v1, %v3282_v25 }
 0x1d2   : > { %v3867_v26 = vpop.f32.mrf.mxu3  ;;  %v4004_v34 = vmax.f32 %v3972_v58, 0.0  ;;  %v3779_v24 = vadd.f32 %v3778_v61, %v3690_v11  ;;  %v3691_v14 = vpop.f32.mrf.mxu1  ;;  %v880_v11 = vrot.slane %v7826_v40, 5  ;;  %v7302_v58 = vld [vmem:[%s9847_s1 + $0x208] sm:$0xff] }
 0x1d3   : > { %v3692_v36 = vadd.f32 %v3691_v14, %v3602_v30  ;;  %9882 = vst [vmem:[#allocation10_spill] sm:$0xff] %v9011_v47  ;;  %v7310_v61 = vld [vmem:[%s9847_s1 + $0x248] sm:$0xff]  ;;  %4505 = vmatpush.bf16.msra.mxu0 %v7302_v58  ;;  %v9026_v14 = vld [vmem:[%s9849_s3] ss:$0 sm:$0xff] }
 0x1d4   : > { %v7453_v37 = vpack.c.bf16 %v4004_v34, %v4003_v53  ;;  %v3868_v10 = vadd.f32 %v3867_v26, %v3779_v24  ;;  %v7827_v26 = vld [vmem:[%s8007_s25 + $0xa0] sm:$0xf]  ;;  %v6094_v34 = vld [vmem:[%s8007_s25 + $0x9c] sm:$0xe]  ;;  %4594 = vmatpush.bf16.msra.mxu1 %v7310_v61  ;;  %v6030_v24 = vrot.slane %v739_v35, 9  ;;  %v882_v30 = vrot.slane %v880_v11, 4 }
 0x1d5   : > { %v1492_v9 = vrot.slane %v7827_v26, 5 }
 0x1d6   : > { %7701 = vst [vmem:[%s8430_s12 + $0x88] sm:$0xff] %v7453_v37   ;;  %v3941_v63 = vmul.f32 %v8986_v15, %v3868_v10  ;;  %v7829_v37 = vld [vmem:[%s8007_s25 + $0x98] sm:$0x1]  ;;  %v7830_v10 = vld [vmem:[%s8007_s25 + $0xa4] sm:$0x1] }
 0x1d7   : > { %v883_v45 = vrot.slane %v7829_v37, 5  ;;  %v1494_v42 = vrot.slane %v1492_v9, 4  ;;  %v1495_v25 = vrot.slane %v7830_v10, 5  ;;  %v740_v10 = vld [vmem:[%s8007_s25 + $0x9c] sm:$0xe] }
 0x1d8   : > { %v3973_v12 = vadd.f32 %v9026_v14, %v3941_v63 }
 0x1d9   : > { %v3780_v3 = vpop.f32.mrf.mxu2  ;;  %v3605_v46 = vpop.f32.mrf.mxu0 }
 0x1da   : > { %v3869_v4 = vpop.f32.mrf.mxu3  ;;  %v3781_v16 = vadd.f32 %v3780_v3, %v3692_v36  ;;  %v3694_v60 = vpop.f32.mrf.mxu1  ;;  %v881_v36 = vsel %vm8602_vm5, %v6030_v24, %v880_v11  ;;  %v4005_v3 = vmax.f32 %v3973_v12, 0.0 }
 0x1db   : > { %v3695_v54 = vadd.f32 %v3694_v60, %v3605_v46  ;;  %v1496_v60 = vsel %vm8602_vm5, %v1494_v42, %v1495_v25  ;;  %v3220_v58 = vunpack.c.l.b16 %v881_v36  ;;  %v7832_v25 = vld [vmem:[%s8007_s25 + $0xac] sm:$0xf]  ;;  %v6031_v36 = vrot.slane %v740_v10, 9 }
 0x1dc   : > { %v3870_v53 = vadd.f32 %v3869_v4, %v3781_v16  ;;  %3644 = vmatmul.bf16.gmra.mxu0 %v8474_v17  ;;  %v6110_v17 = vrot.slane %v6094_v34, 9  ;;  %v884_v16 = vsel %vm8602_vm5, %v882_v30, %v883_v45 }
 0x1dd   : > { %3733 = vmatmul.bf16.gmra.mxu1 %v3239_v56  ;;  %v3221_v61 = vunpack.c.l.b16 %v884_v16  ;;  %v7833_v16 = vld [vmem:[%s8007_s25 + $0xa4] sm:$0x1] }
 0x1de   : > { %v3942_v23 = vmul.f32 %v8986_v15, %v3870_v53  ;;  %3822 = vmatmul.bf16.gmra.mxu2 %v8480_v39  ;;  %v1493_v46 = vsel %vm8602_vm5, %v6110_v17, %v1492_v9  ;;  %v3285_v53 = vunpack.c.l.b16 %v1496_v60 }
 0x1df   : > { %3911 = vmatmul.bf16.gmra.mxu3 %v9011_v47  ;;  %v3284_v26 = vunpack.c.l.b16 %v1493_v46  ;;  %v3240_v30 = vpack.c.b16 %v3221_v61, %v3220_v58  ;;  %v890_v46 = vrot.slane %v7833_v16, 5  ;;  %v7834_v58 = vld [vmem:[%s8007_s25 + $0xb0] sm:$0x1]  ;;  %v7835_v16 = vld [vmem:[%s8007_s25 + $0xac] sm:$0xf] }
 0x1e0   : > { %v3974_v1 = vadd.f32 %v9026_v14, %v3942_v23  ;;  %v7831_v23 = vld [vmem:[%s8007_s25 + $0xa0] sm:$0xf]  ;;  %v1502_v61 = vrot.slane %v7834_v58, 5 }
 0x1e1   : > { %v3783_v49 = vpop.f32.mrf.mxu2  ;;  %v3607_v40 = vpop.f32.mrf.mxu0  ;;  %v9046_v42 = vpack.c.b16 %v3285_v53, %v3284_v26 }
 0x1e2   : > { %v3872_v5 = vpop.f32.mrf.mxu3  ;;  %v4006_v4 = vmax.f32 %v3974_v1, 0.0  ;;  %v3784_v56 = vadd.f32 %v3783_v49, %v3695_v54  ;;  %v3696_v63 = vpop.f32.mrf.mxu1  ;;  %v887_v54 = vrot.slane %v7831_v23, 5  ;;  %v1499_v1 = vrot.slane %v7832_v25, 5 }
 0x1e3   : > { %v3697_v34 = vadd.f32 %v3696_v63, %v3607_v40  ;;  %9883 = vst [vmem:[#allocation11_spill] sm:$0xff] %v9046_v42  ;;  %v9884_v63 = vld [vmem:[#allocation4_spill] sm:$0xff] }
 0x1e4   : > { %v7458_v35 = vpack.c.bf16 %v4006_v4, %v4005_v3  ;;  %v3873_v11 = vadd.f32 %v3872_v5, %v3784_v56  ;;  %v6095_v5 = vld [vmem:[%s8007_s25 + $0xa8] sm:$0xe]  ;;  %v889_v3 = vrot.slane %v887_v54, 4  ;;  %v888_v53 = vsel %vm8602_vm5, %v6031_v36, %v887_v54  ;;  %v7317_v36 = vld [vmem:[%s9847_s1 + $0x280] sm:$0xff] }
 0x1e5   : > { %v6111_v60 = vrot.slane %v6095_v5, 9  ;;  %v3222_v10 = vunpack.c.l.b16 %v888_v53  ;;  %4684 = vmatpush.bf16.msra.mxu2 %v7317_v36  ;;  %v7309_v53 = vld [vmem:[%s9847_s1 + $0x240] sm:$0xff] }
 0x1e6   : > { %7702 = vst [vmem:[%s8430_s12 + $0x90] sm:$0xff] %v7458_v35   ;;  %v3943_v9 = vmul.f32 %v8986_v15, %v3873_v11  ;;  %v1501_v35 = vrot.slane %v1499_v1, 4  ;;  %4595 = vmatpush.bf16.msra.mxu1 %v7309_v53 }
 0x1e8   : > { %v3975_v4 = vadd.f32 %v9026_v14, %v3943_v9  ;;  %v891_v9 = vsel %vm8602_vm5, %v889_v3, %v890_v46  ;;  %v894_v46 = vrot.slane %v7835_v16, 5 }
 0x1e9   : > { %v3785_v24 = vpop.f32.mrf.mxu2  ;;  %v3610_v45 = vpop.f32.mrf.mxu0  ;;  %v3223_v25 = vunpack.c.l.b16 %v891_v9 }
 0x1ea   : > { %v3874_v12 = vpop.f32.mrf.mxu3  ;;  %v3786_v37 = vadd.f32 %v3785_v24, %v3697_v34  ;;  %v3699_v17 = vpop.f32.mrf.mxu1  ;;  %v4007_v34 = vmax.f32 %v3975_v4, 0.0 }
 0x1eb   : > { %v3700_v40 = vadd.f32 %v3699_v17, %v3610_v45  ;;  %v1503_v45 = vsel %vm8602_vm5, %v1501_v35, %v1502_v61 }
 0x1ec   : > { %v3875_v49 = vadd.f32 %v3874_v12, %v3786_v37  ;;  %3649 = vmatmul.bf16.gmra.mxu0 %v8517_v22  ;;  %v1500_v37 = vsel %vm8602_vm5, %v6111_v60, %v1499_v1  ;;  %v3287_v5 = vunpack.c.l.b16 %v1503_v45  ;;  %v7325_v1 = vld [vmem:[%s9847_s1 + $0x2c0] sm:$0xff] }
 0x1ed   : > { %3738 = vmatmul.bf16.gmra.mxu1 %v3240_v30  ;;  %4773 = vmatpush.bf16.msra.mxu3 %v7325_v1  ;;  %v7838_v1 = vld [vmem:[%s8007_s25 + $0xbc] sm:$0x1] }
 0x1ee   : > { %v3944_v56 = vmul.f32 %v8986_v15, %v3875_v49  ;;  %3827 = vmatmul.bf16.gmra.mxu2 %v9884_v63  ;;  %v3286_v49 = vunpack.c.l.b16 %v1500_v37  ;;  %v896_v37 = vrot.slane %v894_v46, 4 }
 0x1ef   : > { %3916 = vmatmul.bf16.gmra.mxu3 %v9046_v42 }
 0x1f0   : > { %v3976_v22 = vadd.f32 %v9026_v14, %v3944_v56 }
 0x1f1   : > { %v3788_v11 = vpop.f32.mrf.mxu2  ;;  %v3612_v30 = vpop.f32.mrf.mxu0 }
 0x1f2   : > { %v3877_v26 = vpop.f32.mrf.mxu3  ;;  %v4008_v24 = vmax.f32 %v3976_v22, 0.0  ;;  %v3789_v12 = vadd.f32 %v3788_v11, %v3700_v40  ;;  %v3701_v23 = vpop.f32.mrf.mxu1  ;;  %v3241_v40 = vpack.c.b16 %v3223_v25, %v3222_v10  ;;  %v9076_v22 = vpack.c.b16 %v3287_v5, %v3286_v49  ;;  %v741_v11 = vld [vmem:[%s8007_s25 + $0xa8] sm:$0xe]  ;;  %v9887_v25 = vld [vmem:[#allocation6_spill] sm:$0xff] }
 0x1f3   : > { %v3702_v3 = vadd.f32 %v3701_v23, %v3612_v30  ;;  %v6096_v30 = vld [vmem:[%s8007_s25 + $0xb4] sm:$0xe]  ;;  %v9886_v23 = vld [vmem:[#allocation5_spill] sm:$0xff]  ;;  %v6032_v9 = vrot.slane %v741_v11, 9 }
 0x1f4   : > { %v7463_v17 = vpack.c.bf16 %v4008_v24, %v4007_v34  ;;  %v3878_v54 = vadd.f32 %v3877_v26, %v3789_v12  ;;  %9885 = vst [vmem:[#allocation4_spill] sm:$0xff] %v9076_v22  ;;  %v7301_v26 = vld [vmem:[%s9847_s1 + $0x200] sm:$0xff]  ;;  %v7836_v34 = vld [vmem:[%s8007_s25 + $0xb8] sm:$0xf]  ;;  %v6112_v5 = vrot.slane %v6096_v30, 9 }
 0x1f5   : > { %v1506_v24 = vrot.slane %v7836_v34, 5  ;;  %4506 = vmatpush.bf16.msra.mxu0 %v7301_v26  ;;  %v895_v16 = vsel %vm8602_vm5, %v6032_v9, %v894_v46 }
 0x1f6   : > { %7703 = vst [vmem:[%s8430_s12 + $0x98] sm:$0xff] %v7463_v17   ;;  %v3945_v60 = vmul.f32 %v8986_v15, %v3878_v54  ;;  %v7837_v54 = vld [vmem:[%s8007_s25 + $0xb0] sm:$0x1]  ;;  %v3224_v30 = vunpack.c.l.b16 %v895_v16 }
 0x1f7   : > { %v897_v49 = vrot.slane %v7837_v54, 5  ;;  %v1508_v36 = vrot.slane %v1506_v24, 4  ;;  %v1507_v53 = vsel %vm8602_vm5, %v6112_v5, %v1506_v24 }
 0x1f8   : > { %v3977_v45 = vadd.f32 %v9026_v14, %v3945_v60  ;;  %v3288_v9 = vunpack.c.l.b16 %v1507_v53 }
 0x1f9   : > { %v3790_v4 = vpop.f32.mrf.mxu2  ;;  %v3615_v58 = vpop.f32.mrf.mxu0  ;;  %v898_v26 = vsel %vm8602_vm5, %v896_v37, %v897_v49  ;;  %v742_v37 = vld [vmem:[%s8007_s25 + $0xb4] sm:$0xe]  ;;  %v7839_v49 = vld [vmem:[%s8007_s25 + $0xb8] sm:$0xf] }
 0x1fa   : > { %v3879_v56 = vpop.f32.mrf.mxu3  ;;  %v3791_v35 = vadd.f32 %v3790_v4, %v3702_v3  ;;  %v3704_v61 = vpop.f32.mrf.mxu1  ;;  %v1509_v3 = vrot.slane %v7838_v1, 5  ;;  %v4009_v60 = vmax.f32 %v3977_v45, 0.0  ;;  %v901_v24 = vrot.slane %v7839_v49, 5 }
 0x1fb   : > { %v3705_v10 = vadd.f32 %v3704_v61, %v3615_v58 }
 0x1fc   : > { %v3880_v12 = vadd.f32 %v3879_v56, %v3791_v35  ;;  %3654 = vmatmul.bf16.gmra.mxu0 %v9886_v23  ;;  %v1510_v34 = vsel %vm8602_vm5, %v1508_v36, %v1509_v3  ;;  %v3225_v23 = vunpack.c.l.b16 %v898_v26 }
 0x1fd   : > { %3743 = vmatmul.bf16.gmra.mxu1 %v3241_v40  ;;  %v3289_v45 = vunpack.c.l.b16 %v1510_v34 }
 0x1fe   : > { %v3946_v17 = vmul.f32 %v8986_v15, %v3880_v12  ;;  %3832 = vmatmul.bf16.gmra.mxu2 %v9887_v25  ;;  %v3242_v1 = vpack.c.b16 %v3225_v23, %v3224_v30  ;;  %v6114_v30 = vld [vmem:[%s8007_s25 + $0x18] sm:$0xf]  ;;  %v6115_v23 = vld [vmem:[%s8007_s25 + $0x1c] sm:$0xf] }
 0x1ff   : > { %3921 = vmatmul.bf16.gmra.mxu3 %v9076_v22  ;;  %v1571_v49 = vshrl.u32 %v6114_v30, 16 }
 0x200   : > { %v3978_v4 = vadd.f32 %v9026_v14, %v3946_v17 }
 0x201   : > { %v3793_v56 = vpop.f32.mrf.mxu2  ;;  %v3617_v61 = vpop.f32.mrf.mxu0 }
 0x202   : > { %v3882_v40 = vpop.f32.mrf.mxu3  ;;  %v4010_v35 = vmax.f32 %v3978_v4, 0.0  ;;  %v3794_v58 = vadd.f32 %v3793_v56, %v3705_v10  ;;  %v3706_v11 = vpop.f32.mrf.mxu1  ;;  %v9107_v56 = vpack.c.b16 %v3289_v45, %v3288_v9  ;;  %v7842_v45 = vld [vmem:[%s8007_s25 + $0xc8] sm:$0x1] }
 0x203   : > { %v3707_v17 = vadd.f32 %v3706_v11, %v3617_v61  ;;  %v903_v61 = vrot.slane %v901_v24, 4  ;;  %v7841_v11 = vld [vmem:[%s8007_s25 + $0xbc] sm:$0x1] }
 0x204   : > { %v7468_v12 = vpack.c.bf16 %v4010_v35, %v4009_v60  ;;  %v3883_v46 = vadd.f32 %v3882_v40, %v3794_v58  ;;  %9888 = vst [vmem:[#allocation5_spill] sm:$0xff] %v9107_v56  ;;  %v7840_v40 = vld [vmem:[%s8007_s25 + $0xc4] sm:$0xf]  ;;  %v6033_v35 = vrot.slane %v742_v37, 9  ;;  %v6097_v58 = vld [vmem:[%s8007_s25 + $0xc0] sm:$0xe] }
 0x205   : > { %v1513_v16 = vrot.slane %v7840_v40, 5  ;;  %v904_v26 = vrot.slane %v7841_v11, 5  ;;  %v1584_v11 = vshrl.u32 %v6115_v23, 16 }
 0x206   : > { %7704 = vst [vmem:[%s8430_s12 + $0xa0] sm:$0xff] %v7468_v12   ;;  %v3947_v5 = vmul.f32 %v8986_v15, %v3883_v46  ;;  %v6113_v46 = vrot.slane %v6097_v58, 9 }
 0x207   : > { %v1515_v9 = vrot.slane %v1513_v16, 4  ;;  %v905_v37 = vsel %vm8602_vm5, %v903_v61, %v904_v26  ;;  %v1573_v26 = vrot.slane %v1571_v49, 4  ;;  %v1586_v22 = vrot.slane %v1584_v11, 4  ;;  %v7340_v11 = vld [vmem:[%s9847_s1 + $0x338] sm:$0xff] }
 0x208   : > { %v3979_v53 = vadd.f32 %v9026_v14, %v3947_v5  ;;  %v1574_v5 = vshll.u32 %v6114_v30, 16  ;;  %v3227_v61 = vunpack.c.l.b16 %v905_v37  ;;  %5337 = vmatpush.bf16.msrb.mxu0 %v7340_v11 }
 0x209   : > { %v3795_v10 = vpop.f32.mrf.mxu2  ;;  %v3620_v3 = vpop.f32.mrf.mxu0 }
 0x20a   : > { %v3884_v54 = vpop.f32.mrf.mxu3  ;;  %v3796_v36 = vadd.f32 %v3795_v10, %v3707_v17  ;;  %v3709_v4 = vpop.f32.mrf.mxu1  ;;  %v1516_v17 = vrot.slane %v7842_v45, 5  ;;  %v902_v10 = vsel %vm8602_vm5, %v6033_v35, %v901_v24  ;;  %v1576_v30 = vrot.slane %v1574_v5, 5 }
 0x20b   : > { %v3710_v12 = vadd.f32 %v3709_v4, %v3620_v3  ;;  %v4011_v3 = vmax.f32 %v3979_v53, 0.0  ;;  %v3226_v45 = vunpack.c.l.b16 %v902_v10 }
 0x20c   : > { %v3885_v60 = vadd.f32 %v3884_v54, %v3796_v36  ;;  %3659 = vmatmul.bf16.gmra.mxu0 %v8597_v32  ;;  %v1580_v36 = vshll.u32 %v6115_v23, 16  ;;  %v1517_v24 = vsel %vm8602_vm5, %v1515_v9, %v1516_v17  ;;  %v7356_v23 = vld [vmem:[%s9847_s1 + $0x3b8] sm:$0xff]  ;;  %v1577_v37 = vor.u32 %v1576_v30, %v1573_v26  ;;  %v6116_v30 = vld [vmem:[%s8007_s25 + $0x24] sm:$0xf] }
 0x20d   : > { %3748 = vmatmul.bf16.gmra.mxu1 %v3242_v1  ;;  %5515 = vmatpush.bf16.msrb.mxu2 %v7356_v23  ;;  %v3243_v10 = vpack.c.b16 %v3227_v61, %v3226_v45 }
 0x20e   : > { %v3948_v34 = vmul.f32 %v8986_v15, %v3885_v60  ;;  %3837 = vmatmul.bf16.gmra.mxu2 %v8599_v19 }
 0x20f   : > { %3926 = vmatmul.bf16.gmra.mxu3 %v9107_v56  ;;  %v1582_v56 = vrot.slane %v1580_v36, 5 }
 0x210   : > { %v3980_v32 = vadd.f32 %v9026_v14, %v3948_v34  ;;  %v1514_v34 = vsel %vm8602_vm5, %v6113_v46, %v1513_v16  ;;  %v7364_v16 = vld [vmem:[%s9847_s1 + $0x3f8] sm:$0xff] }
 0x211   : > { %v3798_v54 = vpop.f32.mrf.mxu2  ;;  %v3622_v60 = vpop.f32.mrf.mxu0  ;;  %5604 = vmatpush.bf16.msrb.mxu3 %v7364_v16 }
 0x212   : > { %v3887_v1 = vpop.f32.mrf.mxu3  ;;  %v4012_v4 = vmax.f32 %v3980_v32, 0.0  ;;  %v3799_v40 = vadd.f32 %v3798_v54, %v3710_v12  ;;  %v3711_v58 = vpop.f32.mrf.mxu1  ;;  %v3290_v32 = vunpack.c.l.b16 %v1514_v34  ;;  %v3291_v12 = vunpack.c.l.b16 %v1517_v24  ;;  %v6146_v54 = vld [vmem:[%s8007_s25 + $0x20] sm:$0x1] }
 0x213   : > { %v3712_v46 = vadd.f32 %v3711_v58, %v3622_v60  ;;  %v7348_v60 = vld [vmem:[%s9847_s1 + $0x378] sm:$0xff]  ;;  %v1578_v34 = vrot.slane %v1577_v37, 4  ;;  %v1598_v37 = vshll.u32 %v6116_v30, 16 }
 0x214   : > { %v7473_v35 = vpack.c.bf16 %v4012_v4, %v4011_v3  ;;  %v3888_v53 = vadd.f32 %v3887_v1, %v3799_v40  ;;  %v1590_v1 = vshll.u32 %v6146_v54, 16  ;;  %v9138_v4 = vpack.c.b16 %v3291_v12, %v3290_v32  ;;  %5426 = vmatpush.bf16.msrb.mxu1 %v7348_v60 }
 0x215   : > { %v1587_v40 = vor.u32 %v1586_v22, %v1582_v56  ;;  %v1583_v12 = vsel %vm8048_vm2, %v1578_v34, %v1582_v56  ;;  %v1600_v11 = vrot.slane %v1598_v37, 5  ;;  %v6119_v37 = vld [vmem:[%s8007_s25 + $0x34] sm:$0xf] }
 0x216   : > { %7705 = vst [vmem:[%s8430_s12 + $0xa8] sm:$0xff] %v7473_v35   ;;  %v3949_v49 = vmul.f32 %v8986_v15, %v3888_v53  ;;  %v1592_v24 = vrot.slane %v1590_v1, 5  ;;  %v6117_v53 = vld [vmem:[%s8007_s25 + $0x28] sm:$0xf] }
 0x217   : > { %9889 = vst [vmem:[#allocation6_spill] sm:$0xff] %v9138_v4  ;;  %v1588_v61 = vrot.slane %v1587_v40, 4  ;;  %v1604_v1 = vshll.u32 %v6117_v53, 16 }
 0x218   : > { %v3981_v22 = vadd.f32 %v9026_v14, %v3949_v49  ;;  %v1608_v49 = vshrl.u32 %v6117_v53, 16  ;;  %v7221_v53 = vld [vmem:[%s8007_s25 + $0x18] sm:$0xff] }
 0x219   : > { %v3800_v9 = vpop.f32.mrf.mxu2  ;;  %v3625_v36 = vpop.f32.mrf.mxu0  ;;  %v1606_v60 = vrot.slane %v1604_v1, 5 }
 0x21a   : > { %v3889_v17 = vpop.f32.mrf.mxu3  ;;  %v3801_v5 = vadd.f32 %v3800_v9, %v3712_v46  ;;  %v3714_v3 = vpop.f32.mrf.mxu1  ;;  %v4013_v54 = vmax.f32 %v3981_v22, 0.0  ;;  %v6147_v22 = vld [vmem:[%s8007_s25 + $0x2c] sm:$0x1] }
 0x21b   : > { %v3715_v45 = vadd.f32 %v3714_v3, %v3625_v36  ;;  %v4178_v3 = vunpack.c.l.b16 %v1583_v12 }
 0x21c   : > { %v3890_v58 = vadd.f32 %v3889_v17, %v3801_v5  ;;  %3664 = vmatmul.bf16.gmra.mxu0 %v8638_v59  ;;  %v1593_v17 = vsel %vm8048_vm2, %v1588_v61, %v1592_v24 }
 0x21d   : > { %3753 = vmatmul.bf16.gmra.mxu1 %v3243_v10  ;;  %v1595_v10 = vshrl.u32 %v6116_v30, 16  ;;  %v4179_v40 = vunpack.c.l.b16 %v1593_v17 }
 0x21e   : > { %v3950_v35 = vmul.f32 %v8986_v15, %v3890_v58  ;;  %3842 = vmatmul.bf16.gmra.mxu2 %v8642_v20  ;;  %v1610_v58 = vrot.slane %v1608_v49, 4 }
 0x21f   : > { %3931 = vmatmul.bf16.gmra.mxu3 %v9138_v4  ;;  %v1597_v56 = vrot.slane %v1595_v10, 4  ;;  %v6118_v10 = vld [vmem:[%s8007_s25 + $0x30] sm:$0xf] }
 0x220   : > { %v3982_v26 = vadd.f32 %v9026_v14, %v3950_v35  ;;  %v1611_v12 = vor.u32 %v1610_v58, %v1606_v60  ;;  %v1628_v58 = vshll.u32 %v6119_v37, 16 }
 0x221   : > { %v3803_v32 = vpop.f32.mrf.mxu2  ;;  %v3627_v46 = vpop.f32.mrf.mxu0 }
 0x222   : > { %v3892_v59 = vpop.f32.mrf.mxu3  ;;  %v4014_v23 = vmax.f32 %v3982_v26, 0.0  ;;  %v3804_v16 = vadd.f32 %v3803_v32, %v3715_v45  ;;  %v3716_v9 = vpop.f32.mrf.mxu1  ;;  %v9162_v32 = vpack.c.b16 %v4179_v40, %v4178_v3  ;;  %v1612_v49 = vrot.slane %v1611_v12, 4 }
 0x223   : > { %v3717_v34 = vadd.f32 %v3716_v9, %v3627_v46 }
 0x224   : > { %v7478_v5 = vpack.c.bf16 %v4014_v23, %v4013_v54  ;;  %v3893_v36 = vadd.f32 %v3892_v59, %v3804_v16  ;;  %v1601_v59 = vor.u32 %v1600_v11, %v1597_v56  ;;  %v1614_v54 = vshll.u32 %v6147_v22, 16  ;;  %v7843_v16 = vld [vmem:[%s8007_s25 + $0xc] sm:$0xff] }
 0x225   : > { %v1619_v56 = vshrl.u32 %v6118_v10, 16  ;;  %v1622_v11 = vshll.u32 %v6118_v10, 16  ;;  %v7355_v10 = vld [vmem:[%s9847_s1 + $0x3b0] sm:$0xff] }
 0x226   : > { %7706 = vst [vmem:[%s8430_s12 + $0xb0] sm:$0xff] %v7478_v5   ;;  %v3951_v24 = vmul.f32 %v8986_v15, %v3893_v36  ;;  %v1602_v1 = vrot.slane %v1601_v59, 4  ;;  %v1616_v5 = vrot.slane %v1614_v54, 5  ;;  %v1630_v54 = vrot.slane %v1628_v58, 5  ;;  %5516 = vmatpush.bf16.msrb.mxu2 %v7355_v10  ;;  %v7222_v58 = vld [vmem:[%s8007_s25 + $0x24] sm:$0xff] }
 0x227   : > { %v1621_v59 = vrot.slane %v1619_v56, 4  ;;  %v1624_v12 = vrot.slane %v1622_v11, 5 }
 0x228   : > { %v3983_v46 = vadd.f32 %v9026_v14, %v3951_v24 }
 0x229   : > { %v3805_v35 = vpop.f32.mrf.mxu2  ;;  %v3630_v26 = vpop.f32.mrf.mxu0 }
 0x22a   : > { %v3894_v45 = vpop.f32.mrf.mxu3  ;;  %v3806_v61 = vadd.f32 %v3805_v35, %v3717_v34  ;;  %v3719_v30 = vpop.f32.mrf.mxu1  ;;  %v4015_v34 = vmax.f32 %v3983_v46, 0.0 }
 0x22b   : > { %v3720_v17 = vadd.f32 %v3719_v30, %v3630_v26  ;;  %v1607_v26 = vsel %vm8048_vm2, %v1602_v1, %v1606_v60  ;;  %v1617_v30 = vsel %vm8048_vm2, %v1612_v49, %v1616_v5  ;;  %v7363_v60 = vld [vmem:[%s9847_s1 + $0x3f0] sm:$0xff]  ;;  %v1625_v5 = vor.u32 %v1624_v12, %v1621_v59 }
 0x22c   : > { %v3895_v23 = vadd.f32 %v3894_v45, %v3806_v61  ;;  %4507 = vmatmul.bf16.vlgmr.msra.gmra.mxu0 %v7843_v16  ;;  %v1632_v61 = vshrl.u32 %v6119_v37, 16  ;;  %v4180_v16 = vunpack.c.l.b16 %v1607_v26  ;;  %v4181_v46 = vunpack.c.l.b16 %v1617_v30  ;;  %5605 = vmatpush.bf16.msrb.mxu3 %v7363_v60 }
 0x22d   : > { %4596 = vmatmul.bf16.vlgmr.msra.gmra.mxu1 %v8108_v41  ;;  %v1626_v26 = vrot.slane %v1625_v5, 4 }
 0x22e   : > { %v3952_v9 = vmul.f32 %v8986_v15, %v3895_v23  ;;  %4685 = vmatmul.bf16.vlgmr.msra.gmra.mxu2 %v7221_v53 }
 0x22f   : > { %4774 = vmatmul.bf16.vlgmr.msra.gmra.mxu3 %v9162_v32  ;;  %v1631_v60 = vsel %vm8048_vm2, %v1626_v26, %v1630_v54 }
 0x230   : > { %v3984_v36 = vadd.f32 %v9026_v14, %v3952_v9  ;;  %v6148_v9 = vld [vmem:[%s8007_s25 + $0x38] sm:$0x1] }
 0x231   : > { %v3808_v3 = vpop.f32.mrf.mxu2  ;;  %v3632_v45 = vpop.f32.mrf.mxu0 }
 0x232   : > { %v3897_v40 = vpop.f32.mrf.mxu3  ;;  %v4016_v22 = vmax.f32 %v3984_v36, 0.0  ;;  %v3809_v35 = vadd.f32 %v3808_v3, %v3720_v17  ;;  %v3721_v24 = vpop.f32.mrf.mxu1  ;;  %v1634_v17 = vrot.slane %v1632_v61, 4  ;;  %v1638_v36 = vshll.u32 %v6148_v9, 16  ;;  %v7844_v61 = vld [vmem:[%s8007_s25 + $0x18] sm:$0xff]  ;;  %v6121_v9 = vld [vmem:[%s8007_s25 + $0x40] sm:$0xf] }
 0x233   : > { %v3722_v37 = vadd.f32 %v3721_v24, %v3632_v45  ;;  %v7347_v45 = vld [vmem:[%s9847_s1 + $0x370] sm:$0xff] }
 0x234   : > { %v7483_v53 = vpack.c.bf16 %v4016_v22, %v4015_v34  ;;  %v3898_v23 = vadd.f32 %v3897_v40, %v3809_v35  ;;  %v9186_v34 = vpack.c.b16 %v4181_v46, %v4180_v16  ;;  %v1635_v22 = vor.u32 %v1634_v17, %v1630_v54  ;;  %v7339_v35 = vld [vmem:[%s9847_s1 + $0x330] sm:$0xff]  ;;  %5427 = vmatpush.bf16.msrb.mxu1 %v7347_v45  ;;  %v6120_v46 = vld [vmem:[%s8007_s25 + $0x3c] sm:$0xf] }
 0x235   : > { %5338 = vmatpush.bf16.msrb.mxu0 %v7339_v35  ;;  %v1640_v30 = vrot.slane %v1638_v36, 5  ;;  %v4182_v45 = vunpack.c.l.b16 %v1631_v60 }
 0x236   : > { %7707 = vst [vmem:[%s8430_s12 + $0xb8] sm:$0xff] %v7483_v53   ;;  %v3953_v3 = vmul.f32 %v8986_v15, %v3898_v23  ;;  %v1636_v23 = vrot.slane %v1635_v22, 4 }
 0x238   : > { %v3985_v53 = vadd.f32 %v9026_v14, %v3953_v3  ;;  %v1641_v3 = vsel %vm8048_vm2, %v1636_v23, %v1640_v30 }
 0x239   : > { %v3810_v1 = vpop.f32.mrf.mxu2  ;;  %v3635_v56 = vpop.f32.mrf.mxu0 }
 0x23a   : > { %v3899_v49 = vpop.f32.mrf.mxu3  ;;  %v3811_v40 = vadd.f32 %v3810_v1, %v3722_v37  ;;  %v3724_v11 = vpop.f32.mrf.mxu1  ;;  %v4017_v37 = vmax.f32 %v3985_v53, 0.0 }
 0x23b   : > { %v3725_v12 = vadd.f32 %v3724_v11, %v3635_v56  ;;  %v1646_v56 = vshll.u32 %v6120_v46, 16  ;;  %v1652_v11 = vshll.u32 %v6121_v9, 16 }
 0x23c   : > { %v3900_v24 = vadd.f32 %v3899_v49, %v3811_v40  ;;  %4512 = vmatmul.bf16.gmra.mxu0 %v7844_v61  ;;  %v1643_v40 = vshrl.u32 %v6120_v46, 16 }
 0x23d   : > { %4601 = vmatmul.bf16.gmra.mxu1 %v8149_v29  ;;  %v1648_v61 = vrot.slane %v1646_v56, 5  ;;  %v1654_v26 = vrot.slane %v1652_v11, 5  ;;  %v6122_v11 = vld [vmem:[%s8007_s25 + $0x48] sm:$0xf] }
 0x23e   : > { %v3954_v59 = vmul.f32 %v8986_v15, %v3900_v24  ;;  %4690 = vmatmul.bf16.gmra.mxu2 %v7222_v58  ;;  %v1656_v58 = vshrl.u32 %v6121_v9, 16  ;;  %v4183_v24 = vunpack.c.l.b16 %v1641_v3  ;;  %v1645_v54 = vrot.slane %v1643_v40, 4  ;;  %v7845_v40 = vld [vmem:[%s8007_s25 + $0x24] sm:$0xff] }
 0x23f   : > { %4779 = vmatmul.bf16.gmra.mxu3 %v9186_v34 }
 0x240   : > { %v3986_v16 = vadd.f32 %v9026_v14, %v3954_v59  ;;  %v1658_v53 = vrot.slane %v1656_v58, 4  ;;  %v1649_v60 = vor.u32 %v1648_v61, %v1645_v54  ;;  %v6123_v58 = vld [vmem:[%s8007_s25 + $0x4c] sm:$0xf] }
 0x241   : > { %v3813_v17 = vpop.f32.mrf.mxu2  ;;  %v3637_v5 = vpop.f32.mrf.mxu0 }
 0x242   : > { %v3902_v10 = vpop.f32.mrf.mxu3  ;;  %v4018_v1 = vmax.f32 %v3986_v16, 0.0  ;;  %v3814_v49 = vadd.f32 %v3813_v17, %v3725_v12  ;;  %v3726_v36 = vpop.f32.mrf.mxu1  ;;  %v6149_v12 = vld [vmem:[%s8007_s25 + $0x44] sm:$0x1] }
 0x243   : > { %v3727_v59 = vadd.f32 %v3726_v36, %v3637_v5 }
 0x244   : > { %v7488_v22 = vpack.c.bf16 %v4018_v1, %v4017_v37  ;;  %v3903_v35 = vadd.f32 %v3902_v10, %v3814_v49  ;;  %v7223_v37 = vld [vmem:[%s8007_s25 + $0x30] sm:$0xff]  ;;  %v9210_v10 = vpack.c.b16 %v4183_v24, %v4182_v45  ;;  %v1659_v1 = vor.u32 %v1658_v53, %v1654_v26 }
 0x245   : > { %v1662_v49 = vshll.u32 %v6149_v12, 16  ;;  %v1667_v53 = vshrl.u32 %v6122_v11, 16  ;;  %v1676_v12 = vshll.u32 %v6123_v58, 16 }
 0x246   : > { %7708 = vst [vmem:[%s8430_s12 + $0xc0] sm:$0xff] %v7488_v22   ;;  %v3955_v30 = vmul.f32 %v8986_v15, %v3903_v35  ;;  %v1650_v22 = vrot.slane %v1649_v60, 4  ;;  %v1660_v35 = vrot.slane %v1659_v1, 4 }
 0x247   : > { %v1664_v45 = vrot.slane %v1662_v49, 5  ;;  %v1669_v49 = vrot.slane %v1667_v53, 4 }
 0x248   : > { %v3987_v5 = vadd.f32 %v9026_v14, %v3955_v30 }
 0x249   : > { %v3815_v16 = vpop.f32.mrf.mxu2  ;;  %v3640_v46 = vpop.f32.mrf.mxu0  ;;  %v1665_v60 = vsel %vm8048_vm2, %v1660_v35, %v1664_v45 }
 0x24a   : > { %v3904_v17 = vpop.f32.mrf.mxu3  ;;  %v3816_v23 = vadd.f32 %v3815_v16, %v3727_v59  ;;  %v3729_v9 = vpop.f32.mrf.mxu1  ;;  %v1670_v59 = vshll.u32 %v6122_v11, 16  ;;  %v4019_v16 = vmax.f32 %v3987_v5, 0.0  ;;  %v4185_v5 = vunpack.c.l.b16 %v1665_v60  ;;  %v7846_v60 = vld [vmem:[%s8007_s25 + $0x30] sm:$0xff] }
 0x24b   : > { %v3730_v56 = vadd.f32 %v3729_v9, %v3640_v46  ;;  %v1680_v9 = vshrl.u32 %v6123_v58, 16  ;;  %v7354_v58 = vld [vmem:[%s9847_s1 + $0x3a8] sm:$0xff] }
 0x24c   : > { %v3905_v3 = vadd.f32 %v3904_v17, %v3816_v23  ;;  %4517 = vmatmul.bf16.gmra.mxu0 %v7845_v40  ;;  %v1678_v40 = vrot.slane %v1676_v12, 5  ;;  %5517 = vmatpush.bf16.msrb.mxu2 %v7354_v58  ;;  %v6125_v58 = vld [vmem:[%s8007_s25 + $0x58] sm:$0xf] }
 0x24d   : > { %4606 = vmatmul.bf16.gmra.mxu1 %v8171_v18 }
 0x24e   : > { %v3956_v36 = vmul.f32 %v8986_v15, %v3905_v3  ;;  %4695 = vmatmul.bf16.gmra.mxu2 %v7223_v37  ;;  %v1655_v37 = vsel %vm8048_vm2, %v1650_v22, %v1654_v26  ;;  %v1672_v3 = vrot.slane %v1670_v59, 5  ;;  %v7362_v26 = vld [vmem:[%s9847_s1 + $0x3e8] sm:$0xff] }
 0x24f   : > { %4784 = vmatmul.bf16.gmra.mxu3 %v9210_v10  ;;  %v4184_v11 = vunpack.c.l.b16 %v1655_v37 }
 0x250   : > { %v3988_v24 = vadd.f32 %v9026_v14, %v3956_v36  ;;  %5606 = vmatpush.bf16.msrb.mxu3 %v7362_v26 }
 0x251   : > { %v3818_v54 = vpop.f32.mrf.mxu2  ;;  %v3642_v23 = vpop.f32.mrf.mxu0 }
 0x252   : > { %v3907_v61 = vpop.f32.mrf.mxu3  ;;  %v4020_v17 = vmax.f32 %v3988_v24, 0.0  ;;  %v3819_v30 = vadd.f32 %v3818_v54, %v3730_v56  ;;  %v3731_v46 = vpop.f32.mrf.mxu1  ;;  %v6150_v24 = vld [vmem:[%s8007_s25 + $0x50] sm:$0x1]  ;;  %v1682_v56 = vrot.slane %v1680_v9, 4  ;;  %v1673_v54 = vor.u32 %v1672_v3, %v1669_v49 }
 0x253   : > { %v3732_v22 = vadd.f32 %v3731_v46, %v3642_v23  ;;  %v7338_v23 = vld [vmem:[%s9847_s1 + $0x328] sm:$0xff] }
 0x254   : > { %v7493_v1 = vpack.c.bf16 %v4020_v17, %v4019_v16  ;;  %v3908_v36 = vadd.f32 %v3907_v61, %v3819_v30  ;;  %v1686_v61 = vshll.u32 %v6150_v24, 16  ;;  %v7224_v17 = vld [vmem:[%s8007_s25 + $0x3c] sm:$0xff]  ;;  %v9234_v30 = vpack.c.b16 %v4185_v5, %v4184_v11  ;;  %v7346_v46 = vld [vmem:[%s9847_s1 + $0x368] sm:$0xff]  ;;  %5339 = vmatpush.bf16.msrb.mxu0 %v7338_v23 }
 0x255   : > { %v1683_v9 = vor.u32 %v1682_v56, %v1678_v40  ;;  %5428 = vmatpush.bf16.msrb.mxu1 %v7346_v46  ;;  %v6124_v56 = vld [vmem:[%s8007_s25 + $0x54] sm:$0xf]  ;;  %v1704_v23 = vshrl.u32 %v6125_v58, 16 }
 0x256   : > { %7709 = vst [vmem:[%s8430_s12 + $0xc8] sm:$0xff] %v7493_v1   ;;  %v3957_v53 = vmul.f32 %v8986_v15, %v3908_v36  ;;  %v1674_v1 = vrot.slane %v1673_v54, 4  ;;  %v1688_v49 = vrot.slane %v1686_v61, 5 }
 0x257   : > { %v1684_v5 = vrot.slane %v1683_v9, 4  ;;  %v1700_v9 = vshll.u32 %v6125_v58, 16 }
 0x258   : > { %v3989_v3 = vadd.f32 %v9026_v14, %v3957_v53 }
 0x259   : > { %v3820_v35 = vpop.f32.mrf.mxu2  ;;  %v3645_v12 = vpop.f32.mrf.mxu0 }
 0x25a   : > { %v3909_v45 = vpop.f32.mrf.mxu3  ;;  %v3821_v59 = vadd.f32 %v3820_v35, %v3732_v22  ;;  %v3734_v16 = vpop.f32.mrf.mxu1  ;;  %v1679_v35 = vsel %vm8048_vm2, %v1674_v1, %v1678_v40 }
 0x25b   : > { %v3735_v11 = vadd.f32 %v3734_v16, %v3645_v12  ;;  %v1689_v12 = vsel %vm8048_vm2, %v1684_v5, %v1688_v49  ;;  %v1691_v16 = vshrl.u32 %v6124_v56, 16 }
 0x25c   : > { %v3910_v37 = vadd.f32 %v3909_v45, %v3821_v59  ;;  %4522 = vmatmul.bf16.gmra.mxu0 %v7846_v60  ;;  %v4021_v45 = vmax.f32 %v3989_v3, 0.0  ;;  %v4186_v60 = vunpack.c.l.b16 %v1679_v35  ;;  %v1702_v3 = vrot.slane %v1700_v9, 5  ;;  %v6127_v9 = vld [vmem:[%s8007_s25 + $0x64] sm:$0xf] }
 0x25d   : > { %4611 = vmatmul.bf16.gmra.mxu1 %v8204_v2  ;;  %v1693_v40 = vrot.slane %v1691_v16, 4  ;;  %v7847_v16 = vld [vmem:[%s8007_s25 + $0x3c] sm:$0xff] }
 0x25e   : > { %v3958_v36 = vmul.f32 %v8986_v15, %v3910_v37  ;;  %4700 = vmatmul.bf16.gmra.mxu2 %v7224_v17  ;;  %v1694_v17 = vshll.u32 %v6124_v56, 16 }
 0x25f   : > { %4789 = vmatmul.bf16.gmra.mxu3 %v9234_v30 }
 0x260   : > { %v3990_v24 = vadd.f32 %v9026_v14, %v3958_v36  ;;  %v4187_v36 = vunpack.c.l.b16 %v1689_v12  ;;  %v1696_v1 = vrot.slane %v1694_v17, 5  ;;  %v6126_v17 = vld [vmem:[%s8007_s25 + $0x60] sm:$0xf] }
 0x261   : > { %v3823_v26 = vpop.f32.mrf.mxu2  ;;  %v3647_v53 = vpop.f32.mrf.mxu0 }
 0x262   : > { %v3912_v22 = vpop.f32.mrf.mxu3  ;;  %v4022_v54 = vmax.f32 %v3990_v24, 0.0  ;;  %v3824_v61 = vadd.f32 %v3823_v26, %v3735_v11  ;;  %v3736_v59 = vpop.f32.mrf.mxu1  ;;  %v1706_v11 = vrot.slane %v1704_v23, 4  ;;  %v6151_v26 = vld [vmem:[%s8007_s25 + $0x5c] sm:$0x1]  ;;  %v1697_v35 = vor.u32 %v1696_v1, %v1693_v40 }
 0x263   : > { %v3737_v24 = vadd.f32 %v3736_v59, %v3647_v53  ;;  %v1715_v40 = vshrl.u32 %v6126_v17, 16  ;;  %v1718_v1 = vshll.u32 %v6126_v17, 16  ;;  %v6152_v17 = vld [vmem:[%s8007_s25 + $0x68] sm:$0x1] }
 0x264   : > { %v7498_v46 = vpack.c.bf16 %v4022_v54, %v4021_v45  ;;  %v3913_v37 = vadd.f32 %v3912_v22, %v3824_v61  ;;  %v7225_v45 = vld [vmem:[%s8007_s25 + $0x48] sm:$0xff]  ;;  %v9258_v22 = vpack.c.b16 %v4187_v36, %v4186_v60  ;;  %v1707_v54 = vor.u32 %v1706_v11, %v1702_v3 }
 0x265   : > { %v1710_v61 = vshll.u32 %v6151_v26, 16  ;;  %v1724_v11 = vshll.u32 %v6127_v9, 16 }
 0x266   : > { %7710 = vst [vmem:[%s8430_s12 + $0xd0] sm:$0xff] %v7498_v46   ;;  %v3959_v49 = vmul.f32 %v8986_v15, %v3913_v37  ;;  %v9266_v15 = vld [vmem:[%s9848_s2] ss:$0 sm:$0xff]  ;;  %v1708_v23 = vrot.slane %v1707_v54, 4  ;;  %v1717_v54 = vrot.slane %v1715_v40, 4 }
 0x267   : > { %v1712_v46 = vrot.slane %v1710_v61, 5  ;;  %v1720_v61 = vrot.slane %v1718_v1, 5 }
 0x268   : > { %v3991_v53 = vadd.f32 %v9026_v14, %v3959_v49 }
 0x269   : > { %v3825_v4 = vpop.f32.mrf.mxu2  ;;  %v3650_v56 = vpop.f32.mrf.mxu0 }
 0x26a   : > { %v3914_v42 = vpop.f32.mrf.mxu3  ;;  %v3826_v5 = vadd.f32 %v3825_v4, %v3737_v24  ;;  %v3739_v58 = vpop.f32.mrf.mxu1  ;;  %v4023_v24 = vmax.f32 %v3991_v53, 0.0 }
 0x26b   : > { %v3740_v59 = vadd.f32 %v3739_v58, %v3650_v56  ;;  %v1728_v58 = vshrl.u32 %v6127_v9, 16  ;;  %v7353_v9 = vld [vmem:[%s9847_s1 + $0x3a0] sm:$0xff] }
 0x26c   : > { %v3915_v12 = vadd.f32 %v3914_v42, %v3826_v5  ;;  %4527 = vmatmul.bf16.gmra.mxu0 %v7847_v16  ;;  %v1698_v42 = vrot.slane %v1697_v35, 4  ;;  %v1713_v35 = vsel %vm8048_vm2, %v1708_v23, %v1712_v46  ;;  %5518 = vmatpush.bf16.msrb.mxu2 %v7353_v9  ;;  %v6129_v9 = vld [vmem:[%s8007_s25 + $0x70] sm:$0xf] }
 0x26d   : > { %4616 = vmatmul.bf16.gmra.mxu1 %v8227_v62  ;;  %v4189_v53 = vunpack.c.l.b16 %v1713_v35 }
 0x26e   : > { %v3960_v4 = vmul.f32 %v9266_v15, %v3915_v12  ;;  %4705 = vmatmul.bf16.gmra.mxu2 %v7225_v45  ;;  %v1703_v45 = vsel %vm8048_vm2, %v1698_v42, %v1702_v3  ;;  %v1726_v12 = vrot.slane %v1724_v11, 5  ;;  %v7361_v3 = vld [vmem:[%s9847_s1 + $0x3e0] sm:$0xff] }
 0x26f   : > { %4794 = vmatmul.bf16.gmra.mxu3 %v9258_v22 }
 0x270   : > { %v3992_v37 = vadd.f32 %v9026_v14, %v3960_v4  ;;  %v4188_v4 = vunpack.c.l.b16 %v1703_v45  ;;  %5607 = vmatpush.bf16.msrb.mxu3 %v7361_v3  ;;  %v7849_v45 = vld [vmem:[%s8007_s25 + $0x48] sm:$0xff] }
 0x271   : > { %v3828_v60 = vpop.f32.mrf.mxu2  ;;  %v3652_v5 = vpop.f32.mrf.mxu0 }
 0x272   : > { %v3917_v36 = vpop.f32.mrf.mxu3  ;;  %v4024_v26 = vmax.f32 %v3992_v37, 0.0  ;;  %v3829_v49 = vadd.f32 %v3828_v60, %v3740_v59  ;;  %v3741_v56 = vpop.f32.mrf.mxu1  ;;  %v1730_v59 = vrot.slane %v1728_v58, 4  ;;  %v1721_v37 = vor.u32 %v1720_v61, %v1717_v54  ;;  %v9300_v54 = vld [vmem:[%s9849_s3] ss:$0 sm:$0xff] }
 0x273   : > { %v3742_v42 = vadd.f32 %v3741_v56, %v3652_v5  ;;  %v1734_v60 = vshll.u32 %v6152_v17, 16  ;;  %v7337_v5 = vld [vmem:[%s9847_s1 + $0x320] sm:$0xff] }
 0x274   : > { %v7503_v14 = vpack.c.bf16 %v4024_v26, %v4023_v24  ;;  %v3918_v16 = vadd.f32 %v3917_v36, %v3829_v49  ;;  %v7226_v24 = vld [vmem:[%s8007_s25 + $0x54] sm:$0xff]  ;;  %v9287_v26 = vpack.c.b16 %v4189_v53, %v4188_v4  ;;  %v1731_v49 = vor.u32 %v1730_v59, %v1726_v12  ;;  %v7345_v56 = vld [vmem:[%s9847_s1 + $0x360] sm:$0xff]  ;;  %5340 = vmatpush.bf16.msrb.mxu0 %v7337_v5  ;;  %v6128_v59 = vld [vmem:[%s8007_s25 + $0x6c] sm:$0xf] }
 0x275   : > { %5429 = vmatpush.bf16.msrb.mxu1 %v7345_v56  ;;  %v1722_v35 = vrot.slane %v1721_v37, 4  ;;  %v1752_v5 = vshrl.u32 %v6129_v9, 16 }
 0x276   : > { %7711 = vst [vmem:[%s8430_s12 + $0xd8] sm:$0xff] %v7503_v14   ;;  %v3961_v36 = vmul.f32 %v9266_v15, %v3918_v16  ;;  %v1736_v14 = vrot.slane %v1734_v60, 5  ;;  %v1732_v53 = vrot.slane %v1731_v49, 4  ;;  %v1748_v49 = vshll.u32 %v6129_v9, 16 }
 0x278   : > { %v3993_v61 = vadd.f32 %v9300_v54, %v3961_v36 }
 0x279   : > { %v3830_v23 = vpop.f32.mrf.mxu2  ;;  %v3655_v1 = vpop.f32.mrf.mxu0 }
 0x27a   : > { %v3919_v46 = vpop.f32.mrf.mxu3  ;;  %v3831_v40 = vadd.f32 %v3830_v23, %v3742_v42  ;;  %v3744_v11 = vpop.f32.mrf.mxu1  ;;  %v1727_v23 = vsel %vm8048_vm2, %v1722_v35, %v1726_v12 }
 0x27b   : > { %v3745_v4 = vadd.f32 %v3744_v11, %v3655_v1  ;;  %v1737_v1 = vsel %vm8048_vm2, %v1732_v53, %v1736_v14  ;;  %v1739_v11 = vshrl.u32 %v6128_v59, 16 }
 0x27c   : > { %v3920_v58 = vadd.f32 %v3919_v46, %v3831_v40  ;;  %4532 = vmatmul.bf16.gmra.mxu0 %v7849_v45  ;;  %v4025_v46 = vmax.f32 %v3993_v61, 0.0  ;;  %v4190_v45 = vunpack.c.l.b16 %v1727_v23  ;;  %v1750_v61 = vrot.slane %v1748_v49, 5  ;;  %v6131_v49 = vld [vmem:[%s8007_s25 + $0x7c] sm:$0xf] }
 0x27d   : > { %4621 = vmatmul.bf16.gmra.mxu1 %v8260_v50  ;;  %v1741_v12 = vrot.slane %v1739_v11, 4  ;;  %v7851_v11 = vld [vmem:[%s8007_s25 + $0x54] sm:$0xff] }
 0x27e   : > { %v3962_v16 = vmul.f32 %v9266_v15, %v3920_v58  ;;  %4710 = vmatmul.bf16.gmra.mxu2 %v7226_v24  ;;  %v1742_v24 = vshll.u32 %v6128_v59, 16 }
 0x27f   : > { %4799 = vmatmul.bf16.gmra.mxu3 %v9287_v26 }
 0x280   : > { %v3994_v17 = vadd.f32 %v9300_v54, %v3962_v16  ;;  %v4191_v16 = vunpack.c.l.b16 %v1737_v1  ;;  %v1744_v35 = vrot.slane %v1742_v24, 5  ;;  %v6130_v24 = vld [vmem:[%s8007_s25 + $0x78] sm:$0xf] }
 0x281   : > { %v3833_v3 = vpop.f32.mrf.mxu2  ;;  %v3657_v36 = vpop.f32.mrf.mxu0 }
 0x282   : > { %v3922_v42 = vpop.f32.mrf.mxu3  ;;  %v4026_v37 = vmax.f32 %v3994_v17, 0.0  ;;  %v3834_v60 = vadd.f32 %v3833_v3, %v3745_v4  ;;  %v3746_v40 = vpop.f32.mrf.mxu1  ;;  %v1754_v4 = vrot.slane %v1752_v5, 4  ;;  %v6153_v3 = vld [vmem:[%s8007_s25 + $0x74] sm:$0x1]  ;;  %v1745_v23 = vor.u32 %v1744_v35, %v1741_v12 }
 0x283   : > { %v3747_v17 = vadd.f32 %v3746_v40, %v3657_v36  ;;  %v1763_v12 = vshrl.u32 %v6130_v24, 16  ;;  %v1766_v35 = vshll.u32 %v6130_v24, 16 }
 0x284   : > { %v7508_v56 = vpack.c.bf16 %v4026_v37, %v4025_v46  ;;  %v3923_v58 = vadd.f32 %v3922_v42, %v3834_v60  ;;  %v7227_v46 = vld [vmem:[%s8007_s25 + $0x60] sm:$0xff]  ;;  %v9316_v42 = vpack.c.b16 %v4191_v16, %v4190_v45  ;;  %v1755_v37 = vor.u32 %v1754_v4, %v1750_v61 }
 0x285   : > { %v1758_v60 = vshll.u32 %v6153_v3, 16  ;;  %v1746_v5 = vrot.slane %v1745_v23, 4  ;;  %v1772_v4 = vshll.u32 %v6131_v49, 16 }
 0x286   : > { %7712 = vst [vmem:[%s8430_s12 + $0xe0] sm:$0xff] %v7508_v56   ;;  %v3963_v14 = vmul.f32 %v9266_v15, %v3923_v58  ;;  %v1756_v56 = vrot.slane %v1755_v37, 4 }
 0x287   : > { %v1760_v58 = vrot.slane %v1758_v60, 5  ;;  %v1765_v60 = vrot.slane %v1763_v12, 4 }
 0x288   : > { %v3995_v36 = vadd.f32 %v9300_v54, %v3963_v14 }
 0x289   : > { %v3835_v47 = vpop.f32.mrf.mxu2  ;;  %v3660_v59 = vpop.f32.mrf.mxu0  ;;  %v1761_v23 = vsel %vm8048_vm2, %v1756_v56, %v1760_v58 }
 0x28a   : > { %v3924_v38 = vpop.f32.mrf.mxu3  ;;  %v3836_v53 = vadd.f32 %v3835_v47, %v3747_v17  ;;  %v3749_v9 = vpop.f32.mrf.mxu1  ;;  %v4027_v17 = vmax.f32 %v3995_v36, 0.0  ;;  %v4193_v36 = vunpack.c.l.b16 %v1761_v23  ;;  %v7852_v23 = vld [vmem:[%s8007_s25 + $0x60] sm:$0xff] }
 0x28b   : > { %v3750_v47 = vadd.f32 %v3749_v9, %v3660_v59  ;;  %v1776_v9 = vshrl.u32 %v6131_v49, 16  ;;  %v7352_v49 = vld [vmem:[%s9847_s1 + $0x398] sm:$0xff] }
 0x28c   : > { %v3925_v1 = vadd.f32 %v3924_v38, %v3836_v53  ;;  %4537 = vmatmul.bf16.gmra.mxu0 %v7851_v11  ;;  %v1774_v11 = vrot.slane %v1772_v4, 5  ;;  %5519 = vmatpush.bf16.msrb.mxu2 %v7352_v49  ;;  %v6133_v49 = vld [vmem:[%s8007_s25 + $0x88] sm:$0xf] }
 0x28d   : > { %4626 = vmatmul.bf16.gmra.mxu1 %v8283_v52 }
 0x28e   : > { %v3964_v40 = vmul.f32 %v9266_v15, %v3925_v1  ;;  %4715 = vmatmul.bf16.gmra.mxu2 %v7227_v46  ;;  %v1751_v46 = vsel %vm8048_vm2, %v1746_v5, %v1750_v61  ;;  %v1768_v1 = vrot.slane %v1766_v35, 5  ;;  %v7360_v61 = vld [vmem:[%s9847_s1 + $0x3d8] sm:$0xff] }
 0x28f   : > { %4804 = vmatmul.bf16.gmra.mxu3 %v9316_v42  ;;  %v4192_v24 = vunpack.c.l.b16 %v1751_v46 }
 0x290   : > { %v3996_v45 = vadd.f32 %v9300_v54, %v3964_v40  ;;  %5608 = vmatpush.bf16.msrb.mxu3 %v7360_v61 }
 0x291   : > { %v3838_v38 = vpop.f32.mrf.mxu2  ;;  %v3662_v53 = vpop.f32.mrf.mxu0 }
 0x292   : > { %v3927_v16 = vpop.f32.mrf.mxu3  ;;  %v4028_v3 = vmax.f32 %v3996_v45, 0.0  ;;  %v3839_v14 = vadd.f32 %v3838_v38, %v3750_v47  ;;  %v3751_v59 = vpop.f32.mrf.mxu1  ;;  %v6154_v45 = vld [vmem:[%s8007_s25 + $0x80] sm:$0x1]  ;;  %v1778_v47 = vrot.slane %v1776_v9, 4  ;;  %v1769_v38 = vor.u32 %v1768_v1, %v1765_v60 }
 0x293   : > { %v3752_v5 = vadd.f32 %v3751_v59, %v3662_v53  ;;  %v7336_v53 = vld [vmem:[%s9847_s1 + $0x318] sm:$0xff] }
 0x294   : > { %v7513_v37 = vpack.c.bf16 %v4028_v3, %v4027_v17  ;;  %v3928_v40 = vadd.f32 %v3927_v16, %v3839_v14  ;;  %v1782_v16 = vshll.u32 %v6154_v45, 16  ;;  %v7228_v3 = vld [vmem:[%s8007_s25 + $0x6c] sm:$0xff]  ;;  %v9340_v14 = vpack.c.b16 %v4193_v36, %v4192_v24  ;;  %v7344_v59 = vld [vmem:[%s9847_s1 + $0x358] sm:$0xff]  ;;  %5341 = vmatpush.bf16.msrb.mxu0 %v7336_v53 }
 0x295   : > { %v1779_v9 = vor.u32 %v1778_v47, %v1774_v11  ;;  %5430 = vmatpush.bf16.msrb.mxu1 %v7344_v59  ;;  %v6132_v47 = vld [vmem:[%s8007_s25 + $0x84] sm:$0xf]  ;;  %v1800_v53 = vshrl.u32 %v6133_v49, 16 }
 0x296   : > { %7713 = vst [vmem:[%s8430_s12 + $0xe8] sm:$0xff] %v7513_v37   ;;  %v3965_v12 = vmul.f32 %v9266_v15, %v3928_v40  ;;  %v1770_v37 = vrot.slane %v1769_v38, 4  ;;  %v1784_v60 = vrot.slane %v1782_v16, 5 }
 0x297   : > { %v1780_v36 = vrot.slane %v1779_v9, 4  ;;  %v1796_v9 = vshll.u32 %v6133_v49, 16 }
 0x298   : > { %v3997_v1 = vadd.f32 %v9300_v54, %v3965_v12 }
 0x299   : > { %v3840_v56 = vpop.f32.mrf.mxu2  ;;  %v3665_v4 = vpop.f32.mrf.mxu0 }
 0x29a   : > { %v3929_v58 = vpop.f32.mrf.mxu3  ;;  %v3841_v35 = vadd.f32 %v3840_v56, %v3752_v5  ;;  %v3754_v17 = vpop.f32.mrf.mxu1  ;;  %v1775_v56 = vsel %vm8048_vm2, %v1770_v37, %v1774_v11 }
 0x29b   : > { %v3755_v24 = vadd.f32 %v3754_v17, %v3665_v4  ;;  %v1785_v4 = vsel %vm8048_vm2, %v1780_v36, %v1784_v60  ;;  %v1787_v17 = vshrl.u32 %v6132_v47, 16 }
 0x29c   : > { %v3930_v46 = vadd.f32 %v3929_v58, %v3841_v35  ;;  %4542 = vmatmul.bf16.gmra.mxu0 %v7852_v23  ;;  %v4029_v58 = vmax.f32 %v3997_v1, 0.0  ;;  %v4194_v23 = vunpack.c.l.b16 %v1775_v56  ;;  %v1798_v1 = vrot.slane %v1796_v9, 5  ;;  %v6135_v9 = vld [vmem:[%s8007_s25 + $0x94] sm:$0xf] }
 0x29d   : > { %4631 = vmatmul.bf16.gmra.mxu1 %v8311_v43  ;;  %v1789_v11 = vrot.slane %v1787_v17, 4  ;;  %v7853_v17 = vld [vmem:[%s8007_s25 + $0x6c] sm:$0xff] }
 0x29e   : > { %v3966_v40 = vmul.f32 %v9266_v15, %v3930_v46  ;;  %4720 = vmatmul.bf16.gmra.mxu2 %v7228_v3  ;;  %v1790_v3 = vshll.u32 %v6132_v47, 16 }
 0x29f   : > { %4809 = vmatmul.bf16.gmra.mxu3 %v9340_v14 }
 0x2a0   : > { %v3998_v45 = vadd.f32 %v9300_v54, %v3966_v40  ;;  %v4195_v40 = vunpack.c.l.b16 %v1785_v4  ;;  %v1792_v37 = vrot.slane %v1790_v3, 5  ;;  %v6134_v3 = vld [vmem:[%s8007_s25 + $0x90] sm:$0xf] }
 0x2a1   : > { %v3843_v61 = vpop.f32.mrf.mxu2  ;;  %v3667_v12 = vpop.f32.mrf.mxu0 }
 0x2a2   : > { %v3932_v5 = vpop.f32.mrf.mxu3  ;;  %v4030_v38 = vmax.f32 %v3998_v45, 0.0  ;;  %v3844_v16 = vadd.f32 %v3843_v61, %v3755_v24  ;;  %v3756_v35 = vpop.f32.mrf.mxu1  ;;  %v1802_v24 = vrot.slane %v1800_v53, 4  ;;  %v6155_v61 = vld [vmem:[%s8007_s25 + $0x8c] sm:$0x1]  ;;  %v1793_v56 = vor.u32 %v1792_v37, %v1789_v11 }
 0x2a3   : > { %v3757_v45 = vadd.f32 %v3756_v35, %v3667_v12  ;;  %v1811_v11 = vshrl.u32 %v6134_v3, 16  ;;  %v1814_v37 = vshll.u32 %v6134_v3, 16 }
 0x2a4   : > { %v7518_v59 = vpack.c.bf16 %v4030_v38, %v4029_v58  ;;  %v3933_v46 = vadd.f32 %v3932_v5, %v3844_v16  ;;  %v7229_v58 = vld [vmem:[%s8007_s25 + $0x78] sm:$0xff]  ;;  %v9364_v5 = vpack.c.b16 %v4195_v40, %v4194_v23  ;;  %v1803_v38 = vor.u32 %v1802_v24, %v1798_v1 }
 0x2a5   : > { %v1806_v16 = vshll.u32 %v6155_v61, 16  ;;  %v1794_v53 = vrot.slane %v1793_v56, 4  ;;  %v1820_v24 = vshll.u32 %v6135_v9, 16 }
 0x2a6   : > { %7714 = vst [vmem:[%s8430_s12 + $0xf0] sm:$0xff] %v7518_v59   ;;  %v3967_v60 = vmul.f32 %v9266_v15, %v3933_v46  ;;  %v1804_v59 = vrot.slane %v1803_v38, 4 }
 0x2a7   : > { %v1808_v46 = vrot.slane %v1806_v16, 5  ;;  %v1813_v16 = vrot.slane %v1811_v11, 4 }
 0x2a8   : > { %v3999_v12 = vadd.f32 %v9300_v54, %v3967_v60 }
 0x2a9   : > { %v3845_v57 = vpop.f32.mrf.mxu2  ;;  %v4508_v47 = vpop.f32.mrf.mxu0  ;;  %v1809_v56 = vsel %vm8048_vm2, %v1804_v59, %v1808_v46 }
 0x2aa   : > { %v3934_v28 = vpop.f32.mrf.mxu3  ;;  %v3846_v36 = vadd.f32 %v3845_v57, %v3757_v45  ;;  %v4597_v49 = vpop.f32.mrf.mxu1  ;;  %v4031_v45 = vmax.f32 %v3999_v12, 0.0  ;;  %v4197_v12 = vunpack.c.l.b16 %v1809_v56  ;;  %v7854_v56 = vld [vmem:[%s8007_s25 + $0x78] sm:$0xff] }
 0x2ab   : > { %v4598_v57 = vadd.f32 %v4597_v49, %v4508_v47  ;;  %v1824_v49 = vshrl.u32 %v6135_v9, 16  ;;  %v7351_v9 = vld [vmem:[%s9847_s1 + $0x390] sm:$0xff] }
 0x2ac   : > { %v3935_v4 = vadd.f32 %v3934_v28, %v3846_v36  ;;  %4547 = vmatmul.bf16.gmra.mxu0 %v7853_v17  ;;  %v1822_v17 = vrot.slane %v1820_v24, 5  ;;  %5520 = vmatpush.bf16.msrb.mxu2 %v7351_v9  ;;  %v6137_v9 = vld [vmem:[%s8007_s25 + $0xa0] sm:$0xf] }
 0x2ad   : > { %4636 = vmatmul.bf16.gmra.mxu1 %v8339_v44 }
 0x2ae   : > { %v3968_v35 = vmul.f32 %v9266_v15, %v3935_v4  ;;  %4725 = vmatmul.bf16.gmra.mxu2 %v7229_v58  ;;  %v1799_v58 = vsel %vm8048_vm2, %v1794_v53, %v1798_v1  ;;  %v1816_v4 = vrot.slane %v1814_v37, 5  ;;  %v7359_v1 = vld [vmem:[%s9847_s1 + $0x3d0] sm:$0xff] }
 0x2af   : > { %4814 = vmatmul.bf16.gmra.mxu3 %v9364_v5  ;;  %v4196_v3 = vunpack.c.l.b16 %v1799_v58 }
 0x2b0   : > { %v4000_v23 = vadd.f32 %v9300_v54, %v3968_v35  ;;  %5609 = vmatpush.bf16.msrb.mxu3 %v7359_v1 }
 0x2b1   : > { %v4686_v28 = vpop.f32.mrf.mxu2  ;;  %v4510_v36 = vpop.f32.mrf.mxu0 }
 0x2b2   : > { %v4775_v40 = vpop.f32.mrf.mxu3  ;;  %v4032_v61 = vmax.f32 %v4000_v23, 0.0  ;;  %v4687_v60 = vadd.f32 %v4686_v28, %v4598_v57  ;;  %v4599_v47 = vpop.f32.mrf.mxu1  ;;  %v6156_v23 = vld [vmem:[%s8007_s25 + $0x98] sm:$0x1]  ;;  %v1826_v57 = vrot.slane %v1824_v49, 4  ;;  %v1817_v28 = vor.u32 %v1816_v4, %v1813_v16 }
 0x2b3   : > { %v4600_v53 = vadd.f32 %v4599_v47, %v4510_v36  ;;  %v7335_v36 = vld [vmem:[%s9847_s1 + $0x310] sm:$0xff] }
 0x2b4   : > { %v7523_v38 = vpack.c.bf16 %v4032_v61, %v4031_v45  ;;  %v4776_v35 = vadd.f32 %v4775_v40, %v4687_v60  ;;  %v1830_v40 = vshll.u32 %v6156_v23, 16  ;;  %v7230_v61 = vld [vmem:[%s8007_s25 + $0x84] sm:$0xff]  ;;  %v9388_v60 = vpack.c.b16 %v4197_v12, %v4196_v3  ;;  %v7343_v47 = vld [vmem:[%s9847_s1 + $0x350] sm:$0xff]  ;;  %5342 = vmatpush.bf16.msrb.mxu0 %v7335_v36 }
 0x2b5   : > { %v1827_v49 = vor.u32 %v1826_v57, %v1822_v17  ;;  %5431 = vmatpush.bf16.msrb.mxu1 %v7343_v47  ;;  %v6136_v57 = vld [vmem:[%s8007_s25 + $0x9c] sm:$0xf]  ;;  %v1848_v36 = vshrl.u32 %v6137_v9, 16 }
 0x2b6   : > { %7715 = vst [vmem:[%s8430_s12 + $0xf8] sm:$0xff] %v7523_v38   ;;  %v4855_v11 = vmul.f32 %v9266_v15, %v4776_v35  ;;  %v1818_v38 = vrot.slane %v1817_v28, 4  ;;  %v1832_v16 = vrot.slane %v1830_v40, 5 }
 0x2b7   : > { %9890 = vst [vmem:[#allocation12_spill] sm:$0xff] %v9388_v60  ;;  %v1828_v12 = vrot.slane %v1827_v49, 4  ;;  %v1844_v49 = vshll.u32 %v6137_v9, 16 }
 0x2b8   : > { %v4887_v4 = vadd.f32 %v9300_v54, %v4855_v11 }
 0x2b9   : > { %v4688_v59 = vpop.f32.mrf.mxu2  ;;  %v4513_v24 = vpop.f32.mrf.mxu0 }
 0x2ba   : > { %v4777_v46 = vpop.f32.mrf.mxu3  ;;  %v4689_v37 = vadd.f32 %v4688_v59, %v4600_v53  ;;  %v4602_v45 = vpop.f32.mrf.mxu1  ;;  %v1823_v59 = vsel %vm8048_vm2, %v1818_v38, %v1822_v17 }
 0x2bb   : > { %v4603_v3 = vadd.f32 %v4602_v45, %v4513_v24  ;;  %v1833_v24 = vsel %vm8048_vm2, %v1828_v12, %v1832_v16  ;;  %v1835_v45 = vshrl.u32 %v6136_v57, 16 }
 0x2bc   : > { %v4778_v58 = vadd.f32 %v4777_v46, %v4689_v37  ;;  %4552 = vmatmul.bf16.gmra.mxu0 %v7854_v56  ;;  %v4919_v46 = vmax.f32 %v4887_v4, 0.0  ;;  %v4198_v56 = vunpack.c.l.b16 %v1823_v59  ;;  %v1846_v4 = vrot.slane %v1844_v49, 5  ;;  %v6139_v49 = vld [vmem:[%s8007_s25 + $0xac] sm:$0xf] }
 0x2bd   : > { %4641 = vmatmul.bf16.gmra.mxu1 %v8391_v13  ;;  %v1837_v17 = vrot.slane %v1835_v45, 4  ;;  %v7855_v45 = vld [vmem:[%s8007_s25 + $0x84] sm:$0xff] }
 0x2be   : > { %v4856_v35 = vmul.f32 %v9266_v15, %v4778_v58  ;;  %4730 = vmatmul.bf16.gmra.mxu2 %v7230_v61  ;;  %v1838_v61 = vshll.u32 %v6136_v57, 16 }
 0x2bf   : > { %4819 = vmatmul.bf16.gmra.mxu3 %v9388_v60 }
 0x2c0   : > { %v4888_v23 = vadd.f32 %v9300_v54, %v4856_v35  ;;  %v4199_v35 = vunpack.c.l.b16 %v1833_v24  ;;  %v1840_v38 = vrot.slane %v1838_v61, 5  ;;  %v6138_v61 = vld [vmem:[%s8007_s25 + $0xa8] sm:$0xf] }
 0x2c1   : > { %v4691_v1 = vpop.f32.mrf.mxu2  ;;  %v4515_v11 = vpop.f32.mrf.mxu0 }
 0x2c2   : > { %v4780_v53 = vpop.f32.mrf.mxu3  ;;  %v4920_v28 = vmax.f32 %v4888_v23, 0.0  ;;  %v4692_v40 = vadd.f32 %v4691_v1, %v4603_v3  ;;  %v4604_v37 = vpop.f32.mrf.mxu1  ;;  %v1850_v3 = vrot.slane %v1848_v36, 4  ;;  %v6157_v1 = vld [vmem:[%s8007_s25 + $0xa4] sm:$0x1]  ;;  %v1841_v59 = vor.u32 %v1840_v38, %v1837_v17 }
 0x2c3   : > { %v4605_v23 = vadd.f32 %v4604_v37, %v4515_v11  ;;  %v1859_v17 = vshrl.u32 %v6138_v61, 16  ;;  %v1862_v38 = vshll.u32 %v6138_v61, 16 }
 0x2c4   : > { %v7528_v47 = vpack.c.bf16 %v4920_v28, %v4919_v46  ;;  %v4781_v58 = vadd.f32 %v4780_v53, %v4692_v40  ;;  %v7231_v46 = vld [vmem:[%s8007_s25 + $0x90] sm:$0xff]  ;;  %v9412_v53 = vpack.c.b16 %v4199_v35, %v4198_v56  ;;  %v1851_v28 = vor.u32 %v1850_v3, %v1846_v4 }
 0x2c5   : > { %v1854_v40 = vshll.u32 %v6157_v1, 16  ;;  %v1842_v36 = vrot.slane %v1841_v59, 4  ;;  %v1868_v3 = vshll.u32 %v6139_v49, 16 }
 0x2c6   : > { %7716 = vst [vmem:[%s8430_s12 + $0x100] sm:$0xff] %v7528_v47   ;;  %v4857_v16 = vmul.f32 %v9266_v15, %v4781_v58  ;;  %v1852_v47 = vrot.slane %v1851_v28, 4 }
 0x2c7   : > { %v1856_v58 = vrot.slane %v1854_v40, 5  ;;  %v1861_v40 = vrot.slane %v1859_v17, 4 }
 0x2c8   : > { %v4889_v11 = vadd.f32 %v9300_v54, %v4857_v16 }
 0x2c9   : > { %v4693_v60 = vpop.f32.mrf.mxu2  ;;  %v4518_v57 = vpop.f32.mrf.mxu0  ;;  %v1857_v59 = vsel %vm8048_vm2, %v1852_v47, %v1856_v58 }
 0x2ca   : > { %v4782_v13 = vpop.f32.mrf.mxu3  ;;  %v4694_v12 = vadd.f32 %v4693_v60, %v4605_v23  ;;  %v4607_v9 = vpop.f32.mrf.mxu1  ;;  %v4921_v23 = vmax.f32 %v4889_v11, 0.0  ;;  %v4201_v11 = vunpack.c.l.b16 %v1857_v59  ;;  %v7856_v59 = vld [vmem:[%s8007_s25 + $0x90] sm:$0xff] }
 0x2cb   : > { %v4608_v60 = vadd.f32 %v4607_v9, %v4518_v57  ;;  %v1872_v9 = vshrl.u32 %v6139_v49, 16  ;;  %v7350_v49 = vld [vmem:[%s9847_s1 + $0x388] sm:$0xff] }
 0x2cc   : > { %v4783_v24 = vadd.f32 %v4782_v13, %v4694_v12  ;;  %4557 = vmatmul.bf16.gmra.mxu0 %v7855_v45  ;;  %v1870_v45 = vrot.slane %v1868_v3, 5  ;;  %5521 = vmatpush.bf16.msrb.mxu2 %v7350_v49  ;;  %v6141_v49 = vld [vmem:[%s8007_s25 + $0xb8] sm:$0xf] }
 0x2cd   : > { %4646 = vmatmul.bf16.gmra.mxu1 %v8439_v51 }
 0x2ce   : > { %v4858_v37 = vmul.f32 %v9266_v15, %v4783_v24  ;;  %4735 = vmatmul.bf16.gmra.mxu2 %v7231_v46  ;;  %v1847_v46 = vsel %vm8048_vm2, %v1842_v36, %v1846_v4  ;;  %v1864_v24 = vrot.slane %v1862_v38, 5  ;;  %v7358_v4 = vld [vmem:[%s9847_s1 + $0x3c8] sm:$0xff] }
 0x2cf   : > { %4824 = vmatmul.bf16.gmra.mxu3 %v9412_v53  ;;  %v4200_v61 = vunpack.c.l.b16 %v1847_v46 }
 0x2d0   : > { %v4890_v56 = vadd.f32 %v9300_v54, %v4858_v37  ;;  %5610 = vmatpush.bf16.msrb.mxu3 %v7358_v4 }
 0x2d1   : > { %v4696_v13 = vpop.f32.mrf.mxu2  ;;  %v4520_v12 = vpop.f32.mrf.mxu0 }
 0x2d2   : > { %v4785_v35 = vpop.f32.mrf.mxu3  ;;  %v4922_v1 = vmax.f32 %v4890_v56, 0.0  ;;  %v4697_v16 = vadd.f32 %v4696_v13, %v4608_v60  ;;  %v4609_v57 = vpop.f32.mrf.mxu1  ;;  %v6158_v56 = vld [vmem:[%s8007_s25 + $0xb0] sm:$0x1]  ;;  %v1874_v60 = vrot.slane %v1872_v9, 4  ;;  %v1865_v13 = vor.u32 %v1864_v24, %v1861_v40 }
 0x2d3   : > { %v4610_v36 = vadd.f32 %v4609_v57, %v4520_v12  ;;  %v7334_v12 = vld [vmem:[%s9847_s1 + $0x308] sm:$0xff] }
 0x2d4   : > { %v7533_v28 = vpack.c.bf16 %v4922_v1, %v4921_v23  ;;  %v4786_v37 = vadd.f32 %v4785_v35, %v4697_v16  ;;  %v1878_v35 = vshll.u32 %v6158_v56, 16  ;;  %v7232_v1 = vld [vmem:[%s8007_s25 + $0x9c] sm:$0xff]  ;;  %v9436_v16 = vpack.c.b16 %v4201_v11, %v4200_v61  ;;  %v7342_v57 = vld [vmem:[%s9847_s1 + $0x348] sm:$0xff]  ;;  %5343 = vmatpush.bf16.msrb.mxu0 %v7334_v12 }
 0x2d5   : > { %v1875_v9 = vor.u32 %v1874_v60, %v1870_v45  ;;  %5432 = vmatpush.bf16.msrb.mxu1 %v7342_v57  ;;  %v6140_v60 = vld [vmem:[%s8007_s25 + $0xb4] sm:$0xf]  ;;  %v1896_v12 = vshrl.u32 %v6141_v49, 16 }
 0x2d6   : > { %7717 = vst [vmem:[%s8430_s12 + $0x108] sm:$0xff] %v7533_v28   ;;  %v4859_v17 = vmul.f32 %v9266_v15, %v4786_v37  ;;  %v1866_v28 = vrot.slane %v1865_v13, 4  ;;  %v1880_v40 = vrot.slane %v1878_v35, 5 }
 0x2d7   : > { %9891 = vst [vmem:[#allocation13_spill] sm:$0xff] %v9436_v16  ;;  %v1876_v11 = vrot.slane %v1875_v9, 4  ;;  %v1892_v9 = vshll.u32 %v6141_v49, 16 }
 0x2d8   : > { %v4891_v24 = vadd.f32 %v9300_v54, %v4859_v17 }
 0x2d9   : > { %v4698_v47 = vpop.f32.mrf.mxu2  ;;  %v4523_v3 = vpop.f32.mrf.mxu0 }
 0x2da   : > { %v4787_v58 = vpop.f32.mrf.mxu3  ;;  %v4699_v38 = vadd.f32 %v4698_v47, %v4610_v36  ;;  %v4612_v23 = vpop.f32.mrf.mxu1  ;;  %v1871_v47 = vsel %vm8048_vm2, %v1866_v28, %v1870_v45 }
 0x2db   : > { %v4613_v61 = vadd.f32 %v4612_v23, %v4523_v3  ;;  %v1881_v3 = vsel %vm8048_vm2, %v1876_v11, %v1880_v40  ;;  %v1883_v23 = vshrl.u32 %v6140_v60, 16 }
 0x2dc   : > { %v4788_v46 = vadd.f32 %v4787_v58, %v4699_v38  ;;  %4562 = vmatmul.bf16.gmra.mxu0 %v7856_v59  ;;  %v4923_v58 = vmax.f32 %v4891_v24, 0.0  ;;  %v4202_v59 = vunpack.c.l.b16 %v1871_v47  ;;  %v1894_v24 = vrot.slane %v1892_v9, 5  ;;  %v6143_v9 = vld [vmem:[%s8007_s25 + $0xc4] sm:$0xf] }
 0x2dd   : > { %4651 = vmatmul.bf16.gmra.mxu1 %v8480_v39  ;;  %v1885_v45 = vrot.slane %v1883_v23, 4  ;;  %v7857_v23 = vld [vmem:[%s8007_s25 + $0x9c] sm:$0xff] }
 0x2de   : > { %v4860_v37 = vmul.f32 %v9266_v15, %v4788_v46  ;;  %4740 = vmatmul.bf16.gmra.mxu2 %v7232_v1  ;;  %v1886_v1 = vshll.u32 %v6140_v60, 16 }
 0x2df   : > { %4829 = vmatmul.bf16.gmra.mxu3 %v9436_v16 }
 0x2e0   : > { %v4892_v56 = vadd.f32 %v9300_v54, %v4860_v37  ;;  %v4203_v37 = vunpack.c.l.b16 %v1881_v3  ;;  %v1888_v28 = vrot.slane %v1886_v1, 5  ;;  %v6142_v1 = vld [vmem:[%s8007_s25 + $0xc0] sm:$0xf] }
 0x2e1   : > { %v4701_v4 = vpop.f32.mrf.mxu2  ;;  %v4525_v17 = vpop.f32.mrf.mxu0 }
 0x2e2   : > { %v4790_v36 = vpop.f32.mrf.mxu3  ;;  %v4924_v13 = vmax.f32 %v4892_v56, 0.0  ;;  %v4702_v35 = vadd.f32 %v4701_v4, %v4613_v61  ;;  %v4614_v38 = vpop.f32.mrf.mxu1  ;;  %v1898_v61 = vrot.slane %v1896_v12, 4  ;;  %v6159_v4 = vld [vmem:[%s8007_s25 + $0xbc] sm:$0x1]  ;;  %v1889_v47 = vor.u32 %v1888_v28, %v1885_v45 }
 0x2e3   : > { %v4615_v56 = vadd.f32 %v4614_v38, %v4525_v17  ;;  %v1907_v45 = vshrl.u32 %v6142_v1, 16  ;;  %v1910_v28 = vshll.u32 %v6142_v1, 16 }
 0x2e4   : > { %v7538_v57 = vpack.c.bf16 %v4924_v13, %v4923_v58  ;;  %v4791_v46 = vadd.f32 %v4790_v36, %v4702_v35  ;;  %v7233_v58 = vld [vmem:[%s8007_s25 + $0xa8] sm:$0xff]  ;;  %v9460_v36 = vpack.c.b16 %v4203_v37, %v4202_v59  ;;  %v1899_v13 = vor.u32 %v1898_v61, %v1894_v24 }
 0x2e5   : > { %v1902_v35 = vshll.u32 %v6159_v4, 16  ;;  %v1890_v12 = vrot.slane %v1889_v47, 4  ;;  %v1916_v61 = vshll.u32 %v6143_v9, 16 }
 0x2e6   : > { %7718 = vst [vmem:[%s8430_s12 + $0x110] sm:$0xff] %v7538_v57   ;;  %v4861_v40 = vmul.f32 %v9266_v15, %v4791_v46  ;;  %v1900_v57 = vrot.slane %v1899_v13, 4 }
 0x2e7   : > { %v1904_v46 = vrot.slane %v1902_v35, 5  ;;  %v1909_v35 = vrot.slane %v1907_v45, 4 }
 0x2e8   : > { %v4893_v17 = vadd.f32 %v9300_v54, %v4861_v40 }
 0x2e9   : > { %v4703_v16 = vpop.f32.mrf.mxu2  ;;  %v4528_v60 = vpop.f32.mrf.mxu0  ;;  %v1905_v47 = vsel %vm8048_vm2, %v1900_v57, %v1904_v46 }
 0x2ea   : > { %v4792_v39 = vpop.f32.mrf.mxu3  ;;  %v4704_v11 = vadd.f32 %v4703_v16, %v4615_v56  ;;  %v4617_v49 = vpop.f32.mrf.mxu1  ;;  %v4925_v56 = vmax.f32 %v4893_v17, 0.0  ;;  %v4205_v17 = vunpack.c.l.b16 %v1905_v47  ;;  %v7858_v47 = vld [vmem:[%s8007_s25 + $0xa8] sm:$0xff] }
 0x2eb   : > { %v4618_v16 = vadd.f32 %v4617_v49, %v4528_v60  ;;  %v1920_v49 = vshrl.u32 %v6143_v9, 16  ;;  %v7349_v9 = vld [vmem:[%s9847_s1 + $0x380] sm:$0xff] }
 0x2ec   : > { %v4793_v3 = vadd.f32 %v4792_v39, %v4704_v11  ;;  %4567 = vmatmul.bf16.gmra.mxu0 %v7857_v23  ;;  %v1918_v23 = vrot.slane %v1916_v61, 5  ;;  %5522 = vmatpush.bf16.msrb.mxu2 %v7349_v9  ;;  %v6145_v9 = vld [vmem:[%s8007_s25 + $0xd0] sm:$0xf] }
 0x2ed   : > { %4656 = vmatmul.bf16.gmra.mxu1 %v9884_v63 }
 0x2ee   : > { %v4862_v38 = vmul.f32 %v9266_v15, %v4793_v3  ;;  %4745 = vmatmul.bf16.gmra.mxu2 %v7233_v58  ;;  %v1895_v58 = vsel %vm8048_vm2, %v1890_v12, %v1894_v24  ;;  %v1912_v3 = vrot.slane %v1910_v28, 5  ;;  %v7357_v24 = vld [vmem:[%s9847_s1 + $0x3c0] sm:$0xff] }
 0x2ef   : > { %4834 = vmatmul.bf16.gmra.mxu3 %v9460_v36  ;;  %v4204_v1 = vunpack.c.l.b16 %v1895_v58 }
 0x2f0   : > { %v4894_v59 = vadd.f32 %v9300_v54, %v4862_v38  ;;  %5611 = vmatpush.bf16.msrb.mxu3 %v7357_v24 }
 0x2f1   : > { %v4706_v39 = vpop.f32.mrf.mxu2  ;;  %v4530_v11 = vpop.f32.mrf.mxu0 }
 0x2f2   : > { %v4795_v37 = vpop.f32.mrf.mxu3  ;;  %v4926_v4 = vmax.f32 %v4894_v59, 0.0  ;;  %v4707_v40 = vadd.f32 %v4706_v39, %v4618_v16  ;;  %v4619_v60 = vpop.f32.mrf.mxu1  ;;  %v6160_v59 = vld [vmem:[%s8007_s25 + $0xc8] sm:$0x1]  ;;  %v1922_v16 = vrot.slane %v1920_v49, 4  ;;  %v1913_v39 = vor.u32 %v1912_v3, %v1909_v35 }
 0x2f3   : > { %v4620_v12 = vadd.f32 %v4619_v60, %v4530_v11  ;;  %v7333_v11 = vld [vmem:[%s9847_s1 + $0x300] sm:$0xff] }
 0x2f4   : > { %v7543_v13 = vpack.c.bf16 %v4926_v4, %v4925_v56  ;;  %v4796_v38 = vadd.f32 %v4795_v37, %v4707_v40  ;;  %v1926_v37 = vshll.u32 %v6160_v59, 16  ;;  %v7234_v4 = vld [vmem:[%s8007_s25 + $0xb4] sm:$0xff]  ;;  %v9484_v40 = vpack.c.b16 %v4205_v17, %v4204_v1  ;;  %v7341_v60 = vld [vmem:[%s9847_s1 + $0x340] sm:$0xff]  ;;  %5344 = vmatpush.bf16.msrb.mxu0 %v7333_v11 }
 0x2f5   : > { %v1923_v49 = vor.u32 %v1922_v16, %v1918_v23  ;;  %5433 = vmatpush.bf16.msrb.mxu1 %v7341_v60  ;;  %v6144_v16 = vld [vmem:[%s8007_s25 + $0xcc] sm:$0xf] }
 0x2f6   : > { %7719 = vst [vmem:[%s8430_s12 + $0x118] sm:$0xff] %v7543_v13   ;;  %v4863_v45 = vmul.f32 %v9266_v15, %v4796_v38  ;;  %v1914_v13 = vrot.slane %v1913_v39, 4  ;;  %v1928_v35 = vrot.slane %v1926_v37, 5 }
 0x2f7   : > { %9892 = vst [vmem:[#allocation14_spill] sm:$0xff] %v9484_v40  ;;  %v1924_v17 = vrot.slane %v1923_v49, 4  ;;  %v1944_v49 = vshrl.u32 %v6145_v9, 16 }
 0x2f8   : > { %v4895_v3 = vadd.f32 %v9300_v54, %v4863_v45 }
 0x2f9   : > { %v4708_v57 = vpop.f32.mrf.mxu2  ;;  %v4533_v61 = vpop.f32.mrf.mxu0 }
 0x2fa   : > { %v4797_v46 = vpop.f32.mrf.mxu3  ;;  %v4709_v28 = vadd.f32 %v4708_v57, %v4620_v12  ;;  %v4622_v56 = vpop.f32.mrf.mxu1  ;;  %v1919_v57 = vsel %vm8048_vm2, %v1914_v13, %v1918_v23 }
 0x2fb   : > { %v4623_v1 = vadd.f32 %v4622_v56, %v4533_v61  ;;  %v1931_v61 = vshrl.u32 %v6144_v16, 16  ;;  %v1934_v56 = vshll.u32 %v6144_v16, 16 }
 0x2fc   : > { %v4798_v58 = vadd.f32 %v4797_v46, %v4709_v28  ;;  %4572 = vmatmul.bf16.gmra.mxu0 %v7858_v47  ;;  %v4927_v46 = vmax.f32 %v4895_v3, 0.0  ;;  %v1929_v28 = vsel %vm8048_vm2, %v1924_v17, %v1928_v35  ;;  %v9509_v35 = vld [vmem:[%s9848_s2] ss:$0 sm:$0xff] }
 0x2fd   : > { %4661 = vmatmul.bf16.gmra.mxu1 %v9887_v25  ;;  %v4207_v47 = vunpack.c.l.b16 %v1929_v28  ;;  %v1933_v23 = vrot.slane %v1931_v61, 4  ;;  %v1936_v13 = vrot.slane %v1934_v56, 5 }
 0x2fe   : > { %v4864_v38 = vmul.f32 %v9266_v15, %v4798_v58  ;;  %4750 = vmatmul.bf16.gmra.mxu2 %v7234_v4  ;;  %v1940_v4 = vshll.u32 %v6145_v9, 16  ;;  %v4206_v58 = vunpack.c.l.b16 %v1919_v57  ;;  %v7235_v57 = vld [vmem:[%s8007_s25 + $0xc0] sm:$0xff] }
 0x2ff   : > { %4839 = vmatmul.bf16.gmra.mxu3 %v9484_v40 }
 0x300   : > { %v4896_v59 = vadd.f32 %v9300_v54, %v4864_v38  ;;  %v1942_v3 = vrot.slane %v1940_v4, 5  ;;  %v1946_v38 = vrot.slane %v1944_v49, 4 }
 0x301   : > { %v4711_v24 = vpop.f32.mrf.mxu2  ;;  %v4535_v45 = vpop.f32.mrf.mxu0 }
 0x302   : > { %v4800_v12 = vpop.f32.mrf.mxu3  ;;  %v4928_v39 = vmax.f32 %v4896_v59, 0.0  ;;  %v4712_v37 = vadd.f32 %v4711_v24, %v4623_v1  ;;  %v4624_v15 = vpop.f32.mrf.mxu1  ;;  %v6161_v59 = vld [vmem:[%s8007_s25 + $0xd4] sm:$0x1] }
 0x303   : > { %v4625_v1 = vadd.f32 %v4624_v15, %v4535_v45  ;;  %v1950_v28 = vshll.u32 %v6161_v59, 16  ;;  %v7860_v15 = vld [vmem:[%s8007_s25 + $0xb4] sm:$0xff] }
 0x304   : > { %v7548_v11 = vpack.c.bf16 %v4928_v39, %v4927_v46  ;;  %v4801_v60 = vadd.f32 %v4800_v12, %v4712_v37  ;;  %v9513_v46 = vpack.c.b16 %v4207_v47, %v4206_v58  ;;  %v1937_v39 = vor.u32 %v1936_v13, %v1933_v23 }
 0x305   : > { %v1947_v37 = vor.u32 %v1946_v38, %v1942_v3 }
 0x306   : > { %7720 = vst [vmem:[%s8430_s12 + $0x120] sm:$0xff] %v7548_v11   ;;  %v4865_v17 = vmul.f32 %v9509_v35, %v4801_v60  ;;  %v1938_v49 = vrot.slane %v1937_v39, 4  ;;  %v1952_v60 = vrot.slane %v1950_v28, 5 }
 0x307   : > { %v1948_v11 = vrot.slane %v1947_v37, 4 }
 0x308   : > { %v4897_v61 = vadd.f32 %v9300_v54, %v4865_v17 }
 0x309   : > { %v4713_v24 = vpop.f32.mrf.mxu2  ;;  %v4538_v9 = vpop.f32.mrf.mxu0  ;;  %v1953_v17 = vsel %vm8048_vm2, %v1948_v11, %v1952_v60  ;;  %v6162_v60 = vld [vmem:[%s8007_s25 + $0x18] sm:$0xe] }
 0x30a   : > { %v4802_v40 = vpop.f32.mrf.mxu3  ;;  %v4714_v16 = vadd.f32 %v4713_v24, %v4625_v1  ;;  %v4627_v12 = vpop.f32.mrf.mxu1  ;;  %v4929_v23 = vmax.f32 %v4897_v61, 0.0  ;;  %v1943_v24 = vsel %vm8048_vm2, %v1938_v49, %v1942_v3  ;;  %v7236_v3 = vld [vmem:[%s8007_s25 + $0xcc] sm:$0xff] }
 0x30b   : > { %v4628_v4 = vadd.f32 %v4627_v12, %v4538_v9  ;;  %v4208_v12 = vunpack.c.l.b16 %v1943_v24  ;;  %v9541_v24 = vld [vmem:[%s9849_s3] ss:$0 sm:$0xff] }
 0x30c   : > { %v4803_v45 = vadd.f32 %v4802_v40, %v4714_v16  ;;  %4577 = vmatmul.bf16.gmra.mxu0 %v7860_v15 }
 0x30d   : > { %4666 = vmatmul.bf16.gmra.mxu1 %v8599_v19 }
 0x30e   : > { %v4866_v56 = vmul.f32 %v9509_v35, %v4803_v45  ;;  %4755 = vmatmul.bf16.gmra.mxu2 %v7235_v57  ;;  %v4209_v57 = vunpack.c.l.b16 %v1953_v17 }
 0x30f   : > { %4844 = vmatmul.bf16.gmra.mxu3 %v9513_v46 }
 0x310   : > { %v4898_v58 = vadd.f32 %v9300_v54, %v4866_v56  ;;  %v9528_v48 = vpack.c.b16 %v4209_v57, %v4208_v12 }
 0x311   : > { %v4716_v47 = vpop.f32.mrf.mxu2  ;;  %v4540_v1 = vpop.f32.mrf.mxu0 }
 0x312   : > { %v4805_v40 = vpop.f32.mrf.mxu3  ;;  %v4930_v13 = vmax.f32 %v4898_v58, 0.0  ;;  %v4717_v38 = vadd.f32 %v4716_v47, %v4628_v4  ;;  %v4629_v59 = vpop.f32.mrf.mxu1  ;;  %v7861_v4 = vld [vmem:[%s8007_s25 + $0x1c] sm:$0xf]  ;;  %v7862_v58 = vld [vmem:[%s8007_s25 + $0xc0] sm:$0xff] }
 0x313   : > { %v4630_v39 = vadd.f32 %v4629_v59, %v4540_v1  ;;  %v2020_v49 = vrot.slane %v7861_v4, 5  ;;  %v7863_v1 = vld [vmem:[%s8007_s25 + $0x20] sm:$0x1] }
 0x314   : > { %v7553_v16 = vpack.c.bf16 %v4930_v13, %v4929_v23  ;;  %v4806_v9 = vadd.f32 %v4805_v40, %v4717_v38  ;;  %v6178_v13 = vrot.slane %v6162_v60, 9  ;;  %v2023_v59 = vrot.slane %v7863_v1, 5 }
 0x315   : > { %v2022_v38 = vrot.slane %v2020_v49, 4 }
 0x316   : > { %7721 = vst [vmem:[%s8430_s12 + $0x128] sm:$0xff] %v7553_v16   ;;  %v4867_v45 = vmul.f32 %v9509_v35, %v4806_v9 }
 0x318   : > { %v4899_v47 = vadd.f32 %v9300_v54, %v4867_v45  ;;  %v2024_v45 = vsel %vm8602_vm5, %v2022_v38, %v2023_v59  ;;  %v6163_v38 = vld [vmem:[%s8007_s25 + $0x24] sm:$0xe] }
 0x319   : > { %v4718_v37 = vpop.f32.mrf.mxu2  ;;  %v4543_v61 = vpop.f32.mrf.mxu0 }
 0x31a   : > { %v4807_v28 = vpop.f32.mrf.mxu3  ;;  %v4719_v15 = vadd.f32 %v4718_v37, %v4630_v39  ;;  %v4632_v56 = vpop.f32.mrf.mxu1  ;;  %v4931_v9 = vmax.f32 %v4899_v47, 0.0 }
 0x31b   : > { %v4633_v23 = vadd.f32 %v4632_v56, %v4543_v61 }
 0x31c   : > { %v4808_v11 = vadd.f32 %v4807_v28, %v4719_v15  ;;  %4582 = vmatmul.bf16.gmra.mxu0 %v7862_v58  ;;  %v2021_v28 = vsel %vm8602_vm5, %v6178_v13, %v2020_v49  ;;  %v7865_v49 = vld [vmem:[%s8007_s25 + $0x28] sm:$0xf] }
 0x31d   : > { %4671 = vmatmul.bf16.gmra.mxu1 %v8642_v20  ;;  %v5016_v56 = vunpack.c.l.b16 %v2021_v28  ;;  %v2027_v13 = vrot.slane %v7865_v49, 5 }
 0x31e   : > { %v4868_v40 = vmul.f32 %v9509_v35, %v4808_v11  ;;  %4760 = vmatmul.bf16.gmra.mxu2 %v7236_v3  ;;  %v5017_v3 = vunpack.c.l.b16 %v2024_v45 }
 0x31f   : > { %4849 = vmatmul.bf16.gmra.mxu3 %v9528_v48 }
 0x320   : > { %v4900_v17 = vadd.f32 %v9541_v24, %v4868_v40  ;;  %v5048_v1 = vpack.c.b16 %v5017_v3, %v5016_v56 }
 0x321   : > { %v4721_v16 = vpop.f32.mrf.mxu2  ;;  %v4545_v39 = vpop.f32.mrf.mxu0 }
 0x322   : > { %v4810_v54 = vpop.f32.mrf.mxu3  ;;  %v4932_v12 = vmax.f32 %v4900_v17, 0.0  ;;  %v4722_v57 = vadd.f32 %v4721_v16, %v4633_v23  ;;  %v4634_v37 = vpop.f32.mrf.mxu1 }
 0x323   : > { %v4635_v4 = vadd.f32 %v4634_v37, %v4545_v39 }
 0x324   : > { %v7558_v15 = vpack.c.bf16 %v4932_v12, %v4931_v9  ;;  %v4811_v61 = vadd.f32 %v4810_v54, %v4722_v57  ;;  %v6179_v9 = vrot.slane %v6163_v38, 9  ;;  %v2029_v12 = vrot.slane %v2027_v13, 4  ;;  %v7866_v57 = vld [vmem:[%s8007_s25 + $0x2c] sm:$0x1] }
 0x325   : > { %v2030_v39 = vrot.slane %v7866_v57, 5 }
 0x326   : > { %7722 = vst [vmem:[%s8430_s12 + $0x130] sm:$0xff] %v7558_v15   ;;  %v4869_v58 = vmul.f32 %v9509_v35, %v4811_v61  ;;  %v2028_v3 = vsel %vm8602_vm5, %v6179_v9, %v2027_v13  ;;  %v7867_v13 = vld [vmem:[%s8007_s25 + $0x34] sm:$0xf]  ;;  %v6164_v9 = vld [vmem:[%s8007_s25 + $0x30] sm:$0xe] }
 0x328   : > { %v4901_v59 = vadd.f32 %v9541_v24, %v4869_v58 }
 0x329   : > { %v4723_v11 = vpop.f32.mrf.mxu2  ;;  %v4548_v40 = vpop.f32.mrf.mxu0 }
 0x32a   : > { %v4812_v60 = vpop.f32.mrf.mxu3  ;;  %v4724_v47 = vadd.f32 %v4723_v11, %v4635_v4  ;;  %v4637_v23 = vpop.f32.mrf.mxu1 }
 0x32b   : > { %v4638_v54 = vadd.f32 %v4637_v23, %v4548_v40 }
 0x32c   : > { %v4813_v17 = vadd.f32 %v4812_v60, %v4724_v47  ;;  %5345 = vmatmul.bf16.vlgmr.msrb.gmra.mxu0 %v8108_v41  ;;  %v4933_v41 = vmax.f32 %v4901_v59, 0.0  ;;  %v5018_v60 = vunpack.c.l.b16 %v2028_v3 }
 0x32d   : > { %5434 = vmatmul.bf16.vlgmr.msrb.gmra.mxu1 %v8670_v33 }
 0x32e   : > { %v4870_v16 = vmul.f32 %v9509_v35, %v4813_v17  ;;  %5523 = vmatmul.bf16.vlgmr.msrb.gmra.mxu2 %v9162_v32  ;;  %v2031_v32 = vsel %vm8602_vm5, %v2029_v12, %v2030_v39 }
 0x32f   : > { %5612 = vmatmul.bf16.vlgmr.msrb.gmra.mxu3 %v5048_v1  ;;  %v5019_v58 = vunpack.c.l.b16 %v2031_v32 }
 0x330   : > { %v4902_v37 = vadd.f32 %v9541_v24, %v4870_v16  ;;  %v2034_v16 = vrot.slane %v7867_v13, 5 }
 0x331   : > { %v4726_v28 = vpop.f32.mrf.mxu2  ;;  %v4550_v61 = vpop.f32.mrf.mxu0  ;;  %v5049_v59 = vpack.c.b16 %v5019_v58, %v5018_v60 }
 0x332   : > { %v4815_v45 = vpop.f32.mrf.mxu3  ;;  %v4934_v15 = vmax.f32 %v4902_v37, 0.0  ;;  %v4727_v33 = vadd.f32 %v4726_v28, %v4638_v54  ;;  %v4639_v56 = vpop.f32.mrf.mxu1  ;;  %v6180_v37 = vrot.slane %v6164_v9, 9  ;;  %v2036_v28 = vrot.slane %v2034_v16, 4 }
 0x333   : > { %v4640_v47 = vadd.f32 %v4639_v56, %v4550_v61 }
 0x334   : > { %v7563_v4 = vpack.c.bf16 %v4934_v15, %v4933_v41  ;;  %v4816_v11 = vadd.f32 %v4815_v45, %v4727_v33  ;;  %v7868_v45 = vld [vmem:[%s8007_s25 + $0x38] sm:$0x1] }
 0x335   : > { %v2037_v41 = vrot.slane %v7868_v45, 5 }
 0x336   : > { %7723 = vst [vmem:[%s8430_s12 + $0x138] sm:$0xff] %v7563_v4   ;;  %v4871_v1 = vmul.f32 %v9509_v35, %v4816_v11  ;;  %v2035_v4 = vsel %vm8602_vm5, %v6180_v37, %v2034_v16  ;;  %v7869_v16 = vld [vmem:[%s8007_s25 + $0x40] sm:$0xf] }
 0x337   : > { %v5020_v58 = vunpack.c.l.b16 %v2035_v4 }
 0x338   : > { %v4903_v12 = vadd.f32 %v9541_v24, %v4871_v1 }
 0x339   : > { %v4728_v40 = vpop.f32.mrf.mxu2  ;;  %v4553_v17 = vpop.f32.mrf.mxu0 }
 0x33a   : > { %v4817_v23 = vpop.f32.mrf.mxu3  ;;  %v4729_v49 = vadd.f32 %v4728_v40, %v4640_v47  ;;  %v4642_v38 = vpop.f32.mrf.mxu1 }
 0x33b   : > { %v4643_v39 = vadd.f32 %v4642_v38, %v4553_v17 }
 0x33c   : > { %v4818_v54 = vadd.f32 %v4817_v23, %v4729_v49  ;;  %5350 = vmatmul.bf16.gmra.mxu0 %v8149_v29  ;;  %v4935_v29 = vmax.f32 %v4903_v12, 0.0  ;;  %v6165_v12 = vld [vmem:[%s8007_s25 + $0x3c] sm:$0xe] }
 0x33d   : > { %5439 = vmatmul.bf16.gmra.mxu1 %v8706_v0 }
 0x33e   : > { %v4872_v57 = vmul.f32 %v9509_v35, %v4818_v54  ;;  %5528 = vmatmul.bf16.gmra.mxu2 %v9186_v34  ;;  %v2038_v34 = vsel %vm8602_vm5, %v2036_v28, %v2037_v41  ;;  %v2041_v54 = vrot.slane %v7869_v16, 5  ;;  %v6181_v28 = vrot.slane %v6165_v12, 9  ;;  %v7870_v41 = vld [vmem:[%s8007_s25 + $0x44] sm:$0x1] }
 0x33f   : > { %5617 = vmatmul.bf16.gmra.mxu3 %v5049_v59  ;;  %v5021_v47 = vunpack.c.l.b16 %v2038_v34 }
 0x340   : > { %v4904_v15 = vadd.f32 %v9541_v24, %v4872_v57  ;;  %v2043_v45 = vrot.slane %v2041_v54, 4 }
 0x341   : > { %v4731_v33 = vpop.f32.mrf.mxu2  ;;  %v4555_v3 = vpop.f32.mrf.mxu0  ;;  %v5050_v13 = vpack.c.b16 %v5021_v47, %v5020_v58 }
 0x342   : > { %v4820_v61 = vpop.f32.mrf.mxu3  ;;  %v4936_v56 = vmax.f32 %v4904_v15, 0.0  ;;  %v4732_v0 = vadd.f32 %v4731_v33, %v4643_v39  ;;  %v4644_v32 = vpop.f32.mrf.mxu1  ;;  %v2044_v15 = vrot.slane %v7870_v41, 5 }
 0x343   : > { %v4645_v40 = vadd.f32 %v4644_v32, %v4555_v3  ;;  %v2042_v32 = vsel %vm8602_vm5, %v6181_v28, %v2041_v54  ;;  %v6166_v54 = vld [vmem:[%s8007_s25 + $0x48] sm:$0xe]  ;;  %v7872_v28 = vld [vmem:[%s8007_s25 + $0x50] sm:$0x1] }
 0x344   : > { %v7568_v11 = vpack.c.bf16 %v4936_v56, %v4935_v29  ;;  %v4821_v60 = vadd.f32 %v4820_v61, %v4732_v0 }
 0x346   : > { %7724 = vst [vmem:[%s8430_s12 + $0x140] sm:$0xff] %v7568_v11   ;;  %v4873_v49 = vmul.f32 %v9509_v35, %v4821_v60  ;;  %v5022_v11 = vunpack.c.l.b16 %v2042_v32 }
 0x348   : > { %v4905_v57 = vadd.f32 %v9541_v24, %v4873_v49 }
 0x349   : > { %v4733_v23 = vpop.f32.mrf.mxu2  ;;  %v4558_v38 = vpop.f32.mrf.mxu0 }
 0x34a   : > { %v4822_v1 = vpop.f32.mrf.mxu3  ;;  %v4734_v17 = vadd.f32 %v4733_v23, %v4645_v40  ;;  %v4647_v59 = vpop.f32.mrf.mxu1 }
 0x34b   : > { %v4648_v37 = vadd.f32 %v4647_v59, %v4558_v38  ;;  %v7871_v59 = vld [vmem:[%s8007_s25 + $0x4c] sm:$0xf] }
 0x34c   : > { %v4823_v9 = vadd.f32 %v4822_v1, %v4734_v17  ;;  %5355 = vmatmul.bf16.gmra.mxu0 %v8171_v18  ;;  %v4937_v18 = vmax.f32 %v4905_v57, 0.0 }
 0x34d   : > { %5444 = vmatmul.bf16.gmra.mxu1 %v8736_v8 }
 0x34e   : > { %v4874_v39 = vmul.f32 %v9509_v35, %v4823_v9  ;;  %5533 = vmatmul.bf16.gmra.mxu2 %v9210_v10  ;;  %v2045_v10 = vsel %vm8602_vm5, %v2043_v45, %v2044_v15  ;;  %v2051_v45 = vrot.slane %v7872_v28, 5 }
 0x34f   : > { %5622 = vmatmul.bf16.gmra.mxu3 %v5050_v13  ;;  %v5023_v60 = vunpack.c.l.b16 %v2045_v10  ;;  %v2048_v13 = vrot.slane %v7871_v59, 5 }
 0x350   : > { %v4906_v33 = vadd.f32 %v9541_v24, %v4874_v39  ;;  %v6182_v39 = vrot.slane %v6166_v54, 9 }
 0x351   : > { %v4736_v61 = vpop.f32.mrf.mxu2  ;;  %v4560_v0 = vpop.f32.mrf.mxu0  ;;  %v5051_v38 = vpack.c.b16 %v5023_v60, %v5022_v11 }
 0x352   : > { %v4825_v29 = vpop.f32.mrf.mxu3  ;;  %v4938_v56 = vmax.f32 %v4906_v33, 0.0  ;;  %v4737_v8 = vadd.f32 %v4736_v61, %v4648_v37  ;;  %v4649_v3 = vpop.f32.mrf.mxu1  ;;  %v2050_v37 = vrot.slane %v2048_v13, 4 }
 0x353   : > { %v4650_v58 = vadd.f32 %v4649_v3, %v4560_v0 }
 0x354   : > { %v7573_v4 = vpack.c.bf16 %v4938_v56, %v4937_v18  ;;  %v4826_v34 = vadd.f32 %v4825_v29, %v4737_v8  ;;  %v2049_v56 = vsel %vm8602_vm5, %v6182_v39, %v2048_v13 }
 0x355   : > { %v5024_v3 = vunpack.c.l.b16 %v2049_v56 }
 0x356   : > { %7725 = vst [vmem:[%s8430_s12 + $0x148] sm:$0xff] %v7573_v4   ;;  %v4875_v23 = vmul.f32 %v9509_v35, %v4826_v34 }
 0x358   : > { %v4907_v9 = vadd.f32 %v9541_v24, %v4875_v23  ;;  %v7873_v23 = vld [vmem:[%s8007_s25 + $0x58] sm:$0xf] }
 0x359   : > { %v4738_v47 = vpop.f32.mrf.mxu2  ;;  %v4563_v49 = vpop.f32.mrf.mxu0 }
 0x35a   : > { %v4827_v40 = vpop.f32.mrf.mxu3  ;;  %v4739_v1 = vadd.f32 %v4738_v47, %v4650_v58  ;;  %v4652_v17 = vpop.f32.mrf.mxu1 }
 0x35b   : > { %v4653_v57 = vadd.f32 %v4652_v17, %v4563_v49  ;;  %v6167_v17 = vld [vmem:[%s8007_s25 + $0x54] sm:$0xe] }
 0x35c   : > { %v4828_v16 = vadd.f32 %v4827_v40, %v4739_v1  ;;  %5360 = vmatmul.bf16.gmra.mxu0 %v8204_v2  ;;  %v4939_v2 = vmax.f32 %v4907_v9, 0.0  ;;  %v2055_v1 = vrot.slane %v7873_v23, 5  ;;  %v7874_v9 = vld [vmem:[%s8007_s25 + $0x5c] sm:$0x1] }
 0x35d   : > { %5449 = vmatmul.bf16.gmra.mxu1 %v8766_v6 }
 0x35e   : > { %v4876_v12 = vmul.f32 %v9509_v35, %v4828_v16  ;;  %5538 = vmatmul.bf16.gmra.mxu2 %v9234_v30  ;;  %v2052_v30 = vsel %vm8602_vm5, %v2050_v37, %v2051_v45  ;;  %v6183_v16 = vrot.slane %v6167_v17, 9  ;;  %v2057_v54 = vrot.slane %v2055_v1, 4 }
 0x35f   : > { %5627 = vmatmul.bf16.gmra.mxu3 %v5051_v38  ;;  %v5025_v32 = vunpack.c.l.b16 %v2052_v30 }
 0x360   : > { %v4908_v41 = vadd.f32 %v9541_v24, %v4876_v12  ;;  %v2058_v12 = vrot.slane %v7874_v9, 5 }
 0x361   : > { %v4741_v15 = vpop.f32.mrf.mxu2  ;;  %v4565_v29 = vpop.f32.mrf.mxu0  ;;  %v5052_v40 = vpack.c.b16 %v5025_v32, %v5024_v3 }
 0x362   : > { %v4830_v33 = vpop.f32.mrf.mxu3  ;;  %v4940_v61 = vmax.f32 %v4908_v41, 0.0  ;;  %v4742_v6 = vadd.f32 %v4741_v15, %v4653_v57  ;;  %v4654_v18 = vpop.f32.mrf.mxu1  ;;  %v2056_v15 = vsel %vm8602_vm5, %v6183_v16, %v2055_v1  ;;  %v7876_v1 = vld [vmem:[%s8007_s25 + $0x68] sm:$0x1] }
 0x363   : > { %v4655_v10 = vadd.f32 %v4654_v18, %v4565_v29 }
 0x364   : > { %v7578_v8 = vpack.c.bf16 %v4940_v61, %v4939_v2  ;;  %v4831_v0 = vadd.f32 %v4830_v33, %v4742_v6  ;;  %v5026_v61 = vunpack.c.l.b16 %v2056_v15 }
 0x366   : > { %7726 = vst [vmem:[%s8430_s12 + $0x150] sm:$0xff] %v7578_v8   ;;  %v4877_v11 = vmul.f32 %v9509_v35, %v4831_v0 }
 0x368   : > { %v4909_v38 = vadd.f32 %v9541_v24, %v4877_v11  ;;  %v6168_v11 = vld [vmem:[%s8007_s25 + $0x60] sm:$0xe] }
 0x369   : > { %v4743_v4 = vpop.f32.mrf.mxu2  ;;  %v4568_v58 = vpop.f32.mrf.mxu0 }
 0x36a   : > { %v4832_v34 = vpop.f32.mrf.mxu3  ;;  %v4744_v60 = vadd.f32 %v4743_v4, %v4655_v10  ;;  %v4657_v47 = vpop.f32.mrf.mxu1  ;;  %v7875_v10 = vld [vmem:[%s8007_s25 + $0x64] sm:$0xf] }
 0x36b   : > { %v4658_v13 = vadd.f32 %v4657_v47, %v4568_v58  ;;  %v2062_v4 = vrot.slane %v7875_v10, 5 }
 0x36c   : > { %v4833_v49 = vadd.f32 %v4832_v34, %v4744_v60  ;;  %5365 = vmatmul.bf16.gmra.mxu0 %v8227_v62  ;;  %v4941_v62 = vmax.f32 %v4909_v38, 0.0 }
 0x36d   : > { %5454 = vmatmul.bf16.gmra.mxu1 %v8796_v21  ;;  %v2064_v23 = vrot.slane %v2062_v4, 4 }
 0x36e   : > { %v4878_v59 = vmul.f32 %v9509_v35, %v4833_v49  ;;  %5543 = vmatmul.bf16.gmra.mxu2 %v9258_v22  ;;  %v2059_v22 = vsel %vm8602_vm5, %v2057_v54, %v2058_v12  ;;  %v2065_v49 = vrot.slane %v7876_v1, 5 }
 0x36f   : > { %5632 = vmatmul.bf16.gmra.mxu3 %v5052_v40  ;;  %v5027_v6 = vunpack.c.l.b16 %v2059_v22  ;;  %v6184_v40 = vrot.slane %v6168_v11, 9 }
 0x370   : > { %v4910_v57 = vadd.f32 %v9541_v24, %v4878_v59 }
 0x371   : > { %v4746_v39 = vpop.f32.mrf.mxu2  ;;  %v4570_v45 = vpop.f32.mrf.mxu0  ;;  %v5053_v32 = vpack.c.b16 %v5027_v6, %v5026_v61  ;;  %v2063_v9 = vsel %vm8602_vm5, %v6184_v40, %v2062_v4 }
 0x372   : > { %v4835_v37 = vpop.f32.mrf.mxu3  ;;  %v4942_v28 = vmax.f32 %v4910_v57, 0.0  ;;  %v4747_v21 = vadd.f32 %v4746_v39, %v4658_v13  ;;  %v4659_v41 = vpop.f32.mrf.mxu1  ;;  %v5028_v39 = vunpack.c.l.b16 %v2063_v9  ;;  %v7879_v9 = vld [vmem:[%s8007_s25 + $0x7c] sm:$0xf] }
 0x373   : > { %v4660_v29 = vadd.f32 %v4659_v41, %v4570_v45 }
 0x374   : > { %v7583_v33 = vpack.c.bf16 %v4942_v28, %v4941_v62  ;;  %v4836_v2 = vadd.f32 %v4835_v37, %v4747_v21 }
 0x376   : > { %7727 = vst [vmem:[%s8430_s12 + $0x158] sm:$0xff] %v7583_v33   ;;  %v4879_v30 = vmul.f32 %v9509_v35, %v4836_v2  ;;  %v7877_v2 = vld [vmem:[%s8007_s25 + $0x70] sm:$0xf] }
 0x377   : > { %v2069_v61 = vrot.slane %v7877_v2, 5 }
 0x378   : > { %v4911_v60 = vadd.f32 %v9541_v24, %v4879_v30 }
 0x379   : > { %v4748_v18 = vpop.f32.mrf.mxu2  ;;  %v4573_v0 = vpop.f32.mrf.mxu0 }
 0x37a   : > { %v4837_v56 = vpop.f32.mrf.mxu3  ;;  %v4749_v8 = vadd.f32 %v4748_v18, %v4660_v29  ;;  %v4662_v3 = vpop.f32.mrf.mxu1  ;;  %v6169_v29 = vld [vmem:[%s8007_s25 + $0x6c] sm:$0xe] }
 0x37b   : > { %v4663_v47 = vadd.f32 %v4662_v3, %v4573_v0  ;;  %v2071_v0 = vrot.slane %v2069_v61, 4  ;;  %v7878_v3 = vld [vmem:[%s8007_s25 + $0x74] sm:$0x1] }
 0x37c   : > { %v4838_v34 = vadd.f32 %v4837_v56, %v4749_v8  ;;  %5370 = vmatmul.bf16.gmra.mxu0 %v8260_v50  ;;  %v4943_v50 = vmax.f32 %v4911_v60, 0.0  ;;  %v6185_v8 = vrot.slane %v6169_v29, 9 }
 0x37d   : > { %5459 = vmatmul.bf16.gmra.mxu1 %v8826_v7 }
 0x37e   : > { %v4880_v58 = vmul.f32 %v9509_v35, %v4838_v34  ;;  %5548 = vmatmul.bf16.gmra.mxu2 %v9287_v26  ;;  %v2066_v26 = vsel %vm8602_vm5, %v2064_v23, %v2065_v49 }
 0x37f   : > { %5637 = vmatmul.bf16.gmra.mxu3 %v5053_v32  ;;  %v5029_v37 = vunpack.c.l.b16 %v2066_v26  ;;  %v2072_v32 = vrot.slane %v7878_v3, 5  ;;  %v2076_v26 = vrot.slane %v7879_v9, 5 }
 0x380   : > { %v4912_v17 = vadd.f32 %v9541_v24, %v4880_v58 }
 0x381   : > { %v4751_v38 = vpop.f32.mrf.mxu2  ;;  %v4575_v16 = vpop.f32.mrf.mxu0  ;;  %v5054_v33 = vpack.c.b16 %v5029_v37, %v5028_v39 }
 0x382   : > { %v4840_v59 = vpop.f32.mrf.mxu3  ;;  %v4944_v13 = vmax.f32 %v4912_v17, 0.0  ;;  %v4752_v7 = vadd.f32 %v4751_v38, %v4663_v47  ;;  %v4664_v54 = vpop.f32.mrf.mxu1  ;;  %v2070_v47 = vsel %vm8602_vm5, %v6185_v8, %v2069_v61 }
 0x383   : > { %v4665_v62 = vadd.f32 %v4664_v54, %v4575_v16  ;;  %v5030_v1 = vunpack.c.l.b16 %v2070_v47  ;;  %v6171_v47 = vld [vmem:[%s8007_s25 + $0x84] sm:$0xe] }
 0x384   : > { %v7588_v12 = vpack.c.bf16 %v4944_v13, %v4943_v50  ;;  %v4841_v57 = vadd.f32 %v4840_v59, %v4752_v7 }
 0x386   : > { %7728 = vst [vmem:[%s8430_s12 + $0x160] sm:$0xff] %v7588_v12   ;;  %v4881_v45 = vmul.f32 %v9509_v35, %v4841_v57  ;;  %v6170_v57 = vld [vmem:[%s8007_s25 + $0x78] sm:$0xe] }
 0x388   : > { %v4913_v18 = vadd.f32 %v9541_v24, %v4881_v45  ;;  %v7880_v45 = vld [vmem:[%s8007_s25 + $0x80] sm:$0x1] }
 0x389   : > { %v4753_v28 = vpop.f32.mrf.mxu2  ;;  %v4578_v15 = vpop.f32.mrf.mxu0 }
 0x38a   : > { %v4842_v21 = vpop.f32.mrf.mxu3  ;;  %v4754_v41 = vadd.f32 %v4753_v28, %v4665_v62  ;;  %v4667_v22 = vpop.f32.mrf.mxu1  ;;  %v6186_v28 = vrot.slane %v6170_v57, 9 }
 0x38b   : > { %v4668_v30 = vadd.f32 %v4667_v22, %v4578_v15 }
 0x38c   : > { %v4843_v6 = vadd.f32 %v4842_v21, %v4754_v41  ;;  %5375 = vmatmul.bf16.gmra.mxu0 %v8283_v52  ;;  %v4945_v52 = vmax.f32 %v4913_v18, 0.0  ;;  %v2078_v21 = vrot.slane %v2076_v26, 4  ;;  %v2079_v41 = vrot.slane %v7880_v45, 5 }
 0x38d   : > { %5464 = vmatmul.bf16.gmra.mxu1 %v8856_v27  ;;  %v2077_v29 = vsel %vm8602_vm5, %v6186_v28, %v2076_v26 }
 0x38e   : > { %v4882_v56 = vmul.f32 %v9509_v35, %v4843_v6  ;;  %5553 = vmatmul.bf16.gmra.mxu2 %v9316_v42  ;;  %v2073_v42 = vsel %vm8602_vm5, %v2071_v0, %v2072_v32 }
 0x38f   : > { %5642 = vmatmul.bf16.gmra.mxu3 %v5054_v33  ;;  %v5031_v49 = vunpack.c.l.b16 %v2073_v42  ;;  %v9893_v42 = vld [vmem:[#allocation7_spill] sm:$0xff] }
 0x390   : > { %v4914_v10 = vadd.f32 %v9541_v24, %v4882_v56 }
 0x391   : > { %v4756_v4 = vpop.f32.mrf.mxu2  ;;  %v4580_v60 = vpop.f32.mrf.mxu0  ;;  %v5055_v54 = vpack.c.b16 %v5031_v49, %v5030_v1  ;;  %v6187_v49 = vrot.slane %v6171_v47, 9 }
 0x392   : > { %v4845_v34 = vpop.f32.mrf.mxu3  ;;  %v4946_v11 = vmax.f32 %v4914_v10, 0.0  ;;  %v4757_v27 = vadd.f32 %v4756_v4, %v4668_v30  ;;  %v4669_v58 = vpop.f32.mrf.mxu1  ;;  %v5032_v30 = vunpack.c.l.b16 %v2077_v29  ;;  %v9894_v29 = vld [vmem:[#allocation2_spill] sm:$0xff] }
 0x393   : > { %v4670_v17 = vadd.f32 %v4669_v58, %v4580_v60 }
 0x394   : > { %v7593_v40 = vpack.c.bf16 %v4946_v11, %v4945_v52  ;;  %v4846_v23 = vadd.f32 %v4845_v34, %v4757_v27  ;;  %v7881_v27 = vld [vmem:[%s8007_s25 + $0x88] sm:$0xf] }
 0x395   : > { %v2083_v60 = vrot.slane %v7881_v27, 5 }
 0x396   : > { %7729 = vst [vmem:[%s8430_s12 + $0x168] sm:$0xff] %v7593_v40   ;;  %v4883_v50 = vmul.f32 %v9509_v35, %v4846_v23 }
 0x398   : > { %v4915_v39 = vadd.f32 %v9541_v24, %v4883_v50 }
 0x399   : > { %v4758_v38 = vpop.f32.mrf.mxu2  ;;  %v4583_v7 = vpop.f32.mrf.mxu0 }
 0x39a   : > { %v4847_v59 = vpop.f32.mrf.mxu3  ;;  %v4759_v13 = vadd.f32 %v4758_v38, %v4670_v17  ;;  %v4672_v16 = vpop.f32.mrf.mxu1  ;;  %v2085_v17 = vrot.slane %v2083_v60, 4  ;;  %v7882_v38 = vld [vmem:[%s8007_s25 + $0x8c] sm:$0x1] }
 0x39b   : > { %v4673_v62 = vadd.f32 %v4672_v16, %v4583_v7 }
 0x39c   : > { %v4848_v12 = vadd.f32 %v4847_v59, %v4759_v13  ;;  %5380 = vmatmul.bf16.gmra.mxu0 %v8311_v43  ;;  %v4947_v43 = vmax.f32 %v4915_v39, 0.0  ;;  %v2086_v59 = vrot.slane %v7882_v38, 5 }
 0x39d   : > { %5469 = vmatmul.bf16.gmra.mxu1 %v8886_v55 }
 0x39e   : > { %v4884_v37 = vmul.f32 %v9509_v35, %v4848_v12  ;;  %5558 = vmatmul.bf16.gmra.mxu2 %v9340_v14  ;;  %v2080_v14 = vsel %vm8602_vm5, %v2078_v21, %v2079_v41  ;;  %v2084_v12 = vsel %vm8602_vm5, %v6187_v49, %v2083_v60 }
 0x39f   : > { %5647 = vmatmul.bf16.gmra.mxu3 %v5055_v54  ;;  %v5033_v8 = vunpack.c.l.b16 %v2080_v14  ;;  %v9895_v14 = vld [vmem:[#allocation8_spill] sm:$0xff] }
 0x3a0   : > { %v4916_v15 = vadd.f32 %v9541_v24, %v4884_v37  ;;  %v5034_v37 = vunpack.c.l.b16 %v2084_v12 }
 0x3a1   : > { %v4761_v22 = vpop.f32.mrf.mxu2  ;;  %v4585_v61 = vpop.f32.mrf.mxu0  ;;  %v5056_v11 = vpack.c.b16 %v5033_v8, %v5032_v30  ;;  %v9896_v8 = vld [vmem:[#allocation12_spill] sm:$0xff] }
 0x3a2   : > { %v4850_v33 = vpop.f32.mrf.mxu3  ;;  %v4948_v2 = vmax.f32 %v4916_v15, 0.0  ;;  %v4762_v55 = vadd.f32 %v4761_v22, %v4673_v62  ;;  %v4674_v6 = vpop.f32.mrf.mxu1 }
 0x3a3   : > { %v4675_v0 = vadd.f32 %v4674_v6, %v4585_v61  ;;  %v6172_v6 = vld [vmem:[%s8007_s25 + $0x90] sm:$0xe] }
 0x3a4   : > { %v7598_v18 = vpack.c.bf16 %v4948_v2, %v4947_v43  ;;  %v4851_v56 = vadd.f32 %v4850_v33, %v4762_v55  ;;  %v7883_v2 = vld [vmem:[%s8007_s25 + $0x94] sm:$0xf] }
 0x3a5   : > { %v2090_v55 = vrot.slane %v7883_v2, 5 }
 0x3a6   : > { %7730 = vst [vmem:[%s8430_s12 + $0x170] sm:$0xff] %v7598_v18   ;;  %v4885_v10 = vmul.f32 %v9509_v35, %v4851_v56 }
 0x3a8   : > { %v4917_v40 = vadd.f32 %v9541_v24, %v4885_v10 }
 0x3a9   : > { %v4763_v3 = vpop.f32.mrf.mxu2  ;;  %v5346_v34 = vpop.f32.mrf.mxu0 }
 0x3aa   : > { %v4852_v32 = vpop.f32.mrf.mxu3  ;;  %v4764_v4 = vadd.f32 %v4763_v3, %v4675_v0  ;;  %v5435_v52 = vpop.f32.mrf.mxu1  ;;  %v6188_v0 = vrot.slane %v6172_v6, 9  ;;  %v2092_v3 = vrot.slane %v2090_v55, 4 }
 0x3ab   : > { %v5436_v1 = vadd.f32 %v5435_v52, %v5346_v34 }
 0x3ac   : > { %v4853_v58 = vadd.f32 %v4852_v32, %v4764_v4  ;;  %5385 = vmatmul.bf16.gmra.mxu0 %v8339_v44  ;;  %v4949_v44 = vmax.f32 %v4917_v40, 0.0  ;;  %v7884_v32 = vld [vmem:[%s8007_s25 + $0x98] sm:$0x1] }
 0x3ad   : > { %5474 = vmatmul.bf16.gmra.mxu1 %v9893_v42  ;;  %v2093_v10 = vrot.slane %v7884_v32, 5  ;;  %v2091_v42 = vsel %vm8602_vm5, %v6188_v0, %v2090_v55 }
 0x3ae   : > { %v4886_v23 = vmul.f32 %v9509_v35, %v4853_v58  ;;  %5563 = vmatmul.bf16.gmra.mxu2 %v9364_v5  ;;  %v2087_v5 = vsel %vm8602_vm5, %v2085_v17, %v2086_v59  ;;  %v5036_v49 = vunpack.c.l.b16 %v2091_v42 }
 0x3af   : > { %5652 = vmatmul.bf16.gmra.mxu3 %v5056_v11  ;;  %v5035_v62 = vunpack.c.l.b16 %v2087_v5  ;;  %v2094_v40 = vsel %vm8602_vm5, %v2092_v3, %v2093_v10  ;;  %v6173_v5 = vld [vmem:[%s8007_s25 + $0x9c] sm:$0xe] }
 0x3b0   : > { %v4918_v50 = vadd.f32 %v9541_v24, %v4886_v23  ;;  %v5037_v17 = vunpack.c.l.b16 %v2094_v40 }
 0x3b1   : > { %v5524_v13 = vpop.f32.mrf.mxu2  ;;  %v5348_v9 = vpop.f32.mrf.mxu0  ;;  %v5057_v43 = vpack.c.b16 %v5035_v62, %v5034_v37 }
 0x3b2   : > { %v5613_v7 = vpop.f32.mrf.mxu3  ;;  %v4950_v16 = vmax.f32 %v4918_v50, 0.0  ;;  %v5525_v54 = vadd.f32 %v5524_v13, %v5436_v1  ;;  %v5437_v26 = vpop.f32.mrf.mxu1 }
 0x3b3   : > { %v5438_v28 = vadd.f32 %v5437_v26, %v5348_v9  ;;  %v7885_v9 = vld [vmem:[%s8007_s25 + $0xa0] sm:$0xf] }
 0x3b4   : > { %v7603_v57 = vpack.c.bf16 %v4950_v16, %v4949_v44  ;;  %v5614_v39 = vadd.f32 %v5613_v7, %v5525_v54  ;;  %v5058_v54 = vpack.c.b16 %v5037_v17, %v5036_v49  ;;  %v2097_v26 = vrot.slane %v7885_v9, 5 }
 0x3b6   : > { %7731 = vst [vmem:[%s8430_s12 + $0x178] sm:$0xff] %v7603_v57   ;;  %v5693_v41 = vmul.f32 %v9509_v35, %v5614_v39  ;;  %v9897_v57 = vld [vmem:[#allocation9_spill] sm:$0xff] }
 0x3b8   : > { %v5725_v18 = vadd.f32 %v9541_v24, %v5693_v41 }
 0x3b9   : > { %v5526_v21 = vpop.f32.mrf.mxu2  ;;  %v5351_v22 = vpop.f32.mrf.mxu0 }
 0x3ba   : > { %v5615_v45 = vpop.f32.mrf.mxu3  ;;  %v5527_v15 = vadd.f32 %v5526_v21, %v5438_v28  ;;  %v5440_v33 = vpop.f32.mrf.mxu1  ;;  %v5757_v11 = vmax.f32 %v5725_v18, 0.0  ;;  %v6189_v28 = vrot.slane %v6173_v5, 9  ;;  %v2099_v21 = vrot.slane %v2097_v26, 4 }
 0x3bb   : > { %v5441_v30 = vadd.f32 %v5440_v33, %v5351_v22 }
 0x3bc   : > { %v5616_v61 = vadd.f32 %v5615_v45, %v5527_v15  ;;  %5390 = vmatmul.bf16.gmra.mxu0 %v9894_v29  ;;  %v7886_v45 = vld [vmem:[%s8007_s25 + $0xa4] sm:$0x1]  ;;  %v2098_v6 = vsel %vm8602_vm5, %v6189_v28, %v2097_v26 }
 0x3bd   : > { %5479 = vmatmul.bf16.gmra.mxu1 %v9895_v14  ;;  %v2100_v41 = vrot.slane %v7886_v45, 5  ;;  %v5038_v18 = vunpack.c.l.b16 %v2098_v6  ;;  %v9901_v6 = vld [vmem:[#allocation11_spill] sm:$0xff] }
 0x3be   : > { %v5694_v56 = vmul.f32 %v9509_v35, %v5616_v61  ;;  %5568 = vmatmul.bf16.gmra.mxu2 %v9896_v8 }
 0x3bf   : > { %5657 = vmatmul.bf16.gmra.mxu3 %v5057_v43 }
 0x3c0   : > { %v5726_v4 = vadd.f32 %v9541_v24, %v5694_v56 }
 0x3c1   : > { %v5529_v34 = vpop.f32.mrf.mxu2  ;;  %v5353_v58 = vpop.f32.mrf.mxu0 }
 0x3c2   : > { %v5618_v52 = vpop.f32.mrf.mxu3  ;;  %v5758_v27 = vmax.f32 %v5726_v4, 0.0  ;;  %v5530_v60 = vadd.f32 %v5529_v34, %v5441_v30  ;;  %v5442_v47 = vpop.f32.mrf.mxu1 }
 0x3c3   : > { %v5443_v38 = vadd.f32 %v5442_v47, %v5353_v58  ;;  %v9898_v58 = vld [vmem:[#allocation3_spill] sm:$0xff]  ;;  %v9899_v47 = vld [vmem:[#allocation10_spill] sm:$0xff] }
 0x3c4   : > { %v7608_v23 = vpack.c.bf16 %v5758_v27, %v5757_v11  ;;  %v5619_v1 = vadd.f32 %v5618_v52, %v5530_v60  ;;  %v7887_v52 = vld [vmem:[%s8007_s25 + $0xac] sm:$0xf]  ;;  %v6174_v60 = vld [vmem:[%s8007_s25 + $0xa8] sm:$0xe] }
 0x3c5   : > { %v2104_v11 = vrot.slane %v7887_v52, 5  ;;  %v6190_v49 = vrot.slane %v6174_v60, 9 }
 0x3c6   : > { %7732 = vst [vmem:[%s8430_s12 + $0x180] sm:$0xff] %v7608_v23   ;;  %v5695_v13 = vmul.f32 %v9509_v35, %v5619_v1  ;;  %v9900_v1 = vld [vmem:[#allocation13_spill] sm:$0xff] }
 0x3c7   : > { %v2106_v17 = vrot.slane %v2104_v11, 4 }
 0x3c8   : > { %v5727_v39 = vadd.f32 %v9541_v24, %v5695_v13 }
 0x3c9   : > { %v5531_v59 = vpop.f32.mrf.mxu2  ;;  %v5356_v44 = vpop.f32.mrf.mxu0 }
 0x3ca   : > { %v5620_v50 = vpop.f32.mrf.mxu3  ;;  %v5532_v7 = vadd.f32 %v5531_v59, %v5443_v38  ;;  %v5445_v16 = vpop.f32.mrf.mxu1  ;;  %v7888_v38 = vld [vmem:[%s8007_s25 + $0xb0] sm:$0x1] }
 0x3cb   : > { %v5446_v62 = vadd.f32 %v5445_v16, %v5356_v44  ;;  %v2107_v59 = vrot.slane %v7888_v38, 5 }
 0x3cc   : > { %v5621_v12 = vadd.f32 %v5620_v50, %v5532_v7  ;;  %5395 = vmatmul.bf16.gmra.mxu0 %v8439_v51  ;;  %v5759_v51 = vmax.f32 %v5727_v39, 0.0 }
 0x3cd   : > { %5484 = vmatmul.bf16.gmra.mxu1 %v9897_v57  ;;  %v2108_v5 = vsel %vm8602_vm5, %v2106_v17, %v2107_v59 }
 0x3ce   : > { %v5696_v37 = vmul.f32 %v9509_v35, %v5621_v12  ;;  %5573 = vmatmul.bf16.gmra.mxu2 %v9412_v53  ;;  %v2101_v53 = vsel %vm8602_vm5, %v2099_v21, %v2100_v41  ;;  %v2105_v12 = vsel %vm8602_vm5, %v6190_v49, %v2104_v11 }
 0x3cf   : > { %5662 = vmatmul.bf16.gmra.mxu3 %v5058_v54  ;;  %v5039_v56 = vunpack.c.l.b16 %v2101_v53 }
 0x3d0   : > { %v5728_v15 = vadd.f32 %v9541_v24, %v5696_v37  ;;  %v5040_v37 = vunpack.c.l.b16 %v2105_v12  ;;  %v9903_v12 = vld [vmem:[#allocation14_spill] sm:$0xff] }
 0x3d1   : > { %v5534_v22 = vpop.f32.mrf.mxu2  ;;  %v5358_v55 = vpop.f32.mrf.mxu0  ;;  %v5059_v34 = vpack.c.b16 %v5039_v56, %v5038_v18 }
 0x3d2   : > { %v5623_v33 = vpop.f32.mrf.mxu3  ;;  %v5760_v43 = vmax.f32 %v5728_v15, 0.0  ;;  %v5535_v2 = vadd.f32 %v5534_v22, %v5446_v62  ;;  %v5447_v61 = vpop.f32.mrf.mxu1  ;;  %v5041_v62 = vunpack.c.l.b16 %v2108_v5 }
 0x3d3   : > { %v5448_v30 = vadd.f32 %v5447_v61, %v5358_v55  ;;  %v6175_v61 = vld [vmem:[%s8007_s25 + $0xb4] sm:$0xe] }
 0x3d4   : > { %v7613_v29 = vpack.c.bf16 %v5760_v43, %v5759_v51  ;;  %v5624_v14 = vadd.f32 %v5623_v33, %v5535_v2  ;;  %v5060_v51 = vpack.c.b16 %v5041_v62, %v5040_v37  ;;  %v7889_v43 = vld [vmem:[%s8007_s25 + $0xb8] sm:$0xf]  ;;  %v6191_v18 = vrot.slane %v6175_v61, 9 }
 0x3d5   : > { %v2111_v2 = vrot.slane %v7889_v43, 5 }
 0x3d6   : > { %7733 = vst [vmem:[%s8430_s12 + $0x188] sm:$0xff] %v7613_v29   ;;  %v5697_v3 = vmul.f32 %v9509_v35, %v5624_v14  ;;  %v9738_v29 = vld [vmem:[%s9848_s2] ss:$0 sm:$0xff] }
 0x3d7   : > { %v2113_v56 = vrot.slane %v2111_v2, 4  ;;  %v2112_v11 = vsel %vm8602_vm5, %v6191_v18, %v2111_v2 }
 0x3d8   : > { %v5729_v42 = vadd.f32 %v9541_v24, %v5697_v3 }
 0x3d9   : > { %v5536_v8 = vpop.f32.mrf.mxu2  ;;  %v5361_v10 = vpop.f32.mrf.mxu0 }
 0x3da   : > { %v5625_v0 = vpop.f32.mrf.mxu3  ;;  %v5537_v32 = vadd.f32 %v5536_v8, %v5448_v30  ;;  %v5450_v4 = vpop.f32.mrf.mxu1  ;;  %v5761_v44 = vmax.f32 %v5729_v42, 0.0  ;;  %v7891_v30 = vld [vmem:[%s8007_s25 + $0xbc] sm:$0x1] }
 0x3db   : > { %v5451_v23 = vadd.f32 %v5450_v4, %v5361_v10 }
 0x3dc   : > { %v5626_v27 = vadd.f32 %v5625_v0, %v5537_v32  ;;  %5400 = vmatmul.bf16.gmra.mxu0 %v9898_v58  ;;  %v5042_v58 = vunpack.c.l.b16 %v2112_v11 }
 0x3dd   : > { %5489 = vmatmul.bf16.gmra.mxu1 %v9899_v47 }
 0x3de   : > { %v5698_v40 = vmul.f32 %v9509_v35, %v5626_v27  ;;  %5578 = vmatmul.bf16.gmra.mxu2 %v9900_v1 }
 0x3df   : > { %5667 = vmatmul.bf16.gmra.mxu3 %v5059_v34 }
 0x3e0   : > { %v5730_v50 = vadd.f32 %v9541_v24, %v5698_v40 }
 0x3e1   : > { %v5539_v13 = vpop.f32.mrf.mxu2  ;;  %v5363_v9 = vpop.f32.mrf.mxu0 }
 0x3e2   : > { %v5628_v7 = vpop.f32.mrf.mxu3  ;;  %v5762_v16 = vmax.f32 %v5730_v50, 0.0  ;;  %v5540_v54 = vadd.f32 %v5539_v13, %v5451_v23  ;;  %v5452_v26 = vpop.f32.mrf.mxu1  ;;  %v7892_v50 = vld [vmem:[%s8007_s25 + $0xc4] sm:$0xf] }
 0x3e3   : > { %v5453_v28 = vadd.f32 %v5452_v26, %v5363_v9  ;;  %v2118_v13 = vrot.slane %v7892_v50, 5 }
 0x3e4   : > { %v7618_v57 = vpack.c.bf16 %v5762_v16, %v5761_v44  ;;  %v5629_v39 = vadd.f32 %v5628_v7, %v5540_v54  ;;  %v6176_v44 = vld [vmem:[%s8007_s25 + $0xc0] sm:$0xe]  ;;  %v9902_v16 = vld [vmem:[#allocation4_spill] sm:$0xff] }
 0x3e5   : > { %v6192_v5 = vrot.slane %v6176_v44, 9 }
 0x3e6   : > { %7734 = vst [vmem:[%s8430_s12 + $0x190] sm:$0xff] %v7618_v57   ;;  %v5699_v41 = vmul.f32 %v9509_v35, %v5629_v39  ;;  %v2120_v57 = vrot.slane %v2118_v13, 4  ;;  %v7893_v39 = vld [vmem:[%s8007_s25 + $0xc8] sm:$0x1] }
 0x3e7   : > { %v2121_v37 = vrot.slane %v7893_v39, 5  ;;  %v9905_v39 = vld [vmem:[#allocation6_spill] sm:$0xff] }
 0x3e8   : > { %v5731_v53 = vadd.f32 %v9541_v24, %v5699_v41 }
 0x3e9   : > { %v5541_v21 = vpop.f32.mrf.mxu2  ;;  %v5366_v22 = vpop.f32.mrf.mxu0 }
 0x3ea   : > { %v5630_v45 = vpop.f32.mrf.mxu3  ;;  %v5542_v15 = vadd.f32 %v5541_v21, %v5453_v28  ;;  %v5455_v33 = vpop.f32.mrf.mxu1  ;;  %v5763_v32 = vmax.f32 %v5731_v53, 0.0 }
 0x3eb   : > { %v5456_v14 = vadd.f32 %v5455_v33, %v5366_v22  ;;  %v2119_v33 = vsel %vm8602_vm5, %v6192_v5, %v2118_v13 }
 0x3ec   : > { %v5631_v55 = vadd.f32 %v5630_v45, %v5542_v15  ;;  %5405 = vmatmul.bf16.gmra.mxu0 %v9884_v63  ;;  %v2114_v63 = vrot.slane %v7891_v30, 5 }
 0x3ed   : > { %5494 = vmatmul.bf16.gmra.mxu1 %v9901_v6 }
 0x3ee   : > { %v5700_v35 = vmul.f32 %v9738_v29, %v5631_v55  ;;  %5583 = vmatmul.bf16.gmra.mxu2 %v9460_v36  ;;  %v2115_v36 = vsel %vm8602_vm5, %v2113_v56, %v2114_v63  ;;  %v5044_v55 = vunpack.c.l.b16 %v2119_v33  ;;  %v7894_v63 = vld [vmem:[%s8007_s25 + $0xd0] sm:$0xf] }
 0x3ef   : > { %5672 = vmatmul.bf16.gmra.mxu3 %v5060_v51  ;;  %v5043_v47 = vunpack.c.l.b16 %v2115_v36  ;;  %v2122_v51 = vsel %vm8602_vm5, %v2120_v57, %v2121_v37 }
 0x3f0   : > { %v5732_v8 = vadd.f32 %v9541_v24, %v5700_v35 }
 0x3f1   : > { %v5544_v0 = vpop.f32.mrf.mxu2  ;;  %v5368_v34 = vpop.f32.mrf.mxu0  ;;  %v5061_v59 = vpack.c.b16 %v5043_v47, %v5042_v58 }
 0x3f2   : > { %v5633_v3 = vpop.f32.mrf.mxu3  ;;  %v5764_v10 = vmax.f32 %v5732_v8, 0.0  ;;  %v5545_v4 = vadd.f32 %v5544_v0, %v5456_v14  ;;  %v5457_v52 = vpop.f32.mrf.mxu1  ;;  %v2125_v8 = vrot.slane %v7894_v63, 5 }
 0x3f3   : > { %v5458_v42 = vadd.f32 %v5457_v52, %v5368_v34 }
 0x3f4   : > { %v7623_v27 = vpack.c.bf16 %v5764_v10, %v5763_v32  ;;  %v5634_v60 = vadd.f32 %v5633_v3, %v5545_v4  ;;  %v6177_v3 = vld [vmem:[%s8007_s25 + $0xcc] sm:$0xe]  ;;  %v9904_v32 = vld [vmem:[#allocation5_spill] sm:$0xff]  ;;  %v9772_v10 = vld [vmem:[%s9849_s3] ss:$0 sm:$0xff]  ;;  %v2127_v36 = vrot.slane %v2125_v8, 4 }
 0x3f5   : > { %v6193_v11 = vrot.slane %v6177_v3, 9 }
 0x3f6   : > { %7735 = vst [vmem:[%s8430_s12 + $0x198] sm:$0xff] %v7623_v27   ;;  %v5701_v1 = vmul.f32 %v9738_v29, %v5634_v60  ;;  %v7896_v27 = vld [vmem:[%s8007_s25 + $0xd4] sm:$0x1] }
 0x3f8   : > { %v5733_v54 = vadd.f32 %v9541_v24, %v5701_v1 }
 0x3f9   : > { %v5546_v40 = vpop.f32.mrf.mxu2  ;;  %v5371_v17 = vpop.f32.mrf.mxu0 }
 0x3fa   : > { %v5635_v23 = vpop.f32.mrf.mxu3  ;;  %v5547_v49 = vadd.f32 %v5546_v40, %v5458_v42  ;;  %v5460_v38 = vpop.f32.mrf.mxu1 }
 0x3fb   : > { %v5461_v26 = vadd.f32 %v5460_v38, %v5371_v17  ;;  %v2126_v17 = vsel %vm8602_vm5, %v6193_v11, %v2125_v8 }
 0x3fc   : > { %v5636_v7 = vadd.f32 %v5635_v23, %v5547_v49  ;;  %5410 = vmatmul.bf16.gmra.mxu0 %v9887_v25  ;;  %v5765_v25 = vmax.f32 %v5733_v54, 0.0  ;;  %v5046_v50 = vunpack.c.l.b16 %v2126_v17 }
 0x3fd   : > { %5499 = vmatmul.bf16.gmra.mxu1 %v9902_v16 }
 0x3fe   : > { %v5702_v9 = vmul.f32 %v9738_v29, %v5636_v7  ;;  %5588 = vmatmul.bf16.gmra.mxu2 %v9903_v12 }
 0x3ff   : > { %5677 = vmatmul.bf16.gmra.mxu3 %v5061_v59 }
 0x400   : > { %v5734_v62 = vadd.f32 %v9541_v24, %v5702_v9  ;;  %v5045_v24 = vunpack.c.l.b16 %v2122_v51 }
 0x401   : > { %v5549_v28 = vpop.f32.mrf.mxu2  ;;  %v5373_v15 = vpop.f32.mrf.mxu0 }
 0x402   : > { %v5638_v21 = vpop.f32.mrf.mxu3  ;;  %v5766_v45 = vmax.f32 %v5734_v62, 0.0  ;;  %v5550_v41 = vadd.f32 %v5549_v28, %v5461_v26  ;;  %v5462_v22 = vpop.f32.mrf.mxu1  ;;  %v5062_v30 = vpack.c.b16 %v5045_v24, %v5044_v55 }
 0x403   : > { %v5463_v61 = vadd.f32 %v5462_v22, %v5373_v15 }
 0x404   : > { %v7628_v43 = vpack.c.bf16 %v5766_v45, %v5765_v25  ;;  %v5639_v2 = vadd.f32 %v5638_v21, %v5550_v41 }
 0x406   : > { %7736 = vst [vmem:[%s8430_s12 + $0x1a0] sm:$0xff] %v7628_v43   ;;  %v5703_v35 = vmul.f32 %v9738_v29, %v5639_v2 }
 0x408   : > { %v5735_v4 = vadd.f32 %v9772_v10, %v5703_v35 }
 0x409   : > { %v5551_v6 = vpop.f32.mrf.mxu2  ;;  %v5376_v18 = vpop.f32.mrf.mxu0 }
 0x40a   : > { %v5640_v53 = vpop.f32.mrf.mxu3  ;;  %v5552_v14 = vadd.f32 %v5551_v6, %v5463_v61  ;;  %v5465_v56 = vpop.f32.mrf.mxu1  ;;  %v5767_v42 = vmax.f32 %v5735_v4, 0.0 }
 0x40b   : > { %v5466_v52 = vadd.f32 %v5465_v56, %v5376_v18 }
 0x40c   : > { %v5641_v0 = vadd.f32 %v5640_v53, %v5552_v14  ;;  %5415 = vmatmul.bf16.gmra.mxu0 %v8599_v19  ;;  %v2128_v19 = vrot.slane %v7896_v27, 5 }
 0x40d   : > { %5504 = vmatmul.bf16.gmra.mxu1 %v9904_v32 }
 0x40e   : > { %v5704_v34 = vmul.f32 %v9738_v29, %v5641_v0  ;;  %5593 = vmatmul.bf16.gmra.mxu2 %v9513_v46  ;;  %v2129_v46 = vsel %vm8602_vm5, %v2127_v36, %v2128_v19 }
 0x40f   : > { %5682 = vmatmul.bf16.gmra.mxu3 %v5062_v30  ;;  %v5047_v13 = vunpack.c.l.b16 %v2129_v46 }
 0x410   : > { %v5736_v60 = vadd.f32 %v9772_v10, %v5704_v34 }
 0x411   : > { %v5554_v58 = vpop.f32.mrf.mxu2  ;;  %v5378_v1 = vpop.f32.mrf.mxu0  ;;  %v5063_v5 = vpack.c.b16 %v5047_v13, %v5046_v50 }
 0x412   : > { %v5643_v47 = vpop.f32.mrf.mxu3  ;;  %v5768_v40 = vmax.f32 %v5736_v60, 0.0  ;;  %v5555_v23 = vadd.f32 %v5554_v58, %v5466_v52  ;;  %v5467_v49 = vpop.f32.mrf.mxu1 }
 0x413   : > { %v5468_v7 = vadd.f32 %v5467_v49, %v5378_v1 }
 0x414   : > { %v7633_v38 = vpack.c.bf16 %v5768_v40, %v5767_v42  ;;  %v5644_v59 = vadd.f32 %v5643_v47, %v5555_v23 }
 0x416   : > { %7737 = vst [vmem:[%s8430_s12 + $0x1a8] sm:$0xff] %v7633_v38   ;;  %v5705_v54 = vmul.f32 %v9738_v29, %v5644_v59 }
 0x418   : > { %v5737_v31 = vadd.f32 %v9772_v10, %v5705_v54 }
 0x419   : > { %v5556_v44 = vpop.f32.mrf.mxu2  ;;  %v5381_v26 = vpop.f32.mrf.mxu0 }
 0x41a   : > { %v5645_v16 = vpop.f32.mrf.mxu3  ;;  %v5557_v9 = vadd.f32 %v5556_v44, %v5468_v7  ;;  %v5470_v12 = vpop.f32.mrf.mxu1  ;;  %v5769_v45 = vmax.f32 %v5737_v31, 0.0 }
 0x41b   : > { %v5471_v62 = vadd.f32 %v5470_v12, %v5381_v26 }
 0x41c   : > { %v5646_v57 = vadd.f32 %v5645_v16, %v5557_v9  ;;  %5420 = vmatmul.bf16.gmra.mxu0 %v8642_v20 }
 0x41d   : > { %5509 = vmatmul.bf16.gmra.mxu1 %v9905_v39 }
 0x41e   : > { %v5706_v37 = vmul.f32 %v9738_v29, %v5646_v57  ;;  %5598 = vmatmul.bf16.gmra.mxu2 %v9528_v48 }
 0x41f   : > { %5687 = vmatmul.bf16.gmra.mxu3 %v5063_v5 }
 0x420   : > { %v5738_v28 = vadd.f32 %v9772_v10, %v5706_v37 }
 0x421   : > { %v5559_v21 = vpop.f32.mrf.mxu2  ;;  %v5383_v22 = vpop.f32.mrf.mxu0 }
 0x422   : > { %v5648_v25 = vpop.f32.mrf.mxu3  ;;  %v5770_v41 = vmax.f32 %v5738_v28, 0.0  ;;  %v5560_v15 = vadd.f32 %v5559_v21, %v5471_v62  ;;  %v5472_v20 = vpop.f32.mrf.mxu1 }
 0x423   : > { %v5473_v43 = vadd.f32 %v5472_v20, %v5383_v22 }
 0x424   : > { %v7638_v33 = vpack.c.bf16 %v5770_v41, %v5769_v45  ;;  %v5649_v51 = vadd.f32 %v5648_v25, %v5560_v15 }
 0x426   : > { %7738 = vst [vmem:[%s8430_s12 + $0x1b0] sm:$0xff] %v7638_v33   ;;  %v5707_v24 = vmul.f32 %v9738_v29, %v5649_v51 }
 0x428   : > { %v5739_v35 = vadd.f32 %v9772_v10, %v5707_v24 }
 0x429   : > { %v5561_v2 = vpop.f32.mrf.mxu2  ;;  %v5386_v48 = vpop.f32.mrf.mxu0 }
 0x42a   : > { %v5650_v55 = vpop.f32.mrf.mxu3  ;;  %v5562_v61 = vadd.f32 %v5561_v2, %v5473_v43  ;;  %v5475_v6 = vpop.f32.mrf.mxu1  ;;  %v5771_v8 = vmax.f32 %v5739_v35, 0.0 }
 0x42b   : > { %v5476_v18 = vadd.f32 %v5475_v6, %v5386_v48 }
 0x42c   : > { %v5651_v53 = vadd.f32 %v5650_v55, %v5562_v61 }
 0x42e   : > { %v5708_v14 = vmul.f32 %v9738_v29, %v5651_v53 }
 0x430   : > { %v5740_v56 = vadd.f32 %v9772_v10, %v5708_v14 }
 0x431   : > { %v5564_v30 = vpop.f32.mrf.mxu2  ;;  %v5388_v32 = vpop.f32.mrf.mxu0 }
 0x432   : > { %v5653_v63 = vpop.f32.mrf.mxu3  ;;  %v5772_v0 = vmax.f32 %v5740_v56, 0.0  ;;  %v5565_v3 = vadd.f32 %v5564_v30, %v5476_v18  ;;  %v5477_v4 = vpop.f32.mrf.mxu1 }
 0x433   : > { %v5478_v11 = vadd.f32 %v5477_v4, %v5388_v32 }
 0x434   : > { %v7643_v34 = vpack.c.bf16 %v5772_v0, %v5771_v8  ;;  %v5654_v52 = vadd.f32 %v5653_v63, %v5565_v3 }
 0x436   : > { %7739 = vst [vmem:[%s8430_s12 + $0x1b8] sm:$0xff] %v7643_v34   ;;  %v5709_v19 = vmul.f32 %v9738_v29, %v5654_v52 }
 0x438   : > { %v5741_v40 = vadd.f32 %v9772_v10, %v5709_v19 }
 0x439   : > { %v5566_v36 = vpop.f32.mrf.mxu2  ;;  %v5391_v58 = vpop.f32.mrf.mxu0 }
 0x43a   : > { %v5655_v27 = vpop.f32.mrf.mxu3  ;;  %v5567_v60 = vadd.f32 %v5566_v36, %v5478_v11  ;;  %v5480_v47 = vpop.f32.mrf.mxu1  ;;  %v5773_v38 = vmax.f32 %v5741_v40, 0.0 }
 0x43b   : > { %v5481_v1 = vadd.f32 %v5480_v47, %v5391_v58 }
 0x43c   : > { %v5656_v42 = vadd.f32 %v5655_v27, %v5567_v60 }
 0x43e   : > { %v5710_v23 = vmul.f32 %v9738_v29, %v5656_v42 }
 0x440   : > { %v5742_v49 = vadd.f32 %v9772_v10, %v5710_v23 }
 0x441   : > { %v5569_v17 = vpop.f32.mrf.mxu2  ;;  %v5393_v13 = vpop.f32.mrf.mxu0 }
 0x442   : > { %v5658_v46 = vpop.f32.mrf.mxu3  ;;  %v5774_v59 = vmax.f32 %v5742_v49, 0.0  ;;  %v5570_v50 = vadd.f32 %v5569_v17, %v5481_v1  ;;  %v5482_v7 = vpop.f32.mrf.mxu1 }
 0x443   : > { %v5483_v54 = vadd.f32 %v5482_v7, %v5393_v13 }
 0x444   : > { %v7648_v44 = vpack.c.bf16 %v5774_v59, %v5773_v38  ;;  %v5659_v16 = vadd.f32 %v5658_v46, %v5570_v50 }
 0x446   : > { %7740 = vst [vmem:[%s8430_s12 + $0x1c0] sm:$0xff] %v7648_v44   ;;  %v5711_v12 = vmul.f32 %v9738_v29, %v5659_v16 }
 0x448   : > { %v5743_v37 = vadd.f32 %v9772_v10, %v5711_v12 }
 0x449   : > { %v5571_v9 = vpop.f32.mrf.mxu2  ;;  %v5396_v57 = vpop.f32.mrf.mxu0 }
 0x44a   : > { %v5660_v26 = vpop.f32.mrf.mxu3  ;;  %v5572_v5 = vadd.f32 %v5571_v9, %v5483_v54  ;;  %v5485_v39 = vpop.f32.mrf.mxu1  ;;  %v5775_v41 = vmax.f32 %v5743_v37, 0.0 }
 0x44b   : > { %v5486_v28 = vadd.f32 %v5485_v39, %v5396_v57 }
 0x44c   : > { %v5661_v31 = vadd.f32 %v5660_v26, %v5572_v5 }
 0x44e   : > { %v5712_v62 = vmul.f32 %v9738_v29, %v5661_v31 }
 0x450   : > { %v5744_v21 = vadd.f32 %v9772_v10, %v5712_v62 }
 0x451   : > { %v5574_v25 = vpop.f32.mrf.mxu2  ;;  %v5398_v20 = vpop.f32.mrf.mxu0 }
 0x452   : > { %v5663_v45 = vpop.f32.mrf.mxu3  ;;  %v5776_v15 = vmax.f32 %v5744_v21, 0.0  ;;  %v5575_v22 = vadd.f32 %v5574_v25, %v5486_v28  ;;  %v5487_v33 = vpop.f32.mrf.mxu1 }
 0x453   : > { %v5488_v2 = vadd.f32 %v5487_v33, %v5398_v20 }
 0x454   : > { %v7653_v51 = vpack.c.bf16 %v5776_v15, %v5775_v41  ;;  %v5664_v43 = vadd.f32 %v5663_v45, %v5575_v22 }
 0x456   : > { %7741 = vst [vmem:[%s8430_s12 + $0x1c8] sm:$0xff] %v7653_v51   ;;  %v5713_v61 = vmul.f32 %v9738_v29, %v5664_v43 }
 0x458   : > { %v5745_v14 = vadd.f32 %v9772_v10, %v5713_v61 }
 0x459   : > { %v5576_v55 = vpop.f32.mrf.mxu2  ;;  %v5401_v6 = vpop.f32.mrf.mxu0 }
 0x45a   : > { %v5665_v24 = vpop.f32.mrf.mxu3  ;;  %v5577_v48 = vadd.f32 %v5576_v55, %v5488_v2  ;;  %v5490_v53 = vpop.f32.mrf.mxu1  ;;  %v5777_v0 = vmax.f32 %v5745_v14, 0.0 }
 0x45b   : > { %v5491_v56 = vadd.f32 %v5490_v53, %v5401_v6 }
 0x45c   : > { %v5666_v35 = vadd.f32 %v5665_v24, %v5577_v48 }
 0x45e   : > { %v5714_v18 = vmul.f32 %v9738_v29, %v5666_v35 }
 0x460   : > { %v5746_v30 = vadd.f32 %v9772_v10, %v5714_v18 }
 0x461   : > { %v5579_v63 = vpop.f32.mrf.mxu2  ;;  %v5403_v4 = vpop.f32.mrf.mxu0 }
 0x462   : > { %v5668_v8 = vpop.f32.mrf.mxu3  ;;  %v5778_v3 = vmax.f32 %v5746_v30, 0.0  ;;  %v5580_v32 = vadd.f32 %v5579_v63, %v5491_v56  ;;  %v5492_v34 = vpop.f32.mrf.mxu1 }
 0x463   : > { %v5493_v36 = vadd.f32 %v5492_v34, %v5403_v4 }
 0x464   : > { %v7658_v52 = vpack.c.bf16 %v5778_v3, %v5777_v0  ;;  %v5669_v11 = vadd.f32 %v5668_v8, %v5580_v32 }
 0x466   : > { %7742 = vst [vmem:[%s8430_s12 + $0x1d0] sm:$0xff] %v7658_v52   ;;  %v5715_v60 = vmul.f32 %v9738_v29, %v5669_v11 }
 0x468   : > { %v5747_v23 = vadd.f32 %v9772_v10, %v5715_v60 }
 0x469   : > { %v5581_v27 = vpop.f32.mrf.mxu2  ;;  %v5406_v47 = vpop.f32.mrf.mxu0 }
 0x46a   : > { %v5670_v19 = vpop.f32.mrf.mxu3  ;;  %v5582_v58 = vadd.f32 %v5581_v27, %v5493_v36  ;;  %v5495_v42 = vpop.f32.mrf.mxu1  ;;  %v5779_v59 = vmax.f32 %v5747_v23, 0.0 }
 0x46b   : > { %v5496_v49 = vadd.f32 %v5495_v42, %v5406_v47 }
 0x46c   : > { %v5671_v40 = vadd.f32 %v5670_v19, %v5582_v58 }
 0x46e   : > { %v5716_v1 = vmul.f32 %v9738_v29, %v5671_v40 }
 0x470   : > { %v5748_v17 = vadd.f32 %v9772_v10, %v5716_v1 }
 0x471   : > { %v5584_v46 = vpop.f32.mrf.mxu2  ;;  %v5408_v7 = vpop.f32.mrf.mxu0 }
 0x472   : > { %v5673_v38 = vpop.f32.mrf.mxu3  ;;  %v5780_v50 = vmax.f32 %v5748_v17, 0.0  ;;  %v5585_v13 = vadd.f32 %v5584_v46, %v5496_v49  ;;  %v5497_v44 = vpop.f32.mrf.mxu1 }
 0x473   : > { %v5498_v9 = vadd.f32 %v5497_v44, %v5408_v7 }
 0x474   : > { %v7663_v16 = vpack.c.bf16 %v5780_v50, %v5779_v59  ;;  %v5674_v54 = vadd.f32 %v5673_v38, %v5585_v13 }
 0x476   : > { %7743 = vst [vmem:[%s8430_s12 + $0x1d8] sm:$0xff] %v7663_v16   ;;  %v5717_v5 = vmul.f32 %v9738_v29, %v5674_v54 }
 0x478   : > { %v5749_v62 = vadd.f32 %v9772_v10, %v5717_v5 }
 0x479   : > { %v5586_v26 = vpop.f32.mrf.mxu2  ;;  %v5411_v39 = vpop.f32.mrf.mxu0 }
 0x47a   : > { %v5675_v12 = vpop.f32.mrf.mxu3  ;;  %v5587_v57 = vadd.f32 %v5586_v26, %v5498_v9  ;;  %v5500_v31 = vpop.f32.mrf.mxu1  ;;  %v5781_v15 = vmax.f32 %v5749_v62, 0.0 }
 0x47b   : > { %v5501_v21 = vadd.f32 %v5500_v31, %v5411_v39 }
 0x47c   : > { %v5676_v37 = vadd.f32 %v5675_v12, %v5587_v57 }
 0x47e   : > { %v5718_v28 = vmul.f32 %v9738_v29, %v5676_v37 }
 0x480   : > { %v5750_v25 = vadd.f32 %v9772_v10, %v5718_v28 }
 0x481   : > { %v5589_v45 = vpop.f32.mrf.mxu2  ;;  %v5413_v33 = vpop.f32.mrf.mxu0 }
 0x482   : > { %v5678_v41 = vpop.f32.mrf.mxu3  ;;  %v5782_v22 = vmax.f32 %v5750_v25, 0.0  ;;  %v5590_v20 = vadd.f32 %v5589_v45, %v5501_v21  ;;  %v5502_v51 = vpop.f32.mrf.mxu1 }
 0x483   : > { %v5503_v55 = vadd.f32 %v5502_v51, %v5413_v33 }
 0x484   : > { %v7668_v43 = vpack.c.bf16 %v5782_v22, %v5781_v15  ;;  %v5679_v2 = vadd.f32 %v5678_v41, %v5590_v20 }
 0x486   : > { %7744 = vst [vmem:[%s8430_s12 + $0x1e0] sm:$0xff] %v7668_v43   ;;  %v5719_v48 = vmul.f32 %v9738_v29, %v5679_v2 }
 0x488   : > { %v5751_v18 = vadd.f32 %v9772_v10, %v5719_v48 }
 0x489   : > { %v5591_v24 = vpop.f32.mrf.mxu2  ;;  %v5416_v53 = vpop.f32.mrf.mxu0 }
 0x48a   : > { %v5680_v61 = vpop.f32.mrf.mxu3  ;;  %v5592_v6 = vadd.f32 %v5591_v24, %v5503_v55  ;;  %v5505_v35 = vpop.f32.mrf.mxu1  ;;  %v5783_v3 = vmax.f32 %v5751_v18, 0.0 }
 0x48b   : > { %v5506_v30 = vadd.f32 %v5505_v35, %v5416_v53 }
 0x48c   : > { %v5681_v14 = vadd.f32 %v5680_v61, %v5592_v6 }
 0x48e   : > { %v5720_v56 = vmul.f32 %v9738_v29, %v5681_v14 }
 0x490   : > { %v5752_v63 = vadd.f32 %v9772_v10, %v5720_v56 }
 0x491   : > { %v5594_v8 = vpop.f32.mrf.mxu2  ;;  %v5418_v34 = vpop.f32.mrf.mxu0 }
 0x492   : > { %v5683_v0 = vpop.f32.mrf.mxu3  ;;  %v5784_v32 = vmax.f32 %v5752_v63, 0.0  ;;  %v5595_v4 = vadd.f32 %v5594_v8, %v5506_v30  ;;  %v5507_v52 = vpop.f32.mrf.mxu1 }
 0x493   : > { %v5508_v27 = vadd.f32 %v5507_v52, %v5418_v34 }
 0x494   : > { %v7673_v11 = vpack.c.bf16 %v5784_v32, %v5783_v3  ;;  %v5684_v36 = vadd.f32 %v5683_v0, %v5595_v4 }
 0x496   : > { %7745 = vst [vmem:[%s8430_s12 + $0x1e8] sm:$0xff] %v7673_v11   ;;  %v5721_v58 = vmul.f32 %v9738_v29, %v5684_v36 }
 0x498   : > { %v5753_v1 = vadd.f32 %v9772_v10, %v5721_v58 }
 0x499   : > { %v5596_v19 = vpop.f32.mrf.mxu2  ;;  %v5421_v42 = vpop.f32.mrf.mxu0 }
 0x49a   : > { %v5685_v60 = vpop.f32.mrf.mxu3  ;;  %v5597_v47 = vadd.f32 %v5596_v19, %v5508_v27  ;;  %v5510_v40 = vpop.f32.mrf.mxu1  ;;  %v5785_v50 = vmax.f32 %v5753_v1, 0.0 }
 0x49b   : > { %v5511_v17 = vadd.f32 %v5510_v40, %v5421_v42 }
 0x49c   : > { %v5686_v23 = vadd.f32 %v5685_v60, %v5597_v47 }
 0x49e   : > { %v5722_v49 = vmul.f32 %v9738_v29, %v5686_v23 }
 0x4a0   : > { %v5754_v46 = vadd.f32 %v9772_v10, %v5722_v49 }
 0x4a1   : > { %v5599_v38 = vpop.f32.mrf.mxu2  ;;  %v5423_v16 = vpop.f32.mrf.mxu0 }
 0x4a2   : > { %v5688_v59 = vpop.f32.mrf.mxu3  ;;  %v5786_v13 = vmax.f32 %v5754_v46, 0.0  ;;  %v5600_v7 = vadd.f32 %v5599_v38, %v5511_v17  ;;  %v5512_v54 = vpop.f32.mrf.mxu1 }
 0x4a3   : > { %v5513_v26 = vadd.f32 %v5512_v54, %v5423_v16 }
 0x4a4   : > { %v7678_v44 = vpack.c.bf16 %v5786_v13, %v5785_v50  ;;  %v5689_v9 = vadd.f32 %v5688_v59, %v5600_v7 }
 0x4a6   : > { %7746 = vst [vmem:[%s8430_s12 + $0x1f0] sm:$0xff] %v7678_v44   ;;  %v5723_v5 = vmul.f32 %v9738_v29, %v5689_v9 }
 0x4a8   : > { %v5755_v37 = vadd.f32 %v9772_v10, %v5723_v5 }
 0x4a9   : > { %v5601_v12 = vpop.f32.mrf.mxu2 }
 0x4aa   : > { %v5602_v57 = vadd.f32 %v5601_v12, %v5513_v26  ;;  %v5690_v39 = vpop.f32.mrf.mxu3  ;;  %v5787_v21 = vmax.f32 %v5755_v37, 0.0 }
 0x4ac   : > { %v5691_v31 = vadd.f32 %v5690_v39, %v5602_v57 }
 0x4ae   : > { %v5724_v62 = vmul.f32 %v9738_v29, %v5691_v31 }
 0x4b0   : > { %v5756_v28 = vadd.f32 %v9772_v10, %v5724_v62 }
 0x4b2   : > { %v5788_v25 = vmax.f32 %v5756_v28, 0.0 }
 0x4b4   : > { %v7683_v45 = vpack.c.bf16 %v5788_v25, %v5787_v21 }
 0x4b6   : > { %7747 = vst [vmem:[%s8430_s12 + $0x1f8] sm:$0xff] %v7683_v45  }
 0x4b7 PF: > { %s14_s17 = sadd.s32 1, %s7919_s17   ;;  %s9906_s15 = smov %s7915_s16 }
 0x4b8   : > { %p11_p6 = scmp.ge.s32.totalorder %s14_s17, 4   ;;  %s9907_s16 = smov %s9909_s18 }
 0x4ba   :  { %13 = sbr.rel (!%p11_p6) target bundleno = 2 (0x2), region = 84 }

</bundles_post_ra>
